<compile_context>
chip_gen: v7x
topology: tpu7x:2x2x1
jax: 0.10.0
libtpu: 0.0.40
codegen_flags: <defaults>
</compile_context>

<pallas_src>
import functools
import math

import jax
import jax.numpy as jnp
from jax import lax
from jax.experimental import pallas as pl
from jax.experimental.pallas import tpu as pltpu

_MiB = 1024 * 1024


def _round_up(x, m):
    return ((x + m - 1) // m) * m


def _tile_and_vmem(hw_pad, thw, de, do_, out_ch, n_score):
    """Pick a lane-dense query tile (multiple of 128) and a VMEM limit.

    Budgeted against v7x's 64 MiB/TC VMEM (the tightest generation); on
    v5e/v6e (128 MiB) the same choice simply leaves headroom.
    """
    f32, bf16 = 4, 2

    def est(t):
        resident = 2 * (de + do_) * thw * f32       # mk + mv (double-buffered f32)
        resident += (de + do_) * thw * bf16         # in-kernel bf16 copies of mk/mv
        resident += 2 * de * de * f32               # linear_e weight (tiny)
        stream = 2 * (de + do_) * t * f32           # qk / q_out tiles (double-buffered)
        stream += 2 * out_ch * t * f32              # output tiles (double-buffered)
        inter = n_score * thw * t * f32             # score / exp intermediates
        inter += 2 * do_ * t * f32                  # f32 accumulators
        return resident + stream + inter

    budget = 48 * _MiB
    tile = 128
    # 256 first: fills the 256-wide MXU on v6e/v7x and keeps the f32 score
    # intermediate / spill pressure low on v5e (1 vst slot, no bf16 VALU).
    for t in (256, 512, 128):
        if hw_pad % t == 0 and est(t) <= budget:
            tile = t
            break
    vmem_limit = int(min(64 * _MiB, max(2 * est(tile), 32 * _MiB)))
    return tile, vmem_limit


def _pad_last(x, new_last):
    pad = new_last - x.shape[-1]
    if pad == 0:
        return x
    return jnp.pad(x, [(0, 0)] * (x.ndim - 1) + [(0, pad)])


# ---------------------------------------------------------------------------
# Shared kernel math: softmax over the memory axis (axis 0), then V_m @ p.
# ---------------------------------------------------------------------------
def _softmax_value(s, mv_bf16, out_dtype):
    m = jnp.max(s, axis=0, keepdims=True)
    e = jnp.exp(s - m)                                        # f32
    # Exact reciprocal: only a (1, hw_t) row, approx buys nothing here.
    r = pl.reciprocal(jnp.sum(e, axis=0, keepdims=True), approx=False)
    acc = jnp.dot(mv_bf16, e.astype(jnp.bfloat16),
                  preferred_element_type=jnp.float32)         # (Do, hw_t) f32
    return (acc * r).astype(out_dtype)                        # fold 1/sum after bmm


# ---------------------------------------------------------------------------
# Kernel 1: memory read + cat([mem_mean, q_out]) (Memory.forward, T == 1)
# ---------------------------------------------------------------------------
def _read_kernel(mk_ref, qk_ref, mv_ref, qo_ref, out_ref, *, scale, do):
    # mk: (De, THW) f32   qk: (De, hw_t) f32   mv: (Do, THW) f32
    # qo: (Do, hw_t) f32  out: (2*Do, hw_t)
    mk = mk_ref[...].astype(jnp.bfloat16)     # per-tile VPU cast, hidden under MXU
    mv = mv_ref[...].astype(jnp.bfloat16)
    qk = (qk_ref[...] * scale).astype(jnp.bfloat16)   # fold 1/sqrt(De) into qk
    # s[m, q] = sum_d mk[d, m] * qk[d, q] : De contraction, transposed lhs.
    # TODO(synk): verify on v6e/v7x bundles this does not emit a per-step vxpose
    # of the resident mk tile; if it does, pre-transpose mk once per batch item.
    s = lax.dot_general(mk, qk, (((0,), (0,)), ((), ())),
                        preferred_element_type=jnp.float32)   # (THW, hw_t) f32
    out_ref[:do, :] = _softmax_value(s, mv, out_ref.dtype)    # mem_mean channels
    out_ref[do:, :] = qo_ref[...].astype(out_ref.dtype)       # concat q_out in-kernel


# ---------------------------------------------------------------------------
# Kernel 2: Memory.generate_edge (linear_e reassociated onto the query side)
# ---------------------------------------------------------------------------
def _edge_kernel(wt_ref, mk_ref, qk_ref, mv_ref, out_ref):
    # wt = W^T (De, De); p = (mk^T @ W^T) @ qk == mk^T @ (W^T @ qk)
    mk = mk_ref[...].astype(jnp.bfloat16)
    mv = mv_ref[...].astype(jnp.bfloat16)
    qk = qk_ref[...].astype(jnp.bfloat16)
    wt = wt_ref[...].astype(jnp.bfloat16)
    wq = jnp.dot(wt, qk, preferred_element_type=jnp.float32).astype(jnp.bfloat16)
    s = lax.dot_general(mk, wq, (((0,), (0,)), ((), ())),
                        preferred_element_type=jnp.float32)   # (HW, hw_t) f32
    out_ref[...] = _softmax_value(s, mv, out_ref.dtype)


# ---------------------------------------------------------------------------
# Kernel 3: fused memory read + edge feature, sharing the resident mk/mv tiles
# ---------------------------------------------------------------------------
def _fused_kernel(wt_ref, mk_ref, qk_ref, mv_ref, qo_ref, mem_ref, edge_ref,
                  *, scale, do):
    mk = mk_ref[...].astype(jnp.bfloat16)     # (De, HW) resident across j
    mv = mv_ref[...].astype(jnp.bfloat16)     # (Do, HW) resident across j
    qk_f32 = qk_ref[...]                      # (De, hw_t) f32
    # --- space-time memory read --------------------------------------------
    qk_s = (qk_f32 * scale).astype(jnp.bfloat16)
    s_mem = lax.dot_general(mk, qk_s, (((0,), (0,)), ((), ())),
                            preferred_element_type=jnp.float32)
    mem_ref[:do, :] = _softmax_value(s_mem, mv, mem_ref.dtype)
    mem_ref[do:, :] = qo_ref[...].astype(mem_ref.dtype)
    # --- graph edge feature (generate_edge) ---------------------------------
    wt = wt_ref[...].astype(jnp.bfloat16)
    wq = jnp.dot(wt, qk_f32.astype(jnp.bfloat16),
                 preferred_element_type=jnp.float32).astype(jnp.bfloat16)
    s_edge = lax.dot_general(mk, wq, (((0,), (0,)), ((), ())),
                             preferred_element_type=jnp.float32)
    edge_ref[...] = _softmax_value(s_edge, mv, edge_ref.dtype)


# ---------------------------------------------------------------------------
# Wrappers
# ---------------------------------------------------------------------------
def memory_forward(m_in, m_out, q_in, q_out):
    """Memory.forward (exact for T == 1, the early-return path in PyTorch).

    m_in: (B, De, T, H, W)  m_out: (B, Do, T, H, W)
    q_in: (B, De, H, W)     q_out: (B, Do, H, W)
    returns (cat([mem_mean, q_out], dim=1): (B, 2*Do, H, W), 10)
    """
    B, De, T, H, W = m_in.shape
    Do = m_out.shape[1]
    if T >= 2:
        # TODO(synk): T > 1 graph propagation needs ConvGRU.ConvGRUCell
        # (external dependency, undefined in the reference source).
        raise NotImplementedError("T > 1 path needs ConvGRU (external dependency)")
    THW, HW = T * H * W, H * W
    HWp = _round_up(HW, 128)

    mk = m_in.reshape(B, De, THW)
    mv = m_out.reshape(B, Do, THW)
    qk = _pad_last(q_in.reshape(B, De, HW), HWp)
    qo = _pad_last(q_out.reshape(B, Do, HW), HWp)

    hw_t, vmem_limit = _tile_and_vmem(HWp, THW, De, Do, out_ch=2 * Do, n_score=2)
    grid = (B, HWp // hw_t)

    out = pl.pallas_call(
        functools.partial(_read_kernel, scale=1.0 / math.sqrt(De), do=Do),
        out_shape=jax.ShapeDtypeStruct((B, 2 * Do, HWp), q_out.dtype),
        grid=grid,
        in_specs=[
            # memory keys/values stay resident across the query-tile axis
            pl.BlockSpec((None, De, THW), lambda b, j: (b, 0, 0)),
            pl.BlockSpec((None, De, hw_t), lambda b, j: (b, 0, j)),
            pl.BlockSpec((None, Do, THW), lambda b, j: (b, 0, 0)),
            pl.BlockSpec((None, Do, hw_t), lambda b, j: (b, 0, j)),
        ],
        out_specs=pl.BlockSpec((None, 2 * Do, hw_t), lambda b, j: (b, 0, j)),
        compiler_params=pltpu.CompilerParams(
            dimension_semantics=("parallel", "parallel"),
            vmem_limit_bytes=vmem_limit),
    )(mk, qk, mv, qo)
    return out[:, :, :HW].reshape(B, 2 * Do, H, W), 10


def generate_edge(m_in, m_out, q_in, linear_e_weight):
    """Memory.generate_edge.

    m_in: (B, De, H, W)  m_out: (B, Do, H, W)  q_in: (B, De, H, W)
    linear_e_weight: (De, De) torch Linear weight (out, in);  y = x @ W.T
    """
    B, De, H, W = m_in.shape
    Do = m_out.shape[1]
    HW = H * W
    HWp = _round_up(HW, 128)

    mk = m_in.reshape(B, De, HW)
    mv = m_out.reshape(B, Do, HW)
    qk = _pad_last(q_in.reshape(B, De, HW), HWp)
    wt = linear_e_weight.T                     # kernel computes wq = W^T @ qk

    hw_t, vmem_limit = _tile_and_vmem(HWp, HW, De, Do, out_ch=Do, n_score=2)
    grid = (B, HWp // hw_t)

    out = pl.pallas_call(
        _edge_kernel,
        out_shape=jax.ShapeDtypeStruct((B, Do, HWp), q_in.dtype),
        grid=grid,
        in_specs=[
            pl.BlockSpec((De, De), lambda b, j: (0, 0)),
            pl.BlockSpec((None, De, HW), lambda b, j: (b, 0, 0)),
            pl.BlockSpec((None, De, hw_t), lambda b, j: (b, 0, j)),
            pl.BlockSpec((None, Do, HW), lambda b, j: (b, 0, 0)),
        ],
        out_specs=pl.BlockSpec((None, Do, hw_t), lambda b, j: (b, 0, j)),
        compiler_params=pltpu.CompilerParams(
            dimension_semantics=("parallel", "parallel"),
            vmem_limit_bytes=vmem_limit),
    )(wt, mk, qk, mv)
    return out[:, :, :HW].reshape(B, Do, H, W)


def memory_forward_with_edge(m_in, m_out, q_in, q_out, linear_e_weight):
    """Fused Memory.forward (T == 1) + Memory.generate_edge in one pallas_call.

    Shares the resident mk/mv tiles and the streamed qk tile between the two
    attention passes: halves HBM reads of mv (the largest tensor) and of mk/qk
    and removes one launch versus memory_forward + generate_edge.
    Returns (mem_out (B, 2*Do, H, W), 10, edge (B, Do, H, W)).
    """
    B, De, T, H, W = m_in.shape
    assert T == 1, "fused path covers the T == 1 early-return branch"
    Do = m_out.shape[1]
    HW = H * W
    HWp = _round_up(HW, 128)

    mk = m_in.reshape(B, De, HW)
    mv = m_out.reshape(B, Do, HW)
    qk = _pad_last(q_in.reshape(B, De, HW), HWp)
    qo = _pad_last(q_out.reshape(B, Do, HW), HWp)
    wt = linear_e_weight.T

    hw_t, vmem_limit = _tile_and_vmem(HWp, HW, De, Do, out_ch=3 * Do, n_score=4)
    grid = (B, HWp // hw_t)

    mem, edge = pl.pallas_call(
        functools.partial(_fused_kernel, scale=1.0 / math.sqrt(De), do=Do),
        out_shape=(jax.ShapeDtypeStruct((B, 2 * Do, HWp), q_out.dtype),
                   jax.ShapeDtypeStruct((B, Do, HWp), q_in.dtype)),
        grid=grid,
        in_specs=[
            pl.BlockSpec((De, De), lambda b, j: (0, 0)),
            pl.BlockSpec((None, De, HW), lambda b, j: (b, 0, 0)),
            pl.BlockSpec((None, De, hw_t), lambda b, j: (b, 0, j)),
            pl.BlockSpec((None, Do, HW), lambda b, j: (b, 0, 0)),
            pl.BlockSpec((None, Do, hw_t), lambda b, j: (b, 0, j)),
        ],
        out_specs=(pl.BlockSpec((None, 2 * Do, hw_t), lambda b, j: (b, 0, j)),
                   pl.BlockSpec((None, Do, hw_t), lambda b, j: (b, 0, j))),
        compiler_params=pltpu.CompilerParams(
            dimension_semantics=("parallel", "parallel"),
            vmem_limit_bytes=vmem_limit),
    )(wt, mk, qk, mv, qo)
    mem_out = mem[:, :, :HW].reshape(B, 2 * Do, H, W)
    edge_out = edge[:, :, :HW].reshape(B, Do, H, W)
    return mem_out, 10, edge_out


# ---------------------------------------------------------------------------
# Pure-JAX f32 references (for the numerical sanity check)
# ---------------------------------------------------------------------------
def _memory_read_ref(m_key, m_val, q_key):
    B, De, T, H, W = m_key.shape
    Do = m_val.shape[1]
    THW, HW = T * H * W, H * W
    mkT = jnp.transpose(m_key.reshape(B, De, THW), (0, 2, 1))
    qk = q_key.reshape(B, De, HW)
    p = jnp.einsum('bmd,bdq->bmq', mkT, qk) / math.sqrt(De)
    p = jax.nn.softmax(p, axis=1)
    mem = jnp.einsum('bom,bmq->boq', m_val.reshape(B, Do, THW), p)
    return mem.reshape(B, Do, H, W)


def _edge_ref(m_in, m_out, q_in, w):
    B, De, H, W = m_in.shape
    Do = m_out.shape[1]
    HW = H * W
    miT = jnp.transpose(m_in.reshape(B, De, HW), (0, 2, 1))    # (B, HW, De)
    mi = miT @ w.T                                             # linear_e
    qi = q_in.reshape(B, De, HW)
    p = jnp.einsum('bmd,bdq->bmq', mi, qi)
    p = jax.nn.softmax(p, axis=1)
    mem = jnp.einsum('bom,bmq->boq', m_out.reshape(B, Do, HW), p)
    return mem.reshape(B, Do, H, W)


if __name__ == "__main__":
    key = jax.random.PRNGKey(0)
    k1, k2, k3, k4, k5 = jax.random.split(key, 5)

    # Module-implied dims: keydim=128, valdim=512 (KeyValue heads of graph_memory).
    B = 2          # total number of objects (sum over batch) fed to Memory
    D_e, D_o = 128, 512
    T, H, W = 1, 16, 16

    m_in = jax.random.normal(k1, (B, D_e, T, H, W), dtype=jnp.float32)   # memory keys
    m_out = jax.random.normal(k2, (B, D_o, T, H, W), dtype=jnp.float32)  # memory values
    q_in = jax.random.normal(k3, (B, D_e, H, W), dtype=jnp.float32)      # query keys
    q_out = jax.random.normal(k4, (B, D_o, H, W), dtype=jnp.float32)     # query values

    # Deterministic synthetic parameter for linear_e (nn.Linear(128, 128, bias=False)).
    linear_e_w = 0.02 * jax.random.normal(k5, (D_e, D_e), dtype=jnp.float32)

    # Fused path: Memory.forward (T == 1) + Memory.generate_edge in one launch.
    mem_out, viz, edge = memory_forward_with_edge(m_in, m_out, q_in, q_out, linear_e_w)

    # Standalone paths (the module also uses them independently).
    mem_out_s, viz_s = memory_forward(m_in, m_out, q_in, q_out)
    edge_s = generate_edge(m_in[:, :, 0], m_out[:, :, 0], q_in, linear_e_w)

    jax.block_until_ready((mem_out, edge, mem_out_s, edge_s))

    assert mem_out.shape == (B, 2 * D_o, H, W)
    assert edge.shape == (B, D_o, H, W)
    assert viz == 10 and viz_s == 10

    # Back half of the concat output is a straight copy of q_out.
    assert float(jnp.max(jnp.abs(mem_out[:, D_o:] - q_out))) < 1e-6

    # Fused and standalone kernels compute the same math.
    assert float(jnp.max(jnp.abs(mem_out - mem_out_s))) < 2e-3
    assert float(jnp.max(jnp.abs(edge - edge_s))) < 2e-3

    # Loose numerical check vs f32 references (bf16 MXU operands => small epsilon).
    ref_mem = _memory_read_ref(m_in, m_out, q_in)
    ref_edge = _edge_ref(m_in[:, :, 0], m_out[:, :, 0], q_in, linear_e_w)
    got_mem = mem_out[:, :D_o]
    err_mem = float(jnp.max(jnp.abs(got_mem - ref_mem)))
    err_edge = float(jnp.max(jnp.abs(edge - ref_edge)))
    tol_mem = 0.05 + 0.05 * float(jnp.max(jnp.abs(ref_mem)))
    tol_edge = 0.05 + 0.05 * float(jnp.max(jnp.abs(ref_edge)))
    assert err_mem < tol_mem, (err_mem, tol_mem)
    assert err_edge < tol_edge, (err_edge, tol_edge)

    print("KERNEL_OK")
</pallas_src>

<mosaic_0001>
module attributes {stable_mosaic.version = 11 : i64} {
  func.func @_fused_kernel(%arg0: i32, %arg1: i32, %arg2: memref<128x128xf32, #tpu.memory_space<vmem>>, %arg3: memref<1x128x256xf32, #tpu.memory_space<vmem>>, %arg4: memref<1x128x256xf32, #tpu.memory_space<vmem>>, %arg5: memref<1x512x256xf32, #tpu.memory_space<vmem>>, %arg6: memref<1x512x256xf32, #tpu.memory_space<vmem>>, %arg7: memref<1x1024x256xf32, #tpu.memory_space<vmem>>, %arg8: memref<1x512x256xf32, #tpu.memory_space<vmem>>) attributes {dimension_semantics = [#tpu.dimension_semantics<parallel>, #tpu.dimension_semantics<parallel>], iteration_bounds = array<i64: 2, 1>, scalar_prefetch = 0 : i64, scratch_operands = 0 : i64, tpu.core_type = #tpu.core_type<tc>, window_params = [{pipeline_mode = #tpu.pipeline_mode<synchronous>, transform_indices = @transform_0, window_bounds = array<i64: 128, 128>}, {transform_indices = @transform_1, window_bounds = array<i64: 1, 128, 256>}, {transform_indices = @transform_2, window_bounds = array<i64: 1, 128, 256>}, {transform_indices = @transform_3, window_bounds = array<i64: 1, 512, 256>}, {transform_indices = @transform_4, window_bounds = array<i64: 1, 512, 256>}, {transform_indices = @transform_5, window_bounds = array<i64: 1, 1024, 256>}, {transform_indices = @transform_6, window_bounds = array<i64: 1, 512, 256>}]} {
    %c0 = arith.constant 0 : index
    %c0_0 = arith.constant 0 : index
    %c0_1 = arith.constant 0 : index
    %0 = vector.load %arg3[%c0, %c0_0, %c0_1] : memref<1x128x256xf32, #tpu.memory_space<vmem>>, vector<1x128x256xf32>
    %1 = vector.shape_cast %0 : vector<1x128x256xf32> to vector<128x256xf32>
    %2 = arith.truncf %1 : vector<128x256xf32> to vector<128x256xbf16>
    %c0_2 = arith.constant 0 : index
    %c0_3 = arith.constant 0 : index
    %c0_4 = arith.constant 0 : index
    %3 = vector.load %arg5[%c0_2, %c0_3, %c0_4] : memref<1x512x256xf32, #tpu.memory_space<vmem>>, vector<1x512x256xf32>
    %4 = vector.shape_cast %3 : vector<1x512x256xf32> to vector<512x256xf32>
    %5 = arith.truncf %4 : vector<512x256xf32> to vector<512x256xbf16>
    %c0_5 = arith.constant 0 : index
    %c0_6 = arith.constant 0 : index
    %c0_7 = arith.constant 0 : index
    %6 = vector.load %arg4[%c0_5, %c0_6, %c0_7] : memref<1x128x256xf32, #tpu.memory_space<vmem>>, vector<1x128x256xf32>
    %7 = vector.shape_cast %6 : vector<1x128x256xf32> to vector<128x256xf32>
    %cst = arith.constant 0.0883883461 : f32
    %8 = vector.broadcast %cst : f32 to vector<128x256xf32>
    %9 = arith.mulf %7, %8 : vector<128x256xf32>
    %10 = arith.truncf %9 : vector<128x256xf32> to vector<128x256xbf16>
    %cst_8 = arith.constant dense<0.000000e+00> : vector<256x256xf32>
    %11 = tpu.matmul %2, %10, %cst_8 {dimension_numbers = #tpu.dot_dimension_numbers<[0], [0], [1], [1], [0, 1, 1, 1], [], []>} : vector<128x256xbf16>, vector<128x256xbf16>, vector<256x256xf32> -> vector<256x256xf32>
    %cst_9 = arith.constant dense<0xFF800000> : vector<256xf32>
    %12 = vector.multi_reduction <maximumf>, %11, %cst_9 [0] : vector<256x256xf32> to vector<256xf32>
    %13 = vector.shape_cast %12 : vector<256xf32> to vector<1x256xf32>
    %14 = vector.broadcast %13 : vector<1x256xf32> to vector<256x256xf32>
    %15 = arith.subf %11, %14 : vector<256x256xf32>
    %16 = math.exp %15 : vector<256x256xf32>
    %cst_10 = arith.constant dense<0.000000e+00> : vector<256xf32>
    %17 = vector.multi_reduction <add>, %16, %cst_10 [0] : vector<256x256xf32> to vector<256xf32>
    %18 = vector.shape_cast %17 : vector<256xf32> to vector<1x256xf32>
    %19 = tpu.reciprocal %18 : vector<1x256xf32> -> vector<1x256xf32>
    %20 = arith.truncf %16 : vector<256x256xf32> to vector<256x256xbf16>
    %cst_11 = arith.constant dense<0.000000e+00> : vector<512x256xf32>
    %21 = tpu.matmul %5, %20, %cst_11 {dimension_numbers = #tpu.dot_dimension_numbers<[1], [0], [0], [1], [0, 0, 1, 1], [], []>} : vector<512x256xbf16>, vector<256x256xbf16>, vector<512x256xf32> -> vector<512x256xf32>
    %22 = vector.broadcast %19 : vector<1x256xf32> to vector<512x256xf32>
    %23 = arith.mulf %21, %22 : vector<512x256xf32>
    %c0_12 = arith.constant 0 : index
    %c0_13 = arith.constant 0 : index
    %c0_14 = arith.constant 0 : index
    %24 = vector.load %arg7[%c0_12, %c0_13, %c0_14] : memref<1x1024x256xf32, #tpu.memory_space<vmem>>, vector<1x512x256xf32>
    %25 = vector.shape_cast %24 : vector<1x512x256xf32> to vector<512x256xf32>
    %26 = vector.shape_cast %23 : vector<512x256xf32> to vector<1x512x256xf32>
    tpu.vector_store %arg7[%c0_12, %c0_13, %c0_14], %26 {strides = array<i32>} : memref<1x1024x256xf32, #tpu.memory_space<vmem>>, vector<1x512x256xf32>,
    %c0_15 = arith.constant 0 : index
    %c0_16 = arith.constant 0 : index
    %c0_17 = arith.constant 0 : index
    %27 = vector.load %arg6[%c0_15, %c0_16, %c0_17] : memref<1x512x256xf32, #tpu.memory_space<vmem>>, vector<1x512x256xf32>
    %28 = vector.shape_cast %27 : vector<1x512x256xf32> to vector<512x256xf32>
    %c0_18 = arith.constant 0 : index
    %c512 = arith.constant 512 : index
    %c0_19 = arith.constant 0 : index
    %29 = vector.load %arg7[%c0_18, %c512, %c0_19] : memref<1x1024x256xf32, #tpu.memory_space<vmem>>, vector<1x512x256xf32>
    %30 = vector.shape_cast %29 : vector<1x512x256xf32> to vector<512x256xf32>
    %31 = vector.shape_cast %28 : vector<512x256xf32> to vector<1x512x256xf32>
    tpu.vector_store %arg7[%c0_18, %c512, %c0_19], %31 {strides = array<i32>} : memref<1x1024x256xf32, #tpu.memory_space<vmem>>, vector<1x512x256xf32>,
    %c0_20 = arith.constant 0 : index
    %c0_21 = arith.constant 0 : index
    %32 = vector.load %arg2[%c0_20, %c0_21] : memref<128x128xf32, #tpu.memory_space<vmem>>, vector<128x128xf32>
    %33 = arith.truncf %32 : vector<128x128xf32> to vector<128x128xbf16>
    %34 = arith.truncf %7 : vector<128x256xf32> to vector<128x256xbf16>
    %cst_22 = arith.constant dense<0.000000e+00> : vector<128x256xf32>
    %35 = tpu.matmul %33, %34, %cst_22 {dimension_numbers = #tpu.dot_dimension_numbers<[1], [0], [0], [1], [0, 0, 1, 1], [], []>} : vector<128x128xbf16>, vector<128x256xbf16>, vector<128x256xf32> -> vector<128x256xf32>
    %36 = arith.truncf %35 : vector<128x256xf32> to vector<128x256xbf16>
    %cst_23 = arith.constant dense<0.000000e+00> : vector<256x256xf32>
    %37 = tpu.matmul %2, %36, %cst_23 {dimension_numbers = #tpu.dot_dimension_numbers<[0], [0], [1], [1], [0, 1, 1, 1], [], []>} : vector<128x256xbf16>, vector<128x256xbf16>, vector<256x256xf32> -> vector<256x256xf32>
    %cst_24 = arith.constant dense<0xFF800000> : vector<256xf32>
    %38 = vector.multi_reduction <maximumf>, %37, %cst_24 [0] : vector<256x256xf32> to vector<256xf32>
    %39 = vector.shape_cast %38 : vector<256xf32> to vector<1x256xf32>
    %40 = vector.broadcast %39 : vector<1x256xf32> to vector<256x256xf32>
    %41 = arith.subf %37, %40 : vector<256x256xf32>
    %42 = math.exp %41 : vector<256x256xf32>
    %cst_25 = arith.constant dense<0.000000e+00> : vector<256xf32>
    %43 = vector.multi_reduction <add>, %42, %cst_25 [0] : vector<256x256xf32> to vector<256xf32>
    %44 = vector.shape_cast %43 : vector<256xf32> to vector<1x256xf32>
    %45 = tpu.reciprocal %44 : vector<1x256xf32> -> vector<1x256xf32>
    %46 = arith.truncf %42 : vector<256x256xf32> to vector<256x256xbf16>
    %cst_26 = arith.constant dense<0.000000e+00> : vector<512x256xf32>
    %47 = tpu.matmul %5, %46, %cst_26 {dimension_numbers = #tpu.dot_dimension_numbers<[1], [0], [0], [1], [0, 0, 1, 1], [], []>} : vector<512x256xbf16>, vector<256x256xbf16>, vector<512x256xf32> -> vector<512x256xf32>
    %48 = vector.broadcast %45 : vector<1x256xf32> to vector<512x256xf32>
    %49 = arith.mulf %47, %48 : vector<512x256xf32>
    %c0_27 = arith.constant 0 : index
    %c0_28 = arith.constant 0 : index
    %c0_29 = arith.constant 0 : index
    %50 = vector.load %arg8[%c0_27, %c0_28, %c0_29] : memref<1x512x256xf32, #tpu.memory_space<vmem>>, vector<1x512x256xf32>
    %51 = vector.shape_cast %50 : vector<1x512x256xf32> to vector<512x256xf32>
    %52 = vector.shape_cast %49 : vector<512x256xf32> to vector<1x512x256xf32>
    tpu.vector_store %arg8[%c0_27, %c0_28, %c0_29], %52 {strides = array<i32>} : memref<1x512x256xf32, #tpu.memory_space<vmem>>, vector<1x512x256xf32>,
    return
  }
  func.func @transform_0(%arg0: i32, %arg1: i32) -> (i32, i32) {
    %c0_i32 = arith.constant 0 : i32
    %c0_i32_0 = arith.constant 0 : i32
    %c0_i32_1 = arith.constant 0 : i32
    return %c0_i32, %c0_i32_0 : i32, i32
  }
  func.func @transform_1(%arg0: i32, %arg1: i32) -> (i32, i32, i32) {
    %c0_i32 = arith.constant 0 : i32
    %c0_i32_0 = arith.constant 0 : i32
    %c0_i32_1 = arith.constant 0 : i32
    return %arg0, %c0_i32, %c0_i32_0 : i32, i32, i32
  }
  func.func @transform_2(%arg0: i32, %arg1: i32) -> (i32, i32, i32) {
    %c0_i32 = arith.constant 0 : i32
    %c0_i32_0 = arith.constant 0 : i32
    return %arg0, %c0_i32, %arg1 : i32, i32, i32
  }
  func.func @transform_3(%arg0: i32, %arg1: i32) -> (i32, i32, i32) {
    %c0_i32 = arith.constant 0 : i32
    %c0_i32_0 = arith.constant 0 : i32
    %c0_i32_1 = arith.constant 0 : i32
    return %arg0, %c0_i32, %c0_i32_0 : i32, i32, i32
  }
  func.func @transform_4(%arg0: i32, %arg1: i32) -> (i32, i32, i32) {
    %c0_i32 = arith.constant 0 : i32
    %c0_i32_0 = arith.constant 0 : i32
    return %arg0, %c0_i32, %arg1 : i32, i32, i32
  }
  func.func @transform_5(%arg0: i32, %arg1: i32) -> (i32, i32, i32) {
    %c0_i32 = arith.constant 0 : i32
    %c0_i32_0 = arith.constant 0 : i32
    return %arg0, %c0_i32, %arg1 : i32, i32, i32
  }
  func.func @transform_6(%arg0: i32, %arg1: i32) -> (i32, i32, i32) {
    %c0_i32 = arith.constant 0 : i32
    %c0_i32_0 = arith.constant 0 : i32
    return %arg0, %c0_i32, %arg1 : i32, i32, i32
  }
}

</mosaic_0001>

<bundles_post_ra>
// kernel: tpu_custom_call.1
= control target key start
LH: loop header
LB: loop body
LE: loop exit
PB: predicated region body
PF: predicated region fallthrough
CT: control target
= control target key end

     0   :  { %s7658_s0 = inlined_call_operand.hbm [shape: f32[128,128], index: 0, kind: input, shape index: {}]   ;;  %s7659_s1 = inlined_call_operand.hbm [shape: f32[2,128,256], index: 1, kind: input, shape index: {}]   ;;  %s7660_s2 = inlined_call_operand.hbm [shape: f32[2,128,256], index: 2, kind: input, shape index: {}]   ;;  %s7661_s3 = inlined_call_operand.hbm [shape: f32[2,512,256], index: 3, kind: input, shape index: {}]   ;;  %s7662_s4 = inlined_call_operand.hbm [shape: f32[2,512,256], index: 4, kind: input, shape index: {}]   ;;  %s7663_s5 = inlined_call_operand.hbm [shape: f32[2,1024,256], index: 5, kind: output, shape index: {0}]   ;;  %s7664_s6 = inlined_call_operand.hbm [shape: f32[2,512,256], index: 6, kind: output, shape index: {1}]  }
   0x1   :  { %7850 = sst [smem:[#allocation108_spill]] %s7659_s1 }
   0x2   :  { %7851 = sst [smem:[#allocation109_spill]] %s7661_s3 }
   0x3   :  { %12 = vsyncpa [#allocation3], 0 }
   0x4   :  { %13 = vsyncpa [#allocation6], 0 }
   0x5   :  { %15 = vsyncpa [#allocation6 + $0x1], 0 }
   0x6   :  { %16 = vsyncpa [#allocation9], 0 }
   0x7   :  { %18 = vsyncpa [#allocation9 + $0x1], 0 }
   0x8   :  { %19 = vsyncpa [#allocation4], 0 }
   0x9   :  { %21 = vsyncpa [#allocation4 + $0x1], 0 }
   0xa   :  { %22 = vsyncpa [#allocation13], 0 }
   0xb   :  { %24 = vsyncpa [#allocation13 + $0x1], 0  ;;  %s4593_s21 = smov 0   ;;  %s4595_s22 = smov 0  }
   0xc   :  { %s4597_s23 = smov 0   ;;  %s4599_s24 = smov 0  }
   0xd   :  { %s4601_s25 = smov 0   ;;  %s4603_s26 = smov 0  }
   0xe LB: > { %7852 = sst [smem:[#allocation19_spill]] %s4530_s23  ;;  %s42_s27 = sadd.s32 1, %s4538_s25  ;;  %s4542_s26 = sphi %s4603_s26, %s30_s26   ;;  %s4538_s25 = sphi %s4601_s25, %s8238_s25   ;;  %s4534_s24 = sphi %s4599_s24, %s8237_s24   ;;  %s4530_s23 = sphi %s4597_s23, %s8236_s23   ;;  %s4526_s22 = sphi %s4595_s22, %s8240_s22   ;;  %s4522_s21 = sphi %s4593_s21, %s8239_s21  }
   0xf   : > { %7853 = sst [smem:[#allocation20_spill]] %s4538_s25  ;;  %s70_s28 = sadd.s32 1, %s4530_s23 }
  0x10   : > { %7854 = sst [smem:[#allocation21_spill]] %s4542_s26  ;;  %p44_p0 = scmp.ge.s32.totalorder %s42_s27, 2 }
  0x11   : > { %p7665_p1 = scmp.ne.s32.totalorder %s4530_s23, %s4526_s22  ;;  %p78_p2 = scmp.eq.s32.totalorder %s4542_s26, 0 }
  0x12   : > { %s8242_s27 = smov (%p44_p0, %s42_s27), 0  ;;  %p3919_p5 = scmp.lt.s32.totalorder %s4542_s26, 2 }
  0x13   : > { %7855 = sst [smem:[#allocation22_spill]] %s8242_s27  ;;  %p79_p4 = por %p78_p2, %p7665_p1 }
  0x14   : > { %s67_s29 = ssub.s32 %s4538_s25, %s8242_s27  ;;  %s7666_s30 = sand.u32 1, %s4542_s26  }
  0x15   : > { %p68_p6 = scmp.eq.s32.totalorder %s67_s29, 0  ;;  %s260_s7 = sand.u32 1, %s4530_s23  }
  0x16   : > { %s3840_s8 = sshll.u32 %s4538_s25, 12  ;;  %s4645_s10 = sshll.u32 %s260_s7, 8 }
  0x17   : > { %s4641_s9 = scalar_select %p68_p6, %s4530_s23, %s70_s28  }
  0x18   : > { %s7857_s1 = sld [smem:[#allocation108_spill]]  ;;  %p4654_p7 = pnand %p3919_p5, %p79_p4 }
  0x19   : > { %7856 = sst [smem:[#allocation23_spill]] %s4641_s9  ;;  %s262_s15 = scalar_lea.vmem [#allocation5], %s4645_s10 }
  0x1a   : > { %s269_s16 = sshll.u32 %s262_s15, 4  ;;  %s4663_s17 = scalar_lea.sflag [#allocation6], %s7666_s30  ;;  %s4659_s16 = int_to_ptr.vmem [resolvable:$true] %s269_s16 }
  0x1b   : > { %p4669_p9 = pneg %p4654_p7 }
  0x1e   : > { %s4652_s13 = scalar_lea.hbm %s7857_s1, %s3840_s8  ;;  %s4277_s29 = scalar_lea.hbm %s7857_s1, 8192 }
  0x1f   : > { %s4272_s18 = scalar_lea.hbm %s4652_s13, 4096  ;;  %p4278_p12 = scmp.lt.u32.totalorder %s4652_s13, %s7857_s1 }
  0x20   : > { %p4273_p8 = scmp.ne.s32.totalorder %s4652_s13, %s4272_s18  ;;  %p4279_p13 = scmp.lt.u32.totalorder %s4277_s29, %s4272_s18 }
  0x21   : > { %p4281_p2 = scmp.lt.u32.totalorder %s4272_s18, %s4652_s13 }
  0x22   : > { %p4275_p10 = pnand %p4669_p9, %p4273_p8  ;;  %p4280_p0 = por %p4279_p13, %p4278_p12 }
  0x24   : > { %p4276_p11 = pneg %p4275_p10  ;;  %p4282_p4 = por %p4281_p2, %p4280_p0 }
  0x26   : > { %p4283_p5 = pnand %p4282_p4, %p4276_p11 }
  0x28   : > { %4286 = shalt.err (!%p4283_p5)
}
  0x29   : > { %s4287_s15 = scalar_lea.vmem %s4659_s16, 4096  ;;  %s4544_s20 = smov [#allocation5]  }
  0x2a   : > { %p4288_p6 = scmp.ne.s32.totalorder %s4659_s16, %s4287_s15  ;;  %s4292_s28 = sshll.u32 %s4544_s20, 4  ;;  %s4293_s28 = int_to_ptr.vmem [resolvable:$false] %s4292_s28 }
  0x2b   : > { %s4294_s11 = scalar_lea.vmem %s4293_s28, 8192  ;;  %p4295_p3 = scmp.lt.s32.totalorder %s4659_s16, %s4293_s28 }
  0x2c   : > { %p4290_p8 = pnand %p4288_p6, %p4669_p9  ;;  %p4296_p1 = scmp.lt.s32.totalorder %s4294_s11, %s4287_s15 }
  0x2e   : > { %p4291_p10 = pneg %p4290_p8  ;;  %p4297_p12 = por %p4296_p1, %p4295_p3 }
  0x30   : > { %p4298_p13 = pnand %p4297_p12, %p4291_p10 }
  0x32   : > { %4301 = shalt.err (!%p4298_p13)
}
  0x33   : > { %s7668_s18 = smov 256   ;;  %s7671_s29 = smov 16  }
  0x34   : > { %3901 = dma.hbm_to_vmem [thread:$0]  (!%p4654_p7), %s4652_s13, 4096, %s4659_s16, %s4663_s17, %s7668_s18, %s7668_s18, %s7671_s29  }
  0x35   : > { %s4701_s20 = scalar_lea.hbm %s7660_s2, %s3840_s8  ;;  %s4705_s28 = sshll.u32 %s260_s7, 10 }
  0x36   : > { %s7670_s11 = sshll.u32 %s4538_s25, 14  ;;  %s7860_s3 = sld [smem:[#allocation109_spill]] }
  0x37   : > { %s283_s13 = scalar_lea.vmem [#allocation7], %s4645_s10  ;;  %s306_s8 = scalar_lea.vmem [#allocation8], %s4705_s28 }
  0x38   : > { %s4716_s16 = sshll.u32 %s283_s13, 4  ;;  %s313_s12 = sshll.u32 %s306_s8, 4  ;;  %s4719_s12 = int_to_ptr.vmem [resolvable:$true] %s313_s12  ;;  %s4751_s16 = int_to_ptr.vmem [resolvable:$true] %s4716_s16 }
  0x39   : > { %s7861_s7 = sand.u32 1, %s4542_s26  }
  0x3a   : > { %s4723_s15 = scalar_lea.sflag [#allocation9], %s7861_s7 }
  0x3c   : > { %s4713_s27 = scalar_lea.hbm %s7860_s3, %s7670_s11  ;;  %s4307_s11 = scalar_lea.hbm %s7860_s3, 32768 }
  0x3d   : > { %s4302_s18 = scalar_lea.hbm %s4713_s27, 16384  ;;  %p4308_p0 = scmp.lt.u32.totalorder %s4713_s27, %s7860_s3 }
  0x3e   : > { %p4303_p1 = scmp.ne.s32.totalorder %s4713_s27, %s4302_s18  ;;  %p4309_p2 = scmp.lt.u32.totalorder %s4307_s11, %s4302_s18 }
  0x3f   : > { %p4311_p5 = scmp.lt.u32.totalorder %s4302_s18, %s4713_s27 }
  0x40   : > { %p4305_p3 = pnand %p4303_p1, %p4669_p9  ;;  %p4310_p4 = por %p4309_p2, %p4308_p0 }
  0x42   : > { %p4306_p11 = pneg %p4305_p3  ;;  %p4312_p6 = por %p4311_p5, %p4310_p4 }
  0x44   : > { %p4313_p8 = pnand %p4312_p6, %p4306_p11 }
  0x46   : > { %4316 = shalt.err (!%p4313_p8)
}
  0x47   : > { %s4317_s13 = scalar_lea.vmem %s4719_s12, 16384  ;;  %s4547_s8 = smov [#allocation8]  }
  0x48   : > { %p4318_p10 = scmp.ne.s32.totalorder %s4719_s12, %s4317_s13  ;;  %s4322_s7 = sshll.u32 %s4547_s8, 4  ;;  %s4323_s7 = int_to_ptr.vmem [resolvable:$false] %s4322_s7 }
  0x49   : > { %s4324_s29 = scalar_lea.vmem %s4323_s7, 32768  ;;  %p4325_p1 = scmp.lt.s32.totalorder %s4719_s12, %s4323_s7 }
  0x4a   : > { %p4320_p12 = pnand %p4318_p10, %p4669_p9  ;;  %p4326_p3 = scmp.lt.s32.totalorder %s4324_s29, %s4317_s13 }
  0x4c   : > { %p4321_p13 = pneg %p4320_p12  ;;  %p4327_p0 = por %p4326_p3, %p4325_p1 }
  0x4e   : > { %p4328_p2 = pnand %p4327_p0, %p4321_p13 }
  0x50   : > { %4331 = shalt.err (!%p4328_p2)
}
  0x51   : > { %s7862_s18 = smov 16   ;;  %s7863_s11 = smov 256  }
  0x52   : > { %3907 = dma.hbm_to_vmem [thread:$0]  (!%p4654_p7), %s4713_s27, 16384, %s4719_s12, %s4723_s15, %s7863_s11, %s7863_s11, %s7862_s18  }
  0x53   : > { %s327_s1 = scalar_lea.vmem [#allocation10], %s4705_s28  ;;  %s4755_s10 = sadd.s32 4294967295, %s4542_s26  }
  0x54   : > { %s336_s30 = sshll.u32 %s327_s1, 4  ;;  %s3808_s13 = sadd.s32 4294967294, %s4542_s26   ;;  %s4792_s30 = int_to_ptr.vmem [resolvable:$true] %s336_s30 }
  0x55   : > { %p83_p11 = scmp.ne.s32.totalorder %s4526_s22, %s4522_s21  ;;  %p7677_p4 = scmp.eq.s32.totalorder %s4755_s10, 0 }
  0x56   : > { %p191_p5 = scmp.eq.s32.totalorder %s4755_s10, 1  ;;  %p197_p6 = scmp.eq.s32.totalorder %s3808_s13, 1 }
  0x57   : > { %p4764_p8 = por %p7677_p4, %p83_p11  ;;  %p3809_p10 = scmp.ge.s32.totalorder %s4542_s26, 1 }
  0x58   : > { %p7865_p12 = scmp.ne.s32.totalorder %s4530_s23, %s4526_s22  ;;  %p4776_p1 = por %p197_p6, %p83_p11 }
  0x59   : > { %s7864_s27 = scalar_select %p4764_p8, 1, 0 }
  0x5a   : > { %p4772_p13 = por %p191_p5, %p7865_p12  ;;  %p232_p3 = scmp.lt.s32.totalorder %s4542_s26, 3 }
  0x5b   : > { %s7867_s12 = scalar_select %p4776_p1, 1, 0 }
  0x5c   : > { %s7866_s28 = scalar_select %p4772_p13, 1, 0 }
  0x5d   : > { %s7868_s8 = sshll.u32 %s4538_s25, 14  ;;  %p4788_p0 = pnand %p3809_p10, %p232_p3 }
  0x5e   : > { %s4786_s1 = scalar_lea.hbm %s7662_s4, %s7868_s8  ;;  %s4548_s3 = smov [#allocation2]  }
  0x5f   : > { %s7869_s13 = scalar_select %p4788_p0, 1, 0 }
  0x60   : > { %s244_s9 = sshll.u32 %s4548_s3, 4  ;;  %s4332_s25 = scalar_lea.hbm %s4701_s20, 4096  ;;  %s4796_s9 = int_to_ptr.vmem [resolvable:$true] %s244_s9 }
  0x61   : > { %p4333_p11 = scmp.ne.s32.totalorder %s4701_s20, %s4332_s25  ;;  %s4337_s29 = scalar_lea.hbm %s7660_s2, 8192 }
  0x62   : > { %p4338_p10 = scmp.lt.u32.totalorder %s4701_s20, %s7660_s2  ;;  %p4339_p12 = scmp.lt.u32.totalorder %s4337_s29, %s4332_s25 }
  0x63   : > { %p4335_p5 = pnand %p4333_p11, %p4669_p9  ;;  %p4341_p4 = scmp.lt.u32.totalorder %s4332_s25, %s4701_s20 }
  0x64   : > { %p4340_p3 = por %p4339_p12, %p4338_p10 }
  0x65   : > { %p4336_p6 = pneg %p4335_p5 }
  0x66   : > { %p4342_p1 = por %p4341_p4, %p4340_p3 }
  0x68   : > { %p4343_p2 = pnand %p4342_p1, %p4336_p6 }
  0x6a   : > { %4346 = shalt.err (!%p4343_p2)
}
  0x6b   : > { %s4347_s3 = scalar_lea.vmem %s4751_s16, 4096  ;;  %s4549_s8 = smov [#allocation7]  }
  0x6c   : > { %p4348_p11 = scmp.ne.s32.totalorder %s4751_s16, %s4347_s3  ;;  %s4352_s7 = sshll.u32 %s4549_s8, 4  ;;  %s4353_s7 = int_to_ptr.vmem [resolvable:$false] %s4352_s7 }
  0x6d   : > { %s4354_s23 = scalar_lea.vmem %s4353_s7, 8192  ;;  %p4355_p8 = scmp.lt.s32.totalorder %s4751_s16, %s4353_s7 }
  0x6e   : > { %p4350_p5 = pnand %p4348_p11, %p4669_p9  ;;  %p4356_p0 = scmp.lt.s32.totalorder %s4354_s23, %s4347_s3 }
  0x70   : > { %p4351_p13 = pneg %p4350_p5  ;;  %p4357_p10 = por %p4356_p0, %p4355_p8 }
  0x72   : > { %p4358_p12 = pnand %p4357_p10, %p4351_p13 }
  0x74   : > { %4361 = shalt.err (!%p4358_p12)
}
  0x75   : > { %3904 = dma.hbm_to_vmem [thread:$0]  (!%p4654_p7), %s4701_s20, 4096, %s4751_s16, %s4663_s17, %s7863_s11, %s7863_s11, %s7862_s18  }
  0x76   : > { %p7870_p4 = scmp.eq.s32.totalorder %s4755_s10, 0  ;;  %p7871_p8 = scmp.ne.s32.totalorder %s7869_s13, 0 }
  0x77   : > { %s4362_s26 = scalar_lea.hbm %s4786_s1, 16384  ;;  %s4367_s8 = scalar_lea.hbm %s7662_s4, 32768 }
  0x78   : > { %p7872_p13 = pneg %p7871_p8  ;;  %p4363_p0 = scmp.ne.s32.totalorder %s4786_s1, %s4362_s26 }
  0x79   : > { %p4368_p3 = scmp.lt.u32.totalorder %s4786_s1, %s7662_s4  ;;  %p4369_p11 = scmp.lt.u32.totalorder %s4367_s8, %s4362_s26 }
  0x7a   : > { %p4828_p1 = pnand %p7872_p13, %p7870_p4  ;;  %p4365_p2 = pnand %p4363_p0, %p4669_p9 }
  0x7b   : > { %p4370_p5 = por %p4369_p11, %p4368_p3  ;;  %p4371_p10 = scmp.lt.u32.totalorder %s4362_s26, %s4786_s1 }
  0x7c   : > { %s7873_s25 = scalar_select %p4828_p1, 1, 0 }
  0x7d   : > { %p4366_p6 = pneg %p4365_p2  ;;  %p4372_p12 = por %p4371_p10, %p4370_p5 }
  0x7f   : > { %p4373_p4 = pnand %p4372_p12, %p4366_p6 }
  0x81   : > { %4376 = shalt.err (!%p4373_p4)
}
  0x82   : > { %s4377_s17 = scalar_lea.vmem %s4792_s30, 16384  ;;  %s4550_s20 = smov [#allocation10]  }
  0x83   : > { %p4378_p13 = scmp.ne.s32.totalorder %s4792_s30, %s4377_s17  ;;  %s4382_s16 = sshll.u32 %s4550_s20, 4  ;;  %s4383_s16 = int_to_ptr.vmem [resolvable:$false] %s4382_s16 }
  0x84   : > { %s4384_s29 = scalar_lea.vmem %s4383_s16, 32768  ;;  %p4385_p8 = scmp.lt.s32.totalorder %s4792_s30, %s4383_s16 }
  0x85   : > { %p4380_p0 = pnand %p4378_p13, %p4669_p9  ;;  %p4386_p1 = scmp.lt.s32.totalorder %s4384_s29, %s4377_s17 }
  0x87   : > { %p4381_p2 = pneg %p4380_p0  ;;  %p4387_p3 = por %p4386_p1, %p4385_p8 }
  0x89   : > { %p4388_p11 = pnand %p4387_p3, %p4381_p2 }
  0x8b   : > { %4391 = shalt.err (!%p4388_p11)
}
  0x8c   : > { %3910 = dma.hbm_to_vmem [thread:$0]  (!%p4654_p7), %s4786_s1, 16384, %s4792_s30, %s4723_s15, %s7863_s11, %s7863_s11, %s7862_s18  }
  0x8d   : > { %s4392_s3 = scalar_lea.hbm %s7658_s0, 2048  ;;  %p7874_p8 = scmp.ne.s32.totalorder %s7873_s25, 0 }
  0x8e   : > { %p4393_p9 = scmp.ne.s32.totalorder %s7658_s0, %s4392_s3  ;;  %p4399_p10 = scmp.lt.u32.totalorder %s4392_s3, %s7658_s0 }
  0x8f   : > { %p4394_p1 = pneg %p7874_p8 }
  0x91   : > { %p4395_p6 = pnand %p4394_p1, %p4393_p9 }
  0x93   : > { %p4396_p5 = pneg %p4395_p6 }
  0x95   : > { %p4401_p12 = pnand %p4399_p10, %p4396_p5 }
  0x97   : > { %4404 = shalt.err (!%p4401_p12)
}
  0x98   : > { %s4405_s15 = scalar_lea.vmem %s4796_s9, 2048  ;;  %p4413_p0 = scmp.lt.s32.totalorder %s4796_s9, %s4796_s9 }
  0x99   : > { %p4406_p7 = scmp.ne.s32.totalorder %s4796_s9, %s4405_s15  ;;  %p4414_p2 = scmp.lt.s32.totalorder %s4405_s15, %s4405_s15 }
  0x9b   : > { %p4408_p4 = pnand %p4406_p7, %p4394_p1  ;;  %p4415_p3 = por %p4414_p2, %p4413_p0 }
  0x9d   : > { %p4409_p13 = pneg %p4408_p4 }
  0x9f   : > { %p4416_p11 = pnand %p4415_p3, %p4409_p13 }
  0xa1   : > { %4419 = shalt.err (!%p4416_p11)
}
  0xa2   : > { %s4551_s18 = smov 128   ;;  %s4552_s11 = smov 8  }
  0xa3   : > { %3897 = dma.hbm_to_vmem [thread:$0]  (!%p7874_p8), %s7658_s0, 2048, %s4796_s9, [#allocation3], %s4551_s18, %s4551_s18, %s4552_s11  }
  0xa4   : > { %p7875_p9 = scmp.ne.s32.totalorder %s7869_s13, 0 }
  0xa6   : > { %348 = sbr.rel (%p7875_p9) target bundleno = 2098 (0x832), region = 40 }
  0xad   : > { %p7876_p1 = scmp.eq.s32.totalorder %s4755_s10, 0 }
  0xaf   : > { %4501 = dma.done.wait (%p7876_p1), [#allocation3], 2048   ;;  %p7877_p6 = pmov %p7876_p1 }
  0xb0   : > { %s354_s17 = sand.u32 1, %s4755_s10   ;;  %s4886_s20 = sand.u32 1, %s4526_s22  }
  0xb1   : > { %4503 = vsyncadd (%p7877_p6), [#allocation3], 4294965248  ;;  %s3826_s25 = sshll.u32 %s4886_s20, 8  ;;  %s355_s16 = scalar_lea.sflag [#allocation6], %s354_s17 }
  0xb2   : > { %s4889_s29 = scalar_lea.vmem [#allocation5], %s3826_s25  ;;  %p7878_p8 = scmp.ne.s32.totalorder %s7864_s27, 0 }
  0xb4   : > { %4505 = dma.done.wait (%p7878_p8), %s355_s16, 8192  }
  0xb5   : > { %4507 = vsyncadd (%p7878_p8), %s355_s16, 4294959104  ;;  %s4896_s9 = sshll.u32 %s4886_s20, 10  ;;  %s4898_s13 = scalar_lea.vmem [#allocation7], %s3826_s25 }
  0xb6   : > { %s373_s10 = scalar_lea.sflag [#allocation9], %s354_s17  ;;  %s4901_s19 = scalar_lea.vmem [#allocation8], %s4896_s9 }
  0xb7   : > { %4509 = dma.done.wait (%p7878_p8), %s373_s10, 32768  }
  0xb8   : > { %4511 = vsyncadd (%p7878_p8), %s373_s10, 4294934528  ;;  %v7683_v0 = vmov 0   ;;  %v439_v1 = vld [vmem:[%s4889_s29] sm:$0xff]  ;;  %v441_v2 = vld [vmem:[%s4889_s29 + $0x10] sm:$0xff]  ;;  %s3830_s27 = sshll.u32 %s4886_s20, 11  ;;  %s7039_s3 = scalar_lea.vmem [#allocation12], %s4896_s9 }
  0xb9   : > { %823 = vmatprep.mubr.bf16.mxu0 %v7683_v0  ;;  %v443_v3 = vld [vmem:[%s4889_s29 + $0x20] sm:$0xff]  ;;  %v471_v4 = vpack.c.bf16 %v441_v2, %v439_v1  ;;  %v445_v5 = vld [vmem:[%s4889_s29 + $0x30] sm:$0xff]  ;;  %v440_v9 = vld [vmem:[%s4889_s29 + $0x8] sm:$0xff]  ;;  %s6060_s26 = scalar_lea.vmem [#allocation11], %s3830_s27  ;;  %s7177_s8 = scalar_lea.vmem [#allocation10], %s4896_s9 }
  0xba   : > { %v473_v6 = vpack.c.bf16 %v445_v5, %v443_v3  ;;  %v447_v7 = vld [vmem:[%s4889_s29 + $0x40] sm:$0xff]  ;;  %v449_v8 = vld [vmem:[%s4889_s29 + $0x50] sm:$0xff]  ;;  %v442_v10 = vld [vmem:[%s4889_s29 + $0x18] sm:$0xff]  ;;  %s3844_s7 = sshll.u32 %s4534_s24, 15  ;;  %s3589_s14 = sshll.u32 %s6060_s26, 4  ;;  %s7469_s14 = int_to_ptr.vmem [resolvable:$true] %s3589_s14 }
  0xbb   : > { %759 = vxpose.xlu0.c.b16.start [1/8] %v471_v4, 128  ;;  %v451_v11 = vld [vmem:[%s4889_s29 + $0x60] sm:$0xff]  ;;  %v453_v12 = vld [vmem:[%s4889_s29 + $0x70] sm:$0xff]  ;;  %v472_v13 = vpack.c.bf16 %v442_v10, %v440_v9  ;;  %v444_v14 = vld [vmem:[%s4889_s29 + $0x28] sm:$0xff]  ;;  %v475_v17 = vpack.c.bf16 %v449_v8, %v447_v7  ;;  %s7467_s18 = scalar_lea.hbm %s7663_s5, %s3844_s7  ;;  %s3569_s11 = scalar_lea.sflag [#allocation4], %s4886_s20 }
  0xbc   : > { %v446_v15 = vld [vmem:[%s4889_s29 + $0x38] sm:$0xff]  ;;  %v680_v16 = vld [vmem:[%s4898_s13 + $0x8] sm:$0xff]  ;;  %v4923_v21 = vld [vmem:[%s4898_s13] sm:$0xff]  ;;  %v477_v38 = vpack.c.bf16 %v453_v12, %v451_v11  ;;  %s4420_s30 = scalar_lea.vmem %s7469_s14, 32768  ;;  %p8231_p10 = scmp.ne.s32.totalorder %s7866_s28, 0 }
  0xbd   : > { %v474_v18 = vpack.c.bf16 %v446_v15, %v444_v14  ;;  %v682_v19 = vld [vmem:[%s4898_s13 + $0x18] sm:$0xff]  ;;  %v712_v20 = vmul.f32 0.088388346, %v680_v16  ;;  %7879 = vst [vmem:[#allocation24_spill] sm:$0xff] %v4923_v21  ;;  %v4926_v22 = vld [vmem:[%s4898_s13 + $0x10] sm:$0xff]  ;;  %775 = vxpose.xlu1.c.b16.start [1/8] %v472_v13, 128  ;;  %v448_v27 = vld [vmem:[%s4889_s29 + $0x48] sm:$0xff]  ;;  %p4421_p5 = scmp.ne.s32.totalorder %s7469_s14, %s4420_s30 }
  0xbe   : > { %7880 = vst [vmem:[#allocation25_spill] sm:$0xff] %v4926_v22  ;;  %v714_v23 = vmul.f32 0.088388346, %v682_v19  ;;  %v711_v24 = vmul.f32 0.088388346, %v4923_v21  ;;  %v450_v28 = vld [vmem:[%s4889_s29 + $0x58] sm:$0xff] }
  0xbf   : > { %760 = vxpose.xlu0.c.b16.cont [2/8] %v473_v6, 128  ;;  %v713_v25 = vmul.f32 0.088388346, %v4926_v22  ;;  %v684_v29 = vld [vmem:[%s4898_s13 + $0x28] sm:$0xff]  ;;  %v455_v30 = vld [vmem:[%s4889_s29 + $0x80] sm:$0xff]  ;;  %v457_v31 = vld [vmem:[%s4889_s29 + $0x90] sm:$0xff]  ;;  %v476_v42 = vpack.c.bf16 %v450_v28, %v448_v27  ;;  %p4422_p12 = pnand %p4421_p5, %p8231_p10  ;;  %s4554_s1 = smov [#allocation11]  }
  0xc0   : > { %v744_v32 = vpack.c.bf16 %v714_v23, %v712_v20  ;;  %v686_v34 = vld [vmem:[%s4898_s13 + $0x38] sm:$0xff]  ;;  %v716_v35 = vmul.f32 0.088388346, %v684_v29  ;;  %v683_v36 = vld [vmem:[%s4898_s13 + $0x20] sm:$0xff]  ;;  %v685_v37 = vld [vmem:[%s4898_s13 + $0x30] sm:$0xff]  ;;  %v479_v57 = vpack.c.bf16 %v457_v31, %v455_v30  ;;  %s4424_s17 = sshll.u32 %s4554_s1, 4  ;;  %s4425_s17 = int_to_ptr.vmem [resolvable:$false] %s4424_s17 }
  0xc1   : > { %v743_v33 = vpack.c.bf16 %v713_v25, %v711_v24  ;;  %v718_v39 = vmul.f32 0.088388346, %v686_v34  ;;  %v715_v40 = vmul.f32 0.088388346, %v683_v36  ;;  %v717_v41 = vmul.f32 0.088388346, %v685_v37  ;;  %776 = vxpose.xlu1.c.b16.cont [2/8] %v474_v18, 128  ;;  %p4423_p7 = pneg %p4422_p12  ;;  %p4427_p4 = scmp.lt.s32.totalorder %s7469_s14, %s4425_s17 }
  0xc2   : > { %791 = vmatprep.subr.bf16.mxu0 %v744_v32  ;;  %v452_v43 = vld [vmem:[%s4889_s29 + $0x68] sm:$0xff]  ;;  %v454_v44 = vld [vmem:[%s4889_s29 + $0x78] sm:$0xff]  ;;  %v687_v50 = vld [vmem:[%s4898_s13 + $0x40] sm:$0xff]  ;;  %s4426_s25 = scalar_lea.vmem %s4425_s17, 65536 }
  0xc3   : > { %761 = vxpose.xlu0.c.b16.cont [3/8] %v475_v17, 128  ;;  %v688_v45 = vld [vmem:[%s4898_s13 + $0x48] sm:$0xff]  ;;  %792 = vmatpush1.bf16.msra.mxu0 %v743_v33  ;;  %v746_v46 = vpack.c.bf16 %v718_v39, %v716_v35  ;;  %v745_v47 = vpack.c.bf16 %v717_v41, %v715_v40  ;;  %v690_v48 = vld [vmem:[%s4898_s13 + $0x58] sm:$0xff]  ;;  %v689_v51 = vld [vmem:[%s4898_s13 + $0x50] sm:$0xff]  ;;  %v719_v55 = vmul.f32 0.088388346, %v687_v50  ;;  %v478_v61 = vpack.c.bf16 %v454_v44, %v452_v43  ;;  %p4428_p13 = scmp.lt.s32.totalorder %s4426_s25, %s4420_s30 }
  0xc4   : > { %v720_v49 = vmul.f32 0.088388346, %v688_v45  ;;  %v459_v52 = vld [vmem:[%s4889_s29 + $0xa0] sm:$0xff]  ;;  %v461_v53 = vld [vmem:[%s4889_s29 + $0xb0] sm:$0xff]  ;;  %v722_v54 = vmul.f32 0.088388346, %v690_v48 }
  0xc5   : > { %v721_v56 = vmul.f32 0.088388346, %v689_v51  ;;  %793 = vmatprep.subr.bf16.mxu0 %v746_v46  ;;  %v456_v58 = vld [vmem:[%s4889_s29 + $0x88] sm:$0xff]  ;;  %v458_v59 = vld [vmem:[%s4889_s29 + $0x98] sm:$0xff]  ;;  %777 = vxpose.xlu1.c.b16.cont [3/8] %v476_v42, 128  ;;  %v691_v2 = vld [vmem:[%s4898_s13 + $0x60] sm:$0xff]  ;;  %v481_v9 = vpack.c.bf16 %v461_v53, %v459_v52  ;;  %p4429_p0 = por %p4428_p13, %p4427_p4 }
  0xc6   : > { %v692_v60 = vld [vmem:[%s4898_s13 + $0x68] sm:$0xff]  ;;  %v748_v62 = vpack.c.bf16 %v722_v54, %v720_v49  ;;  %v694_v63 = vld [vmem:[%s4898_s13 + $0x78] sm:$0xff]  ;;  %v693_v3 = vld [vmem:[%s4898_s13 + $0x70] sm:$0xff]  ;;  %v723_v6 = vmul.f32 0.088388346, %v691_v2  ;;  %v480_v17 = vpack.c.bf16 %v458_v59, %v456_v58 }
  0xc7   : > { %762 = vxpose.xlu0.c.b16.cont [4/8] %v477_v38, 128  ;;  %v724_v1 = vmul.f32 0.088388346, %v692_v60  ;;  %794 = vmatpush1.bf16.msra.mxu0 %v745_v47  ;;  %v747_v4 = vpack.c.bf16 %v721_v56, %v719_v55  ;;  %v726_v5 = vmul.f32 0.088388346, %v694_v63  ;;  %v725_v7 = vmul.f32 0.088388346, %v693_v3  ;;  %p4430_p2 = pnand %p4429_p0, %p4423_p7 }
  0xc8   : > { %795 = vmatprep.subr.bf16.mxu0 %v748_v62  ;;  %v696_v8 = vld [vmem:[%s4898_s13 + $0x88] sm:$0xff]  ;;  %v698_v11 = vld [vmem:[%s4898_s13 + $0x98] sm:$0xff]  ;;  %v695_v13 = vld [vmem:[%s4898_s13 + $0x80] sm:$0xff] }
  0xc9   : > { %v750_v10 = vpack.c.bf16 %v726_v5, %v724_v1  ;;  %v728_v12 = vmul.f32 0.088388346, %v696_v8  ;;  %v697_v14 = vld [vmem:[%s4898_s13 + $0x90] sm:$0xff]  ;;  %v463_v15 = vld [vmem:[%s4889_s29 + $0xc0] sm:$0xff]  ;;  %778 = vxpose.xlu1.c.b16.cont [4/8] %v478_v61, 128  ;;  %v460_v18 = vld [vmem:[%s4889_s29 + $0xa8] sm:$0xff]  ;;  %v749_v20 = vpack.c.bf16 %v725_v7, %v723_v6 }
  0xca   : > { %v465_v16 = vld [vmem:[%s4889_s29 + $0xd0] sm:$0xff]  ;;  %v730_v19 = vmul.f32 0.088388346, %v698_v11  ;;  %v462_v23 = vld [vmem:[%s4889_s29 + $0xb8] sm:$0xff]  ;;  %v727_v24 = vmul.f32 0.088388346, %v695_v13 }
  0xcb   : > { %763 = vxpose.xlu0.c.b16.cont [5/8] %v479_v57, 128  ;;  %796 = vmatpush1.bf16.msra.mxu0 %v747_v4  ;;  %v729_v25 = vmul.f32 0.088388346, %v697_v14  ;;  %v700_v27 = vld [vmem:[%s4898_s13 + $0xa8] sm:$0xff]  ;;  %v702_v29 = vld [vmem:[%s4898_s13 + $0xb8] sm:$0xff]  ;;  %v699_v31 = vld [vmem:[%s4898_s13 + $0xa0] sm:$0xff]  ;;  %v483_v33 = vpack.c.bf16 %v465_v16, %v463_v15  ;;  %v482_v37 = vpack.c.bf16 %v462_v23, %v460_v18 }
  0xcc   : > { %797 = vmatprep.subr.bf16.mxu0 %v750_v10  ;;  %v752_v28 = vpack.c.bf16 %v730_v19, %v728_v12  ;;  %v732_v30 = vmul.f32 0.088388346, %v700_v27  ;;  %v701_v32 = vld [vmem:[%s4898_s13 + $0xb0] sm:$0xff]  ;;  %v467_v34 = vld [vmem:[%s4889_s29 + $0xe0] sm:$0xff]  ;;  %v734_v35 = vmul.f32 0.088388346, %v702_v29 }
  0xcd   : > { %v469_v36 = vld [vmem:[%s4889_s29 + $0xf0] sm:$0xff]  ;;  %779 = vxpose.xlu1.c.b16.cont [5/8] %v480_v17, 128  ;;  %v464_v38 = vld [vmem:[%s4889_s29 + $0xc8] sm:$0xff]  ;;  %v751_v40 = vpack.c.bf16 %v729_v25, %v727_v24  ;;  %v466_v41 = vld [vmem:[%s4889_s29 + $0xd8] sm:$0xff]  ;;  %v731_v42 = vmul.f32 0.088388346, %v699_v31 }
  0xce   : > { %v704_v39 = vld [vmem:[%s4898_s13 + $0xc8] sm:$0xff]  ;;  %v733_v43 = vmul.f32 0.088388346, %v701_v32  ;;  %v706_v44 = vld [vmem:[%s4898_s13 + $0xd8] sm:$0xff]  ;;  %v754_v45 = vpack.c.bf16 %v734_v35, %v732_v30  ;;  %v703_v48 = vld [vmem:[%s4898_s13 + $0xc0] sm:$0xff]  ;;  %v485_v50 = vpack.c.bf16 %v469_v36, %v467_v34  ;;  %v484_v53 = vpack.c.bf16 %v466_v41, %v464_v38 }
  0xcf   : > { %764 = vxpose.xlu0.c.b16.cont [6/8] %v481_v9, 128  ;;  %798 = vmatpush1.bf16.msra.mxu0 %v749_v20  ;;  %v736_v46 = vmul.f32 0.088388346, %v704_v39  ;;  %v738_v47 = vmul.f32 0.088388346, %v706_v44  ;;  %v705_v49 = vld [vmem:[%s4898_s13 + $0xd0] sm:$0xff]  ;;  %v708_v51 = vld [vmem:[%s4898_s13 + $0xe8] sm:$0xff] }
  0xd0   : > { %799 = vmatprep.subr.bf16.mxu0 %v752_v28  ;;  %v710_v52 = vld [vmem:[%s4898_s13 + $0xf8] sm:$0xff]  ;;  %v753_v54 = vpack.c.bf16 %v733_v43, %v731_v42  ;;  %v468_v55 = vld [vmem:[%s4889_s29 + $0xe8] sm:$0xff]  ;;  %v735_v57 = vmul.f32 0.088388346, %v703_v48  ;;  %v737_v58 = vmul.f32 0.088388346, %v705_v49 }
  0xd1   : > { %780 = vxpose.xlu1.c.b16.cont [6/8] %v482_v37, 128  ;;  %v470_v56 = vld [vmem:[%s4889_s29 + $0xf8] sm:$0xff]  ;;  %v756_v59 = vpack.c.bf16 %v738_v47, %v736_v46  ;;  %v740_v60 = vmul.f32 0.088388346, %v708_v51  ;;  %v742_v61 = vmul.f32 0.088388346, %v710_v52  ;;  %v707_v62 = vld [vmem:[%s4898_s13 + $0xe0] sm:$0xff] }
  0xd2   : > { %v709_v63 = vld [vmem:[%s4898_s13 + $0xf0] sm:$0xff]  ;;  %v486_v1 = vpack.c.bf16 %v470_v56, %v468_v55  ;;  %v755_v2 = vpack.c.bf16 %v737_v58, %v735_v57  ;;  %v739_v3 = vmul.f32 0.088388346, %v707_v62 }
  0xd3   : > { %765 = vxpose.xlu0.c.b16.cont [7/8] %v483_v33, 128  ;;  %800 = vmatpush1.bf16.msra.mxu0 %v751_v40  ;;  %v741_v4 = vmul.f32 0.088388346, %v709_v63  ;;  %v758_v5 = vpack.c.bf16 %v742_v61, %v740_v60 }
  0xd4   : > { %801 = vmatprep.subr.bf16.mxu0 %v754_v45 }
  0xd5   : > { %781 = vxpose.xlu1.c.b16.cont [7/8] %v484_v53, 128  ;;  %v757_v6 = vpack.c.bf16 %v741_v4, %v739_v3 }
  0xd7   : > { %766 = vxpose.xlu0.c.b16.end [8/8] %v485_v50, 128  ;;  %802 = vmatpush1.bf16.msra.mxu0 %v753_v54 }
  0xd8   : > { %803 = vmatprep.subr.bf16.mxu0 %v756_v59 }
  0xd9   : > { %782 = vxpose.xlu1.c.b16.end [8/8] %v486_v1, 128 }
  0xdb   : > { %804 = vmatpush1.bf16.msra.mxu0 %v755_v2 }
  0xdc   : > { %805 = vmatprep.subr.bf16.mxu0 %v758_v5 }
  0xdf   : > { %806 = vmatpush1.bf16.msra.mxu0 %v757_v6 }
 0x121   : > { %v4980_v7 = vpop.trf.xlu0 }
 0x122   : > { %7881 = vst [vmem:[#allocation26_spill] sm:$0xff] %v4980_v7  ;;  %824 = vmatmul.mubr.bf16.vlgmr.msra.gmra.mrb[0].mxu0 %v4980_v7 }
 0x123   : > { %833 = vmatprep.mubr.bf16.mxu0 %v7683_v0  ;;  %v5012_v15 = vpop.trf.xlu1 }
 0x124   : > { %7889 = vst [vmem:[#allocation34_spill] sm:$0xff] %v5012_v15 }
 0x125   : > { %v4984_v8 = vpop.trf.xlu0 }
 0x126   : > { %7882 = vst [vmem:[#allocation27_spill] sm:$0xff] %v4984_v8 }
 0x127   : > { %v5016_v16 = vpop.trf.xlu1 }
 0x128   : > { %7890 = vst [vmem:[#allocation35_spill] sm:$0xff] %v5016_v16 }
 0x129   : > { %v4988_v9 = vpop.trf.xlu0 }
 0x12a   : > { %834 = vmatmul.mubr.bf16.gmra.mrb[4].mxu0 %v4984_v8  ;;  %7883 = vst [vmem:[#allocation28_spill] sm:$0xff] %v4988_v9 }
 0x12b   : > { %843 = vmatprep.mubr.bf16.mxu0 %v7683_v0  ;;  %v5020_v17 = vpop.trf.xlu1 }
 0x12c   : > { %7891 = vst [vmem:[#allocation36_spill] sm:$0xff] %v5020_v17 }
 0x12d   : > { %v4992_v10 = vpop.trf.xlu0 }
 0x12e   : > { %7884 = vst [vmem:[#allocation29_spill] sm:$0xff] %v4992_v10 }
 0x12f   : > { %v5024_v18 = vpop.trf.xlu1 }
 0x130   : > { %7892 = vst [vmem:[#allocation37_spill] sm:$0xff] %v5024_v18 }
 0x131   : > { %v4996_v11 = vpop.trf.xlu0 }
 0x132   : > { %844 = vmatmul.mubr.bf16.gmra.mrb[8].mxu0 %v4988_v9  ;;  %7885 = vst [vmem:[#allocation30_spill] sm:$0xff] %v4996_v11 }
 0x133   : > { %853 = vmatprep.mubr.bf16.mxu0 %v7683_v0  ;;  %v5028_v19 = vpop.trf.xlu1 }
 0x134   : > { %7893 = vst [vmem:[#allocation38_spill] sm:$0xff] %v5028_v19 }
 0x135   : > { %v5000_v12 = vpop.trf.xlu0 }
 0x136   : > { %7886 = vst [vmem:[#allocation31_spill] sm:$0xff] %v5000_v12 }
 0x137   : > { %v5032_v20 = vpop.trf.xlu1 }
 0x138   : > { %7894 = vst [vmem:[#allocation39_spill] sm:$0xff] %v5032_v20 }
 0x139   : > { %v5004_v13 = vpop.trf.xlu0 }
 0x13a   : > { %854 = vmatmul.mubr.bf16.gmra.mrb[12].mxu0 %v4992_v10  ;;  %7887 = vst [vmem:[#allocation32_spill] sm:$0xff] %v5004_v13 }
 0x13b   : > { %863 = vmatprep.mubr.bf16.mxu0 %v7683_v0  ;;  %v5036_v23 = vpop.trf.xlu1 }
 0x13c   : > { %7895 = vst [vmem:[#allocation40_spill] sm:$0xff] %v5036_v23 }
 0x13d   : > { %v5008_v14 = vpop.trf.xlu0 }
 0x13e   : > { %7888 = vst [vmem:[#allocation33_spill] sm:$0xff] %v5008_v14 }
 0x13f   : > { %v5040_v24 = vpop.trf.xlu1 }
 0x140   : > { %7896 = vst [vmem:[#allocation41_spill] sm:$0xff] %v5040_v24 }
 0x142   : > { %864 = vmatmul.mubr.bf16.gmra.mrb[16].mxu0 %v4996_v11 }
 0x143   : > { %873 = vmatprep.mubr.bf16.mxu0 %v7683_v0 }
 0x14a   : > { %874 = vmatmul.mubr.bf16.gmra.mrb[20].mxu0 %v5000_v12 }
 0x14b   : > { %883 = vmatprep.mubr.bf16.mxu0 %v7683_v0 }
 0x152   : > { %884 = vmatmul.mubr.bf16.gmra.mrb[24].mxu0 %v5004_v13 }
 0x153   : > { %893 = vmatprep.mubr.bf16.mxu0 %v7683_v0 }
 0x15a   : > { %894 = vmatmul.mubr.bf16.gmra.mrb[28].mxu0 %v5008_v14 }
 0x15b   : > { %903 = vmatprep.mubr.bf16.mxu0 %v7683_v0 }
 0x162   : > { %904 = vmatmul.mubr.bf16.gmra.mrb[32].mxu0 %v5012_v15 }
 0x163   : > { %913 = vmatprep.mubr.bf16.mxu0 %v7683_v0 }
 0x16a   : > { %914 = vmatmul.mubr.bf16.gmra.mrb[36].mxu0 %v5016_v16 }
 0x16b   : > { %923 = vmatprep.mubr.bf16.mxu0 %v7683_v0 }
 0x172   : > { %924 = vmatmul.mubr.bf16.gmra.mrb[40].mxu0 %v5020_v17 }
 0x173   : > { %933 = vmatprep.mubr.bf16.mxu0 %v7683_v0 }
 0x17a   : > { %934 = vmatmul.mubr.bf16.gmra.mrb[44].mxu0 %v5024_v18 }
 0x17b   : > { %943 = vmatprep.mubr.bf16.mxu0 %v7683_v0 }
 0x182   : > { %944 = vmatmul.mubr.bf16.gmra.mrb[48].mxu0 %v5028_v19 }
 0x183   : > { %953 = vmatprep.mubr.bf16.mxu0 %v7683_v0 }
 0x18a   : > { %954 = vmatmul.mubr.bf16.gmra.mrb[52].mxu0 %v5032_v20 }
 0x18b   : > { %963 = vmatprep.mubr.bf16.mxu0 %v7683_v0 }
 0x192   : > { %964 = vmatmul.mubr.bf16.gmra.mrb[56].mxu0 %v5036_v23 }
 0x193   : > { %973 = vmatprep.mubr.bf16.mxu0 %v7683_v0 }
 0x19a   : > { %974 = vmatmul.mubr.bf16.gmra.mrb[60].mxu0 %v5040_v24 }
 0x1f5   : > { %v5043_v25 = vpop.f32.mrb[0].mxu0 }
 0x1f6   : > { %v5045_v27 = vpop.f32.mrb[1].mxu0 }
 0x1f7   : > { %v5047_v28 = vpop.f32.mrb[2].mxu0 }
 0x1f8   : > { %v5049_v29 = vpop.f32.mrb[3].mxu0 }
 0x1fd   : > { %v5051_v30 = vpop.f32.mrb[4].mxu0 }
 0x1fe   : > { %v984_v31 = vmax.f32 %v5043_v25, %v5051_v30  ;;  %v5055_v32 = vpop.f32.mrb[5].mxu0 }
 0x1ff   : > { %v1021_v33 = vmax.f32 %v5045_v27, %v5055_v32  ;;  %v5059_v34 = vpop.f32.mrb[6].mxu0 }
 0x200   : > { %v985_v35 = vmax.f32 %v5047_v28, %v5059_v34  ;;  %v5063_v36 = vpop.f32.mrb[7].mxu0 }
 0x201   : > { %v1022_v37 = vmax.f32 %v5049_v29, %v5063_v36 }
 0x205   : > { %v5067_v38 = vpop.f32.mrb[8].mxu0 }
 0x206   : > { %v986_v39 = vmax.f32 %v984_v31, %v5067_v38  ;;  %v5070_v40 = vpop.f32.mrb[9].mxu0 }
 0x207   : > { %v1023_v41 = vmax.f32 %v1021_v33, %v5070_v40  ;;  %v5073_v42 = vpop.f32.mrb[10].mxu0 }
 0x208   : > { %v987_v43 = vmax.f32 %v985_v35, %v5073_v42  ;;  %v5076_v44 = vpop.f32.mrb[11].mxu0 }
 0x209   : > { %v1024_v45 = vmax.f32 %v1022_v37, %v5076_v44 }
 0x20d   : > { %v5079_v46 = vpop.f32.mrb[12].mxu0 }
 0x20e   : > { %v988_v47 = vmax.f32 %v986_v39, %v5079_v46  ;;  %v5082_v48 = vpop.f32.mrb[13].mxu0 }
 0x20f   : > { %v1025_v49 = vmax.f32 %v1023_v41, %v5082_v48  ;;  %v5085_v50 = vpop.f32.mrb[14].mxu0 }
 0x210   : > { %v989_v51 = vmax.f32 %v987_v43, %v5085_v50  ;;  %v5088_v52 = vpop.f32.mrb[15].mxu0 }
 0x211   : > { %v1026_v53 = vmax.f32 %v1024_v45, %v5088_v52 }
 0x215   : > { %v5091_v54 = vpop.f32.mrb[16].mxu0 }
 0x216   : > { %v990_v55 = vmax.f32 %v988_v47, %v5091_v54  ;;  %v5094_v56 = vpop.f32.mrb[17].mxu0 }
 0x217   : > { %v1027_v57 = vmax.f32 %v1025_v49, %v5094_v56  ;;  %v5097_v58 = vpop.f32.mrb[18].mxu0 }
 0x218   : > { %v991_v59 = vmax.f32 %v989_v51, %v5097_v58  ;;  %v5100_v60 = vpop.f32.mrb[19].mxu0 }
 0x219   : > { %v1028_v61 = vmax.f32 %v1026_v53, %v5100_v60 }
 0x21d   : > { %v5103_v62 = vpop.f32.mrb[20].mxu0 }
 0x21e   : > { %v992_v63 = vmax.f32 %v990_v55, %v5103_v62  ;;  %v5106_v1 = vpop.f32.mrb[21].mxu0 }
 0x21f   : > { %v1029_v2 = vmax.f32 %v1027_v57, %v5106_v1  ;;  %v5109_v3 = vpop.f32.mrb[22].mxu0 }
 0x220   : > { %v993_v4 = vmax.f32 %v991_v59, %v5109_v3  ;;  %v5112_v5 = vpop.f32.mrb[23].mxu0 }
 0x221   : > { %7897 = vst [vmem:[#allocation42_spill] sm:$0xff] %v5112_v5  ;;  %v1030_v6 = vmax.f32 %v1028_v61, %v5112_v5 }
 0x225   : > { %v5115_v31 = vpop.f32.mrb[24].mxu0 }
 0x226   : > { %v994_v33 = vmax.f32 %v992_v63, %v5115_v31  ;;  %v5118_v35 = vpop.f32.mrb[25].mxu0 }
 0x227   : > { %7898 = vst [vmem:[#allocation43_spill] sm:$0xff] %v5118_v35  ;;  %v1031_v37 = vmax.f32 %v1029_v2, %v5118_v35  ;;  %v5121_v39 = vpop.f32.mrb[26].mxu0 }
 0x228   : > { %v995_v41 = vmax.f32 %v993_v4, %v5121_v39  ;;  %v5124_v43 = vpop.f32.mrb[27].mxu0 }
 0x229   : > { %7899 = vst [vmem:[#allocation44_spill] sm:$0xff] %v5124_v43  ;;  %v1032_v45 = vmax.f32 %v1030_v6, %v5124_v43 }
 0x22d   : > { %v5127_v47 = vpop.f32.mrb[28].mxu0 }
 0x22e   : > { %v996_v49 = vmax.f32 %v994_v33, %v5127_v47  ;;  %v5130_v51 = vpop.f32.mrb[29].mxu0 }
 0x22f   : > { %7900 = vst [vmem:[#allocation45_spill] sm:$0xff] %v5130_v51  ;;  %v1033_v53 = vmax.f32 %v1031_v37, %v5130_v51  ;;  %v5133_v55 = vpop.f32.mrb[30].mxu0 }
 0x230   : > { %v997_v57 = vmax.f32 %v995_v41, %v5133_v55  ;;  %v5136_v59 = vpop.f32.mrb[31].mxu0 }
 0x231   : > { %7901 = vst [vmem:[#allocation46_spill] sm:$0xff] %v5136_v59  ;;  %v1034_v61 = vmax.f32 %v1032_v45, %v5136_v59 }
 0x235   : > { %v5139_v63 = vpop.f32.mrb[32].mxu0 }
 0x236   : > { %v998_v2 = vmax.f32 %v996_v49, %v5139_v63  ;;  %v5142_v4 = vpop.f32.mrb[33].mxu0 }
 0x237   : > { %7902 = vst [vmem:[#allocation47_spill] sm:$0xff] %v5142_v4  ;;  %v1035_v6 = vmax.f32 %v1033_v53, %v5142_v4  ;;  %v5145_v33 = vpop.f32.mrb[34].mxu0 }
 0x238   : > { %v999_v37 = vmax.f32 %v997_v57, %v5145_v33  ;;  %v5148_v0 = vpop.f32.mrb[35].mxu0 }
 0x239   : > { %7903 = vst [vmem:[#allocation48_spill] sm:$0xff] %v5148_v0  ;;  %v1036_v41 = vmax.f32 %v1034_v61, %v5148_v0 }
 0x23d   : > { %v5151_v26 = vpop.f32.mrb[36].mxu0 }
 0x23e   : > { %v1000_v45 = vmax.f32 %v998_v2, %v5151_v26  ;;  %v5154_v24 = vpop.f32.mrb[37].mxu0 }
 0x23f   : > { %7904 = vst [vmem:[#allocation49_spill] sm:$0xff] %v5154_v24  ;;  %v1037_v49 = vmax.f32 %v1035_v6, %v5154_v24  ;;  %v5157_v23 = vpop.f32.mrb[38].mxu0 }
 0x240   : > { %v1001_v53 = vmax.f32 %v999_v37, %v5157_v23  ;;  %v5160_v20 = vpop.f32.mrb[39].mxu0 }
 0x241   : > { %7905 = vst [vmem:[#allocation50_spill] sm:$0xff] %v5160_v20  ;;  %v1038_v57 = vmax.f32 %v1036_v41, %v5160_v20 }
 0x245   : > { %v5163_v19 = vpop.f32.mrb[40].mxu0 }
 0x246   : > { %v1002_v61 = vmax.f32 %v1000_v45, %v5163_v19  ;;  %v5166_v18 = vpop.f32.mrb[41].mxu0 }
 0x247   : > { %7906 = vst [vmem:[#allocation51_spill] sm:$0xff] %v5166_v18  ;;  %v1039_v2 = vmax.f32 %v1037_v49, %v5166_v18  ;;  %v5169_v17 = vpop.f32.mrb[42].mxu0 }
 0x248   : > { %v1003_v6 = vmax.f32 %v1001_v53, %v5169_v17  ;;  %v5172_v16 = vpop.f32.mrb[43].mxu0 }
 0x249   : > { %7907 = vst [vmem:[#allocation52_spill] sm:$0xff] %v5172_v16  ;;  %v1040_v37 = vmax.f32 %v1038_v57, %v5172_v16 }
 0x24d   : > { %v5175_v15 = vpop.f32.mrb[44].mxu0 }
 0x24e   : > { %v1004_v41 = vmax.f32 %v1002_v61, %v5175_v15  ;;  %v5178_v14 = vpop.f32.mrb[45].mxu0 }
 0x24f   : > { %7908 = vst [vmem:[#allocation53_spill] sm:$0xff] %v5178_v14  ;;  %v1041_v45 = vmax.f32 %v1039_v2, %v5178_v14  ;;  %v5181_v13 = vpop.f32.mrb[46].mxu0 }
 0x250   : > { %v1005_v49 = vmax.f32 %v1003_v6, %v5181_v13  ;;  %v5184_v12 = vpop.f32.mrb[47].mxu0 }
 0x251   : > { %7909 = vst [vmem:[#allocation54_spill] sm:$0xff] %v5184_v12  ;;  %v1042_v53 = vmax.f32 %v1040_v37, %v5184_v12 }
 0x255   : > { %v5187_v11 = vpop.f32.mrb[48].mxu0 }
 0x256   : > { %v1006_v57 = vmax.f32 %v1004_v41, %v5187_v11  ;;  %v5190_v10 = vpop.f32.mrb[49].mxu0 }
 0x257   : > { %7910 = vst [vmem:[#allocation55_spill] sm:$0xff] %v5190_v10  ;;  %v1043_v61 = vmax.f32 %v1041_v45, %v5190_v10  ;;  %v5193_v9 = vpop.f32.mrb[50].mxu0 }
 0x258   : > { %v1007_v2 = vmax.f32 %v1005_v49, %v5193_v9  ;;  %v5196_v8 = vpop.f32.mrb[51].mxu0 }
 0x259   : > { %7911 = vst [vmem:[#allocation56_spill] sm:$0xff] %v5196_v8  ;;  %v1044_v6 = vmax.f32 %v1042_v53, %v5196_v8 }
 0x25d   : > { %v5199_v7 = vpop.f32.mrb[52].mxu0 }
 0x25e   : > { %v1008_v37 = vmax.f32 %v1006_v57, %v5199_v7  ;;  %v5202_v21 = vpop.f32.mrb[53].mxu0 }
 0x25f   : > { %7912 = vst [vmem:[#allocation57_spill] sm:$0xff] %v5202_v21  ;;  %v1045_v41 = vmax.f32 %v1043_v61, %v5202_v21  ;;  %v5205_v22 = vpop.f32.mrb[54].mxu0 }
 0x260   : > { %v1009_v45 = vmax.f32 %v1007_v2, %v5205_v22  ;;  %v5208_v10 = vpop.f32.mrb[55].mxu0 }
 0x261   : > { %7913 = vst [vmem:[#allocation58_spill] sm:$0xff] %v5208_v10  ;;  %v1046_v49 = vmax.f32 %v1044_v6, %v5208_v10 }
 0x265   : > { %v5211_v12 = vpop.f32.mrb[56].mxu0 }
 0x266   : > { %v1010_v53 = vmax.f32 %v1008_v37, %v5211_v12  ;;  %v5214_v8 = vpop.f32.mrb[57].mxu0 }
 0x267   : > { %7914 = vst [vmem:[#allocation59_spill] sm:$0xff] %v5214_v8  ;;  %v1047_v57 = vmax.f32 %v1045_v41, %v5214_v8  ;;  %v5217_v14 = vpop.f32.mrb[58].mxu0 }
 0x268   : > { %v1011_v61 = vmax.f32 %v1009_v45, %v5217_v14  ;;  %v5220_v21 = vpop.f32.mrb[59].mxu0 }
 0x269   : > { %7915 = vst [vmem:[#allocation60_spill] sm:$0xff] %v5220_v21  ;;  %v1048_v2 = vmax.f32 %v1046_v49, %v5220_v21 }
 0x26d   : > { %v5223_v16 = vpop.f32.mrb[60].mxu0 }
 0x26e   : > { %v1012_v6 = vmax.f32 %v1010_v53, %v5223_v16  ;;  %v5226_v10 = vpop.f32.mrb[61].mxu0 }
 0x26f   : > { %7916 = vst [vmem:[#allocation61_spill] sm:$0xff] %v5226_v10  ;;  %v1049_v37 = vmax.f32 %v1047_v57, %v5226_v10  ;;  %v5229_v18 = vpop.f32.mrb[62].mxu0 }
 0x270   : > { %v1013_v41 = vmax.f32 %v1011_v61, %v5229_v18  ;;  %v5232_v8 = vpop.f32.mrb[63].mxu0 }
 0x271   : > { %7917 = vst [vmem:[#allocation62_spill] sm:$0xff] %v5232_v8  ;;  %v1050_v45 = vmax.f32 %v1048_v2, %v5232_v8 }
 0x272   : > { %v1014_v20 = vmax.f32 %v1012_v6, %v1013_v41 }
 0x273   : > { %v1051_v24 = vmax.f32 %v1049_v37, %v1050_v45 }
 0x274   : > { %v1015_v0 = vrot.slane %v1014_v20, 4 }
 0x275   : > { %v1052_v49 = vrot.slane %v1051_v24, 4 }
 0x276   : > { %v1016_v21 = vmax.f32 %v1014_v20, %v1015_v0 }
 0x277   : > { %v1053_v4 = vmax.f32 %v1051_v24, %v1052_v49 }
 0x278   : > { %v1017_v59 = vrot.slane %v1016_v21, 2 }
 0x279   : > { %v1054_v53 = vrot.slane %v1053_v4, 2 }
 0x27a   : > { %v1018_v51 = vmax.f32 %v1016_v21, %v1017_v59 }
 0x27b   : > { %v1055_v43 = vmax.f32 %v1053_v4, %v1054_v53 }
 0x27c   : > { %v1019_v35 = vrot.slane %v1018_v51, 1 }
 0x27d   : > { %v1056_v57 = vrot.slane %v1055_v43, 1 }
 0x27e   : > { %v5235_v10 = vmax.f32 %v1018_v51, %v1019_v35 }
 0x27f   : > { %v5237_v5 = vmax.f32 %v1055_v43, %v1056_v57 }
 0x280   : > { %v1058_v61 = vsub.f32 %v5043_v25, %v5235_v10  ;;  %v1060_v2 = vsub.f32 %v5047_v28, %v5235_v10  ;;  %v1062_v0 = vsub.f32 %v5051_v30, %v5235_v10  ;;  %v1064_v20 = vsub.f32 %v5059_v34, %v5235_v10 }
 0x281   : > { %v1066_v21 = vsub.f32 %v5067_v38, %v5235_v10  ;;  %v1068_v24 = vsub.f32 %v5073_v42, %v5235_v10  ;;  %v1070_v35 = vsub.f32 %v5079_v46, %v5235_v10  ;;  %v1072_v25 = vsub.f32 %v5085_v50, %v5235_v10 }
 0x282   : > { %v1074_v28 = vsub.f32 %v5091_v54, %v5235_v10  ;;  %v1076_v30 = vsub.f32 %v5097_v58, %v5235_v10  ;;  %v1078_v34 = vsub.f32 %v5103_v62, %v5235_v10  ;;  %v1080_v38 = vsub.f32 %v5109_v3, %v5235_v10 }
 0x283   : > { %v1082_v42 = vsub.f32 %v5115_v31, %v5235_v10  ;;  %v1084_v46 = vsub.f32 %v5121_v39, %v5235_v10  ;;  %v1086_v50 = vsub.f32 %v5127_v47, %v5235_v10  ;;  %v1088_v54 = vsub.f32 %v5133_v55, %v5235_v10  ;;  %v7937_v55 = vld [vmem:[#allocation61_spill] sm:$0xff] }
 0x284   : > { %v1090_v58 = vsub.f32 %v5139_v63, %v5235_v10  ;;  %v1092_v62 = vsub.f32 %v5145_v33, %v5235_v10  ;;  %v1094_v3 = vsub.f32 %v5151_v26, %v5235_v10  ;;  %v1096_v31 = vsub.f32 %v5157_v23, %v5235_v10 }
 0x285   : > { %v1098_v39 = vsub.f32 %v5163_v19, %v5235_v10  ;;  %v1100_v43 = vsub.f32 %v5169_v17, %v5235_v10  ;;  %v1102_v47 = vsub.f32 %v5175_v15, %v5235_v10  ;;  %v1104_v51 = vsub.f32 %v5181_v13, %v5235_v10 }
 0x286   : > { %v1122_v63 = vmul.f32 1.442695, %v1058_v61  ;;  %v1126_v4 = vmul.f32 1.442695, %v1060_v2  ;;  %v1130_v33 = vmul.f32 1.442695, %v1062_v0 }
 0x287   : > { %v1134_v37 = vmul.f32 1.442695, %v1064_v20  ;;  %v1138_v45 = vmul.f32 1.442695, %v1066_v21  ;;  %v1142_v49 = vmul.f32 1.442695, %v1068_v24 }
 0x288   : > { %3978 = vpow2.f32 %v1122_v63  ;;  %v1146_v53 = vmul.f32 1.442695, %v1070_v35  ;;  %v1150_v57 = vmul.f32 1.442695, %v1072_v25  ;;  %v1154_v13 = vmul.f32 1.442695, %v1074_v28 }
 0x289   : > { %3980 = vpow2.f32 %v1126_v4  ;;  %v1158_v59 = vmul.f32 1.442695, %v1076_v30  ;;  %v1162_v61 = vmul.f32 1.442695, %v1078_v34  ;;  %v1166_v2 = vmul.f32 1.442695, %v1080_v38 }
 0x28a   : > { %3982 = vpow2.f32 %v1130_v33  ;;  %v1170_v0 = vmul.f32 1.442695, %v1082_v42  ;;  %v1174_v6 = vmul.f32 1.442695, %v1084_v46  ;;  %v1178_v20 = vmul.f32 1.442695, %v1086_v50 }
 0x28b   : > { %3984 = vpow2.f32 %v1134_v37  ;;  %v1182_v15 = vmul.f32 1.442695, %v1088_v54  ;;  %v1186_v41 = vmul.f32 1.442695, %v1090_v58  ;;  %v1190_v63 = vmul.f32 1.442695, %v1092_v62 }
 0x28c   : > { %3986 = vpow2.f32 %v1138_v45  ;;  %v1194_v21 = vmul.f32 1.442695, %v1094_v3  ;;  %v1198_v24 = vmul.f32 1.442695, %v1096_v31  ;;  %v1202_v4 = vmul.f32 1.442695, %v1098_v39 }
 0x28d   : > { %3988 = vpow2.f32 %v1142_v49  ;;  %v5307_v35 = vmul.f32 1.442695, %v1100_v43  ;;  %v5309_v25 = vmul.f32 1.442695, %v1102_v47  ;;  %v5311_v28 = vmul.f32 1.442695, %v1104_v51 }
 0x28e   : > { %3990 = vpow2.f32 %v1146_v53  ;;  %v7918_v39 = vld [vmem:[#allocation42_spill] sm:$0xff]  ;;  %v7920_v33 = vld [vmem:[#allocation44_spill] sm:$0xff]  ;;  %v7921_v49 = vld [vmem:[#allocation45_spill] sm:$0xff] }
 0x28f   : > { %3992 = vpow2.f32 %v1150_v57  ;;  %v7922_v57 = vld [vmem:[#allocation46_spill] sm:$0xff]  ;;  %v7924_v31 = vld [vmem:[#allocation48_spill] sm:$0xff]  ;;  %v7925_v3 = vld [vmem:[#allocation49_spill] sm:$0xff] }
 0x290   : > { %3994 = vpow2.f32 %v1154_v13  ;;  %v7919_v13 = vld [vmem:[#allocation43_spill] sm:$0xff]  ;;  %v7926_v53 = vld [vmem:[#allocation50_spill] sm:$0xff]  ;;  %v7928_v50 = vld [vmem:[#allocation52_spill] sm:$0xff] }
 0x291   : > { %3996 = vpow2.f32 %v1158_v59  ;;  %v7927_v54 = vld [vmem:[#allocation51_spill] sm:$0xff]  ;;  %v7929_v37 = vld [vmem:[#allocation53_spill] sm:$0xff]  ;;  %v7930_v38 = vld [vmem:[#allocation54_spill] sm:$0xff] }
 0x292   : > { %v5321_v46 = vpop.eup %3978  ;;  %3998 = vpow2.f32 %v1162_v61  ;;  %v7931_v61 = vld [vmem:[#allocation55_spill] sm:$0xff]  ;;  %v7932_v30 = vld [vmem:[#allocation56_spill] sm:$0xff] }
 0x293   : > { %v5329_v62 = vpop.eup %3980  ;;  %4000 = vpow2.f32 %v1166_v2  ;;  %v7923_v2 = vld [vmem:[#allocation47_spill] sm:$0xff] }
 0x294   : > { %v5337_v47 = vpop.eup %3982  ;;  %4002 = vpow2.f32 %v1170_v0  ;;  %v1250_v51 = vadd.f32 %v5329_v62, %v5321_v46  ;;  %v7936_v0 = vld [vmem:[#allocation60_spill] sm:$0xff] }
 0x295   : > { %v5345_v45 = vpop.eup %3984  ;;  %4004 = vpow2.f32 %v1174_v6  ;;  %v7934_v6 = vld [vmem:[#allocation58_spill] sm:$0xff] }
 0x296   : > { %v5353_v43 = vpop.eup %3986  ;;  %4006 = vpow2.f32 %v1178_v20  ;;  %v1251_v59 = vadd.f32 %v5337_v47, %v1250_v51 }
 0x297   : > { %v5360_v58 = vpop.eup %3988  ;;  %4008 = vpow2.f32 %v1182_v15 }
 0x298   : > { %v5368_v42 = vpop.eup %3990  ;;  %4010 = vpow2.f32 %v1186_v41  ;;  %v1252_v51 = vadd.f32 %v5345_v45, %v1251_v59 }
 0x299   : > { %v5375_v34 = vpop.eup %3992  ;;  %4012 = vpow2.f32 %v1190_v63 }
 0x29a   : > { %v5383_v19 = vpop.eup %3994  ;;  %4014 = vpow2.f32 %v1194_v21  ;;  %v1253_v59 = vadd.f32 %v5353_v43, %v1252_v51  ;;  %v7938_v51 = vsub.f32 %v5187_v11, %v5235_v10  ;;  %v7940_v21 = vsub.f32 %v5199_v7, %v5235_v10 }
 0x29b   : > { %v5390_v26 = vpop.eup %3996  ;;  %4016 = vpow2.f32 %v1198_v24  ;;  %v7939_v24 = vsub.f32 %v5193_v9, %v5235_v10  ;;  %v7942_v9 = vsub.f32 %v5211_v12, %v5235_v10 }
 0x29c   : > { %v5398_v17 = vpop.eup %3998  ;;  %4018 = vpow2.f32 %v1202_v4  ;;  %v1218_v15 = vmul.f32 1.442695, %v7938_v51  ;;  %v1254_v63 = vadd.f32 %v5360_v58, %v1253_v59  ;;  %v1226_v4 = vmul.f32 1.442695, %v7940_v21 }
 0x29d   : > { %v4001_v23 = vpop.eup %4000  ;;  %4020 = vpow2.f32 %v5307_v35  ;;  %v1222_v20 = vmul.f32 1.442695, %v7939_v24  ;;  %v7941_v59 = vsub.f32 %v5205_v22, %v5235_v10  ;;  %v7944_v22 = vsub.f32 %v5223_v16, %v5235_v10 }
 0x29e   : > { %v4003_v41 = vpop.eup %4002  ;;  %4022 = vpow2.f32 %v5309_v25  ;;  %v1255_v8 = vadd.f32 %v5368_v42, %v1254_v63  ;;  %v1234_v25 = vmul.f32 1.442695, %v7942_v9  ;;  %v7943_v63 = vsub.f32 %v5217_v14, %v5235_v10 }
 0x29f   : > { %v4005_v11 = vpop.eup %4004  ;;  %4024 = vpow2.f32 %v5311_v28  ;;  %v1230_v35 = vmul.f32 1.442695, %v7941_v59 }
 0x2a0   : > { %v5417_v51 = vpop.eup %4006  ;;  %4026 = vpow2.f32 %v1218_v15  ;;  %v1256_v24 = vadd.f32 %v5375_v34, %v1255_v8  ;;  %v1238_v28 = vmul.f32 1.442695, %v7943_v63  ;;  %v1242_v15 = vmul.f32 1.442695, %v7944_v22 }
 0x2a1   : > { %v5423_v7 = vpop.eup %4008  ;;  %4028 = vpow2.f32 %v1222_v20  ;;  %v7945_v8 = vsub.f32 %v5229_v18, %v5235_v10  ;;  %v7948_v10 = vsub.f32 %v5055_v32, %v5237_v5  ;;  %v7952_v32 = vsub.f32 %v5082_v48, %v5237_v5 }
 0x2a2   : > { %v5428_v21 = vpop.eup %4010  ;;  %4030 = vpow2.f32 %v1226_v4  ;;  %v1257_v59 = vadd.f32 %v5383_v19, %v1256_v24  ;;  %v7946_v4 = vsub.f32 %v5045_v27, %v5237_v5  ;;  %v7947_v24 = vsub.f32 %v5049_v29, %v5237_v5 }
 0x2a3   : > { %v5434_v12 = vpop.eup %4012  ;;  %4032 = vpow2.f32 %v1230_v35  ;;  %v1246_v20 = vmul.f32 1.442695, %v7945_v8  ;;  %v1132_v18 = vmul.f32 1.442695, %v7948_v10  ;;  %v7951_v29 = vsub.f32 %v5076_v44, %v5237_v5 }
 0x2a4   : > { %v5439_v9 = vpop.eup %4014  ;;  %4034 = vpow2.f32 %v1234_v25  ;;  %v1258_v14 = vadd.f32 %v5390_v26, %v1257_v59  ;;  %v1124_v63 = vmul.f32 1.442695, %v7946_v4  ;;  %v1128_v35 = vmul.f32 1.442695, %v7947_v24 }
 0x2a5   : > { %v5445_v16 = vpop.eup %4016  ;;  %4036 = vpow2.f32 %v1238_v28  ;;  %v7949_v25 = vsub.f32 %v5063_v36, %v5237_v5  ;;  %v7950_v28 = vsub.f32 %v5070_v40, %v5237_v5  ;;  %v1144_v4 = vmul.f32 1.442695, %v7951_v29 }
 0x2a6   : > { %v5456_v59 = vpop.eup %4018  ;;  %4038 = vpow2.f32 %v1242_v15  ;;  %v1259_v27 = vadd.f32 %v5398_v17, %v1258_v14  ;;  %v1148_v36 = vmul.f32 1.442695, %v7952_v32  ;;  %v7953_v15 = vsub.f32 %v5088_v52, %v5237_v5 }
 0x2a7   : > { %v1136_v22 = vmul.f32 1.442695, %v7949_v25  ;;  %v1140_v8 = vmul.f32 1.442695, %v7950_v28  ;;  %v5465_v24 = vpop.eup %4020  ;;  %4040 = vpow2.f32 %v1246_v20  ;;  %v7954_v14 = vsub.f32 %v5094_v56, %v5237_v5 }
 0x2a8   : > { %v1152_v10 = vmul.f32 1.442695, %v7953_v15  ;;  %v5476_v25 = vpop.eup %4022  ;;  %v1260_v28 = vadd.f32 %v4001_v23, %v1259_v27  ;;  %4042 = vpow2.f32 %v1124_v63  ;;  %v7955_v44 = vsub.f32 %v5100_v60, %v5237_v5 }
 0x2a9   : > { %v1156_v40 = vmul.f32 1.442695, %v7954_v14  ;;  %v7956_v48 = vsub.f32 %v5106_v1, %v5237_v5  ;;  %v5484_v32 = vpop.eup %4024  ;;  %4044 = vpow2.f32 %v1128_v35  ;;  %v5488_v52 = vpack.c.bf16 %v5329_v62, %v5321_v46 }
 0x2aa   : > { %v1160_v20 = vmul.f32 1.442695, %v7955_v44  ;;  %v5492_v56 = vpack.c.bf16 %v5345_v45, %v5337_v47  ;;  %v5496_v60 = vpack.c.bf16 %v5360_v58, %v5353_v43  ;;  %v5498_v63 = vpop.eup %4026  ;;  %v1261_v1 = vadd.f32 %v4003_v41, %v1260_v28  ;;  %v488_v45 = vld [vmem:[%s4901_s19 + $0x8] sm:$0xff] }
 0x2ab   : > { %v1164_v29 = vmul.f32 1.442695, %v7956_v48  ;;  %4046 = vpow2.f32 %v1132_v18  ;;  %v5502_v35 = vpack.c.bf16 %v5375_v34, %v5368_v42  ;;  %v5506_v46 = vpack.c.bf16 %v5390_v26, %v5383_v19  ;;  %v5508_v62 = vpop.eup %4028  ;;  %v490_v18 = vld [vmem:[%s4901_s19 + $0x18] sm:$0xff]  ;;  %v544_v19 = vld [vmem:[%s4901_s19 + $0x1c8] sm:$0xff] }
 0x2ac   : > { %4048 = vpow2.f32 %v1136_v22  ;;  %v5511_v58 = vpack.c.bf16 %v4001_v23, %v5398_v17  ;;  %v5513_v43 = vpack.c.bf16 %v4005_v11, %v4003_v41  ;;  %v5517_v47 = vpack.c.bf16 %v5423_v7, %v5417_v51  ;;  %v5521_v34 = vpop.eup %4030  ;;  %v546_v17 = vld [vmem:[%s4901_s19 + $0x1d8] sm:$0xff] }
 0x2ad   : > { %v1262_v42 = vadd.f32 %v4005_v11, %v1261_v1  ;;  %4050 = vpow2.f32 %v1140_v8  ;;  %v5525_v26 = vpack.c.bf16 %v5434_v12, %v5428_v21  ;;  %v5529_v23 = vpack.c.bf16 %v5445_v16, %v5439_v9  ;;  %v5533_v41 = vpop.eup %4032 }
 0x2ae   : > { %4052 = vpow2.f32 %v1144_v4  ;;  %v5537_v22 = vpack.c.bf16 %v5465_v24, %v5456_v59  ;;  %v5541_v11 = vpack.c.bf16 %v5484_v32, %v5476_v25  ;;  %v5545_v27 = vpack.c.bf16 %v5508_v62, %v5498_v63  ;;  %v5547_v8 = vpop.eup %4034 }
 0x2af   : > { %v1263_v15 = vadd.f32 %v5417_v51, %v1262_v42  ;;  %4054 = vpow2.f32 %v1148_v36  ;;  %v5552_v4 = vpack.c.bf16 %v5533_v41, %v5521_v34  ;;  %v5554_v14 = vpack.c.bf16 %v490_v18, %v488_v45  ;;  %v5556_v28 = vpop.eup %4036 }
 0x2b0   : > { %7957 = vst [vmem:[#allocation42_spill] sm:$0xff] %v5545_v27  ;;  %4056 = vpow2.f32 %v1152_v10  ;;  %v7958_v44 = vsub.f32 %v7918_v39, %v5237_v5  ;;  %v5561_v1 = vpack.c.bf16 %v546_v17, %v544_v19  ;;  %v5563_v27 = vpop.eup %4038  ;;  %v7960_v36 = vsub.f32 %v7919_v13, %v5237_v5 }
 0x2b1   : > { %v1264_v51 = vadd.f32 %v5423_v7, %v1263_v15  ;;  %4058 = vpow2.f32 %v1156_v40  ;;  %v5571_v45 = vpack.c.bf16 %v5556_v28, %v5547_v8  ;;  %1390 = vmatprep.mubr.bf16.mxu0 %v5554_v14  ;;  %v5574_v10 = vpop.eup %4040  ;;  %v7961_v39 = vsub.f32 %v7920_v33, %v5237_v5 }
 0x2b2   : > { %v1168_v48 = vmul.f32 1.442695, %v7958_v44  ;;  %7959 = vst [vmem:[#allocation43_spill] sm:$0xff] %v5561_v1  ;;  %v1172_v42 = vmul.f32 1.442695, %v7960_v36  ;;  %4060 = vpow2.f32 %v1160_v20  ;;  %1530 = vmatprep.mubr.bf16.mxu1 %v5561_v1  ;;  %v4043_v7 = vpop.eup %4042  ;;  %v7962_v13 = vsub.f32 %v7921_v49, %v5237_v5 }
 0x2b3   : > { %v1176_v18 = vmul.f32 1.442695, %v7961_v39  ;;  %v1265_v40 = vadd.f32 %v5428_v21, %v1264_v51  ;;  %4062 = vpow2.f32 %v1164_v29  ;;  %v5586_v17 = vpack.c.bf16 %v5574_v10, %v5563_v27  ;;  %v4045_v15 = vpop.eup %4044 }
 0x2b4   : > { %v1180_v19 = vmul.f32 1.442695, %v7962_v13  ;;  %4064 = vpow2.f32 %v1168_v48  ;;  %v7963_v33 = vsub.f32 %v7922_v57, %v5237_v5  ;;  %v7964_v44 = vsub.f32 %v7923_v2, %v5237_v5 }
 0x2b5   : > { %v4047_v21 = vpop.eup %4046  ;;  %v1266_v29 = vadd.f32 %v5434_v12, %v1265_v40  ;;  %4066 = vpow2.f32 %v1172_v42  ;;  %v1287_v49 = vadd.f32 %v4045_v15, %v4043_v7  ;;  %v1327_v51 = vpack.c.bf16 %v4045_v15, %v4043_v7 }
 0x2b6   : > { %v1184_v20 = vmul.f32 1.442695, %v7963_v33  ;;  %v1188_v36 = vmul.f32 1.442695, %v7964_v44  ;;  %v4049_v39 = vpop.eup %4048  ;;  %4068 = vpow2.f32 %v1176_v18  ;;  %v7965_v13 = vsub.f32 %v7924_v31, %v5237_v5 }
 0x2b7   : > { %v7966_v57 = vsub.f32 %v7925_v3, %v5237_v5  ;;  %v4051_v1 = vpop.eup %4050  ;;  %v1267_v2 = vadd.f32 %v5439_v9, %v1266_v29  ;;  %4070 = vpow2.f32 %v1180_v19  ;;  %v1288_v44 = vadd.f32 %v4047_v21, %v1287_v49  ;;  %1358 = vmatprep.subr.bf16.mxu0 %v1327_v51  ;;  %3846 = vmatprep.subr.bf16.mxu1 %v1327_v51 }
 0x2b8   : > { %v1192_v48 = vmul.f32 1.442695, %v7965_v13  ;;  %v1329_v12 = vpack.c.bf16 %v4049_v39, %v4047_v21  ;;  %v4053_v42 = vpop.eup %4052  ;;  %4072 = vpow2.f32 %v1184_v20  ;;  %v7967_v18 = vsub.f32 %v7926_v53, %v5237_v5  ;;  %1359 = vmatpush1.bf16.msra.mxu0 %v5488_v52  ;;  %3862 = vmatpush1.bf16.msra.mxu1 %v5488_v52 }
 0x2b9   : > { %v1196_v33 = vmul.f32 1.442695, %v7966_v57  ;;  %v7968_v31 = vsub.f32 %v7927_v54, %v5237_v5  ;;  %v4055_v3 = vpop.eup %4054  ;;  %v1268_v9 = vadd.f32 %v5445_v16, %v1267_v2  ;;  %4074 = vpow2.f32 %v1188_v36 }
 0x2ba   : > { %v1200_v7 = vmul.f32 1.442695, %v7967_v18  ;;  %v1289_v19 = vadd.f32 %v4049_v39, %v1288_v44  ;;  %1360 = vmatprep.subr.bf16.mxu0 %v1329_v12  ;;  %3847 = vmatprep.subr.bf16.mxu1 %v1329_v12  ;;  %v1331_v15 = vpack.c.bf16 %v4053_v42, %v4051_v1  ;;  %v4057_v20 = vpop.eup %4056  ;;  %4076 = vpow2.f32 %v1192_v48 }
 0x2bb   : > { %v1204_v40 = vmul.f32 1.442695, %v7968_v31  ;;  %v7969_v53 = vsub.f32 %v7928_v50, %v5237_v5  ;;  %v7970_v54 = vsub.f32 %v7929_v37, %v5237_v5  ;;  %v4059_v49 = vpop.eup %4058  ;;  %v1269_v52 = vadd.f32 %v5456_v59, %v1268_v9  ;;  %v7977_v9 = vld [vmem:[#allocation59_spill] sm:$0xff] }
 0x2bc   : > { %4078 = vpow2.f32 %v1196_v33  ;;  %v1290_v16 = vadd.f32 %v4051_v1, %v1289_v19  ;;  %v1333_v36 = vpack.c.bf16 %v4057_v20, %v4055_v3  ;;  %v4061_v51 = vpop.eup %4060  ;;  %v7971_v39 = vsub.f32 %v7930_v38, %v5237_v5  ;;  %1361 = vmatpush1.bf16.msra.mxu0 %v5492_v56  ;;  %3863 = vmatpush1.bf16.msra.mxu1 %v5492_v56 }
 0x2bd   : > { %v1208_v21 = vmul.f32 1.442695, %v7969_v53  ;;  %v1212_v29 = vmul.f32 1.442695, %v7970_v54  ;;  %4080 = vpow2.f32 %v1200_v7  ;;  %v7972_v50 = vsub.f32 %v7931_v61, %v5237_v5  ;;  %v4063_v37 = vpop.eup %4062  ;;  %1362 = vmatprep.subr.bf16.mxu0 %v1331_v15  ;;  %3848 = vmatprep.subr.bf16.mxu1 %v1331_v15  ;;  %v7974_v61 = vld [vmem:[#allocation57_spill] sm:$0xff] }
 0x2be   : > { %v1216_v13 = vmul.f32 1.442695, %v7971_v39  ;;  %v1270_v59 = vadd.f32 %v5465_v24, %v1269_v52  ;;  %4082 = vpow2.f32 %v1204_v40  ;;  %v1291_v1 = vadd.f32 %v4053_v42, %v1290_v16  ;;  %v4065_v33 = vpop.eup %4064 }
 0x2bf   : > { %v1220_v48 = vmul.f32 1.442695, %v7972_v50  ;;  %v1335_v57 = vpack.c.bf16 %v4061_v51, %v4059_v49  ;;  %4084 = vpow2.f32 %v1208_v21  ;;  %v7973_v38 = vsub.f32 %v7932_v30, %v5237_v5  ;;  %v4067_v18 = vpop.eup %4066 }
 0x2c0   : > { %v7975_v44 = vsub.f32 %v7974_v61, %v5237_v5  ;;  %v1271_v56 = vadd.f32 %v5476_v25, %v1270_v59  ;;  %4086 = vpow2.f32 %v1212_v29  ;;  %v1292_v24 = vadd.f32 %v4055_v3, %v1291_v1  ;;  %v4069_v42 = vpop.eup %4068  ;;  %1363 = vmatpush1.bf16.msra.mxu0 %v5496_v60  ;;  %3864 = vmatpush1.bf16.msra.mxu1 %v5496_v60 }
 0x2c1   : > { %v1224_v2 = vmul.f32 1.442695, %v7973_v38  ;;  %v1337_v7 = vpack.c.bf16 %v4065_v33, %v4063_v37  ;;  %4088 = vpow2.f32 %v1216_v13  ;;  %v7976_v31 = vsub.f32 %v7934_v6, %v5237_v5  ;;  %v4071_v15 = vpop.eup %4070  ;;  %1364 = vmatprep.subr.bf16.mxu0 %v1333_v36  ;;  %3849 = vmatprep.subr.bf16.mxu1 %v1333_v36  ;;  %v7981_v36 = vld [vmem:[#allocation62_spill] sm:$0xff] }
 0x2c2   : > { %v1228_v12 = vmul.f32 1.442695, %v7975_v44  ;;  %v7978_v30 = vsub.f32 %v7977_v9, %v5237_v5  ;;  %v1272_v25 = vadd.f32 %v5484_v32, %v1271_v56  ;;  %4090 = vpow2.f32 %v1220_v48  ;;  %v4073_v21 = vpop.eup %4072 }
 0x2c3   : > { %v1232_v40 = vmul.f32 1.442695, %v7976_v31  ;;  %v1293_v3 = vadd.f32 %v4057_v20, %v1292_v24  ;;  %v1339_v53 = vpack.c.bf16 %v4069_v42, %v4067_v18  ;;  %4092 = vpow2.f32 %v1224_v2  ;;  %v5649_v16 = vpop.eup %4074 }
 0x2c4   : > { %v1236_v19 = vmul.f32 1.442695, %v7978_v30  ;;  %v7979_v6 = vsub.f32 %v7936_v0, %v5237_v5  ;;  %v7980_v29 = vsub.f32 %v7937_v55, %v5237_v5  ;;  %v1273_v60 = vadd.f32 %v5498_v63, %v1272_v25  ;;  %v4077_v39 = vpop.eup %4076  ;;  %1365 = vmatpush1.bf16.msra.mxu0 %v5502_v35  ;;  %3865 = vmatpush1.bf16.msra.mxu1 %v5502_v35 }
 0x2c5   : > { %4094 = vpow2.f32 %v1228_v12  ;;  %v1294_v32 = vadd.f32 %v4059_v49, %v1293_v3  ;;  %v1341_v20 = vpack.c.bf16 %v4073_v21, %v4071_v15  ;;  %v7982_v13 = vsub.f32 %v7981_v36, %v5237_v5  ;;  %1366 = vmatprep.subr.bf16.mxu0 %v1335_v57  ;;  %3850 = vmatprep.subr.bf16.mxu1 %v1335_v57 }
 0x2c6   : > { %v1240_v54 = vmul.f32 1.442695, %v7979_v6  ;;  %v1244_v52 = vmul.f32 1.442695, %v7980_v29  ;;  %4096 = vpow2.f32 %v1232_v40  ;;  %v4079_v0 = vpop.eup %4078  ;;  %v1274_v55 = vadd.f32 %v5508_v62, %v1273_v60  ;;  %v489_v60 = vld [vmem:[%s4901_s19 + $0x10] sm:$0xff] }
 0x2c7   : > { %v1248_v50 = vmul.f32 1.442695, %v7982_v13  ;;  %4098 = vpow2.f32 %v1236_v19  ;;  %v1295_v48 = vadd.f32 %v4061_v51, %v1294_v32  ;;  %v1343_v63 = vpack.c.bf16 %v4077_v39, %v5649_v16  ;;  %v4081_v49 = vpop.eup %4080  ;;  %v543_v32 = vld [vmem:[%s4901_s19 + $0x1c0] sm:$0xff]  ;;  %v548_v13 = vld [vmem:[%s4901_s19 + $0x1e8] sm:$0xff] }
 0x2c8   : > { %4100 = vpow2.f32 %v1240_v54  ;;  %v4083_v59 = vpop.eup %4082  ;;  %v1275_v1 = vadd.f32 %v5521_v34, %v1274_v55  ;;  %v1345_v38 = vpack.c.bf16 %v4081_v49, %v4079_v0  ;;  %1367 = vmatpush1.bf16.msra.mxu0 %v5506_v46  ;;  %3866 = vmatpush1.bf16.msra.mxu1 %v5506_v46  ;;  %v7983_v54 = vld [vmem:[#allocation42_spill] sm:$0xff]  ;;  %v4243_v55 = vld [vmem:[%s4898_s13 + $0x18] sm:$0xff] }
 0x2c9   : > { %4102 = vpow2.f32 %v1244_v52  ;;  %v1296_v5 = vadd.f32 %v4063_v37, %v1295_v48  ;;  %v4085_v2 = vpop.eup %4084  ;;  %1368 = vmatprep.subr.bf16.mxu0 %v1337_v7  ;;  %3851 = vmatprep.subr.bf16.mxu1 %v1337_v7 }
 0x2ca   : > { %4104 = vpow2.f32 %v1248_v50  ;;  %v4087_v35 = vpop.eup %4086  ;;  %v1276_v62 = vadd.f32 %v5533_v41, %v1275_v1  ;;  %v1347_v57 = vpack.c.bf16 %v4085_v2, %v4083_v59  ;;  %v550_v50 = vld [vmem:[%s4901_s19 + $0x1f8] sm:$0xff]  ;;  %v4244_v1 = vld [vmem:[%s4898_s13 + $0x28] sm:$0xff] }
 0x2cb   : > { %v1297_v51 = vadd.f32 %v4065_v33, %v1296_v5  ;;  %v4089_v61 = vpop.eup %4088  ;;  %v4245_v5 = vld [vmem:[%s4898_s13 + $0x38] sm:$0xff] }
 0x2cc   : > { %v4091_v44 = vpop.eup %4090  ;;  %v1277_v34 = vadd.f32 %v5547_v8, %v1276_v62  ;;  %v1349_v37 = vpack.c.bf16 %v4089_v61, %v4087_v35  ;;  %1369 = vmatpush1.bf16.msra.mxu0 %v5511_v58  ;;  %3867 = vmatpush1.bf16.msra.mxu1 %v5511_v58  ;;  %v549_v62 = vld [vmem:[%s4901_s19 + $0x1f0] sm:$0xff] }
 0x2cd   : > { %v1298_v12 = vadd.f32 %v4067_v18, %v1297_v51  ;;  %v4093_v56 = vpop.eup %4092  ;;  %1370 = vmatprep.subr.bf16.mxu0 %v1339_v53  ;;  %3852 = vmatprep.subr.bf16.mxu1 %v1339_v53  ;;  %v496_v51 = vld [vmem:[%s4901_s19 + $0x48] sm:$0xff] }
 0x2ce   : > { %v1278_v46 = vadd.f32 %v5556_v28, %v1277_v34  ;;  %v1351_v41 = vpack.c.bf16 %v4093_v56, %v4091_v44  ;;  %v7988_v34 = vld [vmem:[#allocation25_spill] sm:$0xff] }
 0x2cf   : > { %v4095_v24 = vpop.eup %4094  ;;  %v1299_v31 = vadd.f32 %v4069_v42, %v1298_v12  ;;  %v7989_v12 = vld [vmem:[#allocation24_spill] sm:$0xff] }
 0x2d0   : > { %v4097_v33 = vpop.eup %4096  ;;  %v1279_v40 = vadd.f32 %v5563_v27, %v1278_v46  ;;  %1371 = vmatpush1.bf16.msra.mxu0 %v5513_v43  ;;  %3868 = vmatpush1.bf16.msra.mxu1 %v5513_v43 }
 0x2d1   : > { %v4099_v7 = vpop.eup %4098  ;;  %v1300_v9 = vadd.f32 %v4071_v15, %v1299_v31  ;;  %v1353_v8 = vpack.c.bf16 %v4097_v33, %v4095_v24  ;;  %1372 = vmatprep.subr.bf16.mxu0 %v1341_v20  ;;  %3853 = vmatprep.subr.bf16.mxu1 %v1341_v20  ;;  %v545_v20 = vld [vmem:[%s4901_s19 + $0x1d0] sm:$0xff]  ;;  %v4248_v31 = vld [vmem:[%s4898_s13 + $0x48] sm:$0xff] }
 0x2d2   : > { %v4101_v18 = vpop.eup %4100  ;;  %v5671_v58 = vadd.f32 %v5574_v10, %v1279_v40 }
 0x2d3   : > { %v4103_v30 = vpop.eup %4102  ;;  %v1301_v28 = vadd.f32 %v4073_v21, %v1300_v9  ;;  %v1355_v42 = vpack.c.bf16 %v4101_v18, %v4099_v7 }
 0x2d4   : > { %v4105_v19 = vpop.eup %4104  ;;  %1373 = vmatpush1.bf16.msra.mxu0 %v5517_v47  ;;  %3869 = vmatpush1.bf16.msra.mxu1 %v5517_v47 }
 0x2d5   : > { %v1302_v25 = vadd.f32 %v5649_v16, %v1301_v28  ;;  %v1357_v3 = vpack.c.bf16 %v4105_v19, %v4103_v30  ;;  %1374 = vmatprep.subr.bf16.mxu0 %v1343_v63  ;;  %3854 = vmatprep.subr.bf16.mxu1 %v1343_v63  ;;  %v487_v16 = vld [vmem:[%s4901_s19] sm:$0xff] }
 0x2d6   : > { %v5702_v63 = vpack.c.bf16 %v489_v60, %v487_v16 }
 0x2d7   : > { %v1303_v27 = vadd.f32 %v4077_v39, %v1302_v25  ;;  %v492_v39 = vld [vmem:[%s4901_s19 + $0x28] sm:$0xff] }
 0x2d8   : > { %1375 = vmatpush1.bf16.msra.mxu0 %v5525_v26  ;;  %3870 = vmatpush1.bf16.msra.mxu1 %v5525_v26  ;;  %7984 = vst [vmem:[#allocation44_spill] sm:$0xff] %v5702_v63 }
 0x2d9   : > { %v1304_v43 = vadd.f32 %v4079_v0, %v1303_v27  ;;  %1376 = vmatprep.subr.bf16.mxu0 %v1345_v38  ;;  %3855 = vmatprep.subr.bf16.mxu1 %v1345_v38  ;;  %v4242_v0 = vld [vmem:[%s4898_s13 + $0x8] sm:$0xff]  ;;  %v2250_v38 = vpack.c.bf16 %v4245_v5, %v4244_v1  ;;  %v497_v27 = vld [vmem:[%s4901_s19 + $0x50] sm:$0xff] }
 0x2da   : > { %v2248_v48 = vpack.c.bf16 %v4243_v55, %v4242_v0  ;;  %v499_v0 = vld [vmem:[%s4901_s19 + $0x60] sm:$0xff]  ;;  %v501_v55 = vld [vmem:[%s4901_s19 + $0x70] sm:$0xff]  ;;  %v504_v5 = vld [vmem:[%s4901_s19 + $0x88] sm:$0xff] }
 0x2db   : > { %v1305_v10 = vadd.f32 %v4081_v49, %v1304_v43  ;;  %v551_v43 = vld [vmem:[%s4901_s19 + $0x200] sm:$0xff]  ;;  %v557_v1 = vld [vmem:[%s4901_s19 + $0x230] sm:$0xff] }
 0x2dc   : > { %1377 = vmatpush1.bf16.msra.mxu0 %v5529_v23  ;;  %3871 = vmatpush1.bf16.msra.mxu1 %v5529_v23 }
 0x2dd   : > { %v1306_v15 = vadd.f32 %v4083_v59, %v1305_v10  ;;  %1378 = vmatprep.subr.bf16.mxu0 %v1347_v57  ;;  %3856 = vmatprep.subr.bf16.mxu1 %v1347_v57  ;;  %v5710_v59 = vpack.c.bf16 %v550_v50, %v548_v13  ;;  %v498_v57 = vld [vmem:[%s4901_s19 + $0x58] sm:$0xff]  ;;  %v553_v10 = vld [vmem:[%s4901_s19 + $0x210] sm:$0xff] }
 0x2de   : > { %v5737_v9 = vpack.c.bf16 %v498_v57, %v496_v51  ;;  %v4261_v13 = vld [vmem:[%s4898_s13 + $0xb8] sm:$0xff]  ;;  %v4264_v57 = vld [vmem:[%s4898_s13 + $0xc8] sm:$0xff] }
 0x2df   : > { %v1307_v53 = vadd.f32 %v4085_v2, %v1306_v15  ;;  %7987 = vst [vmem:[#allocation47_spill] sm:$0xff] %v5710_v59  ;;  %v491_v2 = vld [vmem:[%s4901_s19 + $0x20] sm:$0xff]  ;;  %v500_v15 = vld [vmem:[%s4901_s19 + $0x68] sm:$0xff] }
 0x2e0   : > { %1379 = vmatpush1.bf16.msra.mxu0 %v5537_v22  ;;  %3872 = vmatpush1.bf16.msra.mxu1 %v5537_v22  ;;  %7993 = vst [vmem:[#allocation50_spill] sm:$0xff] %v5737_v9 }
 0x2e1   : > { %v1308_v47 = vadd.f32 %v4087_v35, %v1307_v53  ;;  %1380 = vmatprep.subr.bf16.mxu0 %v1349_v37  ;;  %3857 = vmatprep.subr.bf16.mxu1 %v1349_v37  ;;  %v547_v35 = vld [vmem:[%s4901_s19 + $0x1e0] sm:$0xff]  ;;  %v7990_v37 = vpack.c.bf16 %v7988_v34, %v7989_v12  ;;  %v502_v53 = vld [vmem:[%s4901_s19 + $0x78] sm:$0xff]  ;;  %v5789_v34 = vpack.c.bf16 %v501_v55, %v499_v0 }
 0x2e2   : > { %v5735_v40 = vpack.c.bf16 %v549_v62, %v547_v35  ;;  %v5765_v16 = vpack.c.bf16 %v502_v53, %v500_v15  ;;  %v4262_v35 = vld [vmem:[%s4898_s13 + $0xa0] sm:$0xff]  ;;  %v4263_v62 = vld [vmem:[%s4898_s13 + $0xb0] sm:$0xff] }
 0x2e3   : > { %v1309_v21 = vadd.f32 %v4089_v61, %v1308_v47  ;;  %v552_v61 = vld [vmem:[%s4901_s19 + $0x208] sm:$0xff]  ;;  %v2257_v51 = vpack.c.bf16 %v4263_v62, %v4262_v35  ;;  %7999 = vst [vmem:[#allocation56_spill] sm:$0xff] %v5789_v34  ;;  %v4271_v15 = vld [vmem:[%s4898_s13 + $0xf0] sm:$0xff]  ;;  %v574_v62 = vld [vmem:[%s4901_s19 + $0x2b8] sm:$0xff] }
 0x2e4   : > { %1381 = vmatpush1.bf16.msra.mxu0 %v5541_v11  ;;  %3873 = vmatpush1.bf16.msra.mxu1 %v5541_v11  ;;  %7992 = vst [vmem:[#allocation49_spill] sm:$0xff] %v5735_v40  ;;  %v556_v47 = vld [vmem:[%s4901_s19 + $0x228] sm:$0xff]  ;;  %7997 = vst [vmem:[#allocation54_spill] sm:$0xff] %v5765_v16 }
 0x2e5   : > { %v1310_v26 = vadd.f32 %v4091_v44, %v1309_v21  ;;  %1382 = vmatprep.subr.bf16.mxu0 %v1351_v41  ;;  %3858 = vmatprep.subr.bf16.mxu1 %v1351_v41  ;;  %v554_v44 = vld [vmem:[%s4901_s19 + $0x218] sm:$0xff]  ;;  %v572_v35 = vld [vmem:[%s4901_s19 + $0x2a8] sm:$0xff] }
 0x2e6   : > { %v4249_v41 = vld [vmem:[%s4898_s13 + $0x58] sm:$0xff] }
 0x2e7   : > { %v1311_v6 = vadd.f32 %v4093_v56, %v1310_v26  ;;  %v4246_v56 = vld [vmem:[%s4898_s13 + $0x20] sm:$0xff]  ;;  %v558_v21 = vld [vmem:[%s4901_s19 + $0x238] sm:$0xff] }
 0x2e8   : > { %1383 = vmatpush1.bf16.msra.mxu0 %v7983_v54  ;;  %3874 = vmatpush1.bf16.msra.mxu1 %v7983_v54  ;;  %v4254_v26 = vld [vmem:[%s4898_s13 + $0x60] sm:$0xff]  ;;  %v4256_v54 = vld [vmem:[%s4898_s13 + $0x88] sm:$0xff]  ;;  %v5767_v60 = vpack.c.bf16 %v558_v21, %v556_v47 }
 0x2e9   : > { %v1312_v23 = vadd.f32 %v4095_v24, %v1311_v6  ;;  %1384 = vmatprep.subr.bf16.mxu0 %v1353_v8  ;;  %3859 = vmatprep.subr.bf16.mxu1 %v1353_v8  ;;  %v4247_v24 = vld [vmem:[%s4898_s13 + $0x30] sm:$0xff]  ;;  %v5739_v8 = vpack.c.bf16 %v554_v44, %v552_v61  ;;  %v4265_v61 = vld [vmem:[%s4898_s13 + $0xd8] sm:$0xff] }
 0x2ea   : > { %v2249_v46 = vpack.c.bf16 %v4247_v24, %v4246_v56  ;;  %v4255_v6 = vld [vmem:[%s4898_s13 + $0x70] sm:$0xff]  ;;  %7998 = vst [vmem:[#allocation55_spill] sm:$0xff] %v5767_v60  ;;  %v2260_v44 = vpack.c.bf16 %v4265_v61, %v4264_v57  ;;  %v4266_v24 = vld [vmem:[%s4898_s13 + $0xc0] sm:$0xff] }
 0x2eb   : > { %v1313_v22 = vadd.f32 %v4097_v33, %v1312_v23  ;;  %v2252_v33 = vpack.c.bf16 %v4249_v41, %v4248_v31  ;;  %7994 = vst [vmem:[#allocation51_spill] sm:$0xff] %v5739_v8  ;;  %v2253_v23 = vpack.c.bf16 %v4255_v6, %v4254_v26  ;;  %v4268_v41 = vld [vmem:[%s4898_s13 + $0xe8] sm:$0xff] }
 0x2ec   : > { %1385 = vmatpush1.bf16.msra.mxu0 %v5552_v4  ;;  %3875 = vmatpush1.bf16.msra.mxu1 %v5552_v4  ;;  %v494_v4 = vld [vmem:[%s4901_s19 + $0x38] sm:$0xff] }
 0x2ed   : > { %v1314_v29 = vadd.f32 %v4099_v7, %v1313_v22  ;;  %1386 = vmatprep.subr.bf16.mxu0 %v1355_v42  ;;  %3860 = vmatprep.subr.bf16.mxu1 %v1355_v42  ;;  %v5708_v49 = vpack.c.bf16 %v494_v4, %v492_v39  ;;  %v4252_v42 = vld [vmem:[%s4898_s13 + $0x68] sm:$0xff]  ;;  %v4257_v22 = vld [vmem:[%s4898_s13 + $0x98] sm:$0xff] }
 0x2ee   : > { %v4260_v4 = vld [vmem:[%s4898_s13 + $0xa8] sm:$0xff] }
 0x2ef   : > { %v1315_v11 = vadd.f32 %v4101_v18, %v1314_v29  ;;  %7986 = vst [vmem:[#allocation46_spill] sm:$0xff] %v5708_v49  ;;  %v4250_v18 = vld [vmem:[%s4898_s13 + $0x40] sm:$0xff]  ;;  %v2256_v29 = vpack.c.bf16 %v4257_v22, %v4256_v54  ;;  %v2258_v50 = vpack.c.bf16 %v4261_v13, %v4260_v4  ;;  %v509_v54 = vld [vmem:[%s4901_s19 + $0xb0] sm:$0xff]  ;;  %v570_v4 = vld [vmem:[%s4901_s19 + $0x298] sm:$0xff] }
 0x2f0   : > { %1387 = vmatpush1.bf16.msra.mxu0 %v5571_v45  ;;  %3876 = vmatpush1.bf16.msra.mxu1 %v5571_v45  ;;  %v5704_v45 = vpack.c.bf16 %v545_v20, %v543_v32  ;;  %v4258_v32 = vld [vmem:[%s4898_s13 + $0x80] sm:$0xff]  ;;  %v4259_v20 = vld [vmem:[%s4898_s13 + $0x90] sm:$0xff] }
 0x2f1   : > { %v1316_v52 = vadd.f32 %v4103_v30, %v1315_v11  ;;  %1388 = vmatprep.subr.bf16.mxu0 %v1357_v3  ;;  %3861 = vmatprep.subr.bf16.mxu1 %v1357_v3  ;;  %v4251_v30 = vld [vmem:[%s4898_s13 + $0x50] sm:$0xff]  ;;  %v495_v3 = vld [vmem:[%s4901_s19 + $0x40] sm:$0xff]  ;;  %v2255_v39 = vpack.c.bf16 %v4259_v20, %v4258_v32  ;;  %v512_v32 = vld [vmem:[%s4901_s19 + $0xc8] sm:$0xff] }
 0x2f2   : > { %7985 = vst [vmem:[#allocation45_spill] sm:$0xff] %v5704_v45  ;;  %v2251_v28 = vpack.c.bf16 %v4251_v30, %v4250_v18  ;;  %v5761_v11 = vpack.c.bf16 %v497_v27, %v495_v3  ;;  %v503_v30 = vld [vmem:[%s4901_s19 + $0x80] sm:$0xff]  ;;  %v510_v3 = vld [vmem:[%s4901_s19 + $0xb8] sm:$0xff]  ;;  %v564_v27 = vld [vmem:[%s4901_s19 + $0x268] sm:$0xff] }
 0x2f3   : > { %v5695_v36 = vadd.f32 %v4105_v19, %v1316_v52  ;;  %v4253_v19 = vld [vmem:[%s4898_s13 + $0x78] sm:$0xff]  ;;  %v5763_v52 = vpack.c.bf16 %v553_v10, %v551_v43  ;;  %v4270_v10 = vld [vmem:[%s4898_s13 + $0xe0] sm:$0xff] }
 0x2f4   : > { %1389 = vmatpush1.bf16.msra.mxu0 %v5586_v17  ;;  %3877 = vmatpush1.bf16.msra.mxu1 %v5586_v17  ;;  %v493_v17 = vld [vmem:[%s4901_s19 + $0x30] sm:$0xff]  ;;  %v2254_v25 = vpack.c.bf16 %v4253_v19, %v4252_v42  ;;  %7995 = vst [vmem:[#allocation52_spill] sm:$0xff] %v5761_v11  ;;  %v559_v42 = vld [vmem:[%s4901_s19 + $0x240] sm:$0xff]  ;;  %v566_v43 = vld [vmem:[%s4901_s19 + $0x278] sm:$0xff]  ;;  %v2261_v53 = vpack.c.bf16 %v4271_v15, %v4270_v10 }
 0x2f5   : > { %2263 = vmatprep.subr.bf16.mxu0 %v2248_v48  ;;  %v5733_v7 = vpack.c.bf16 %v493_v17, %v491_v2  ;;  %7996 = vst [vmem:[#allocation53_spill] sm:$0xff] %v5763_v52  ;;  %v555_v48 = vld [vmem:[%s4901_s19 + $0x220] sm:$0xff]  ;;  %v560_v2 = vld [vmem:[%s4901_s19 + $0x248] sm:$0xff]  ;;  %v562_v17 = vld [vmem:[%s4901_s19 + $0x258] sm:$0xff]  ;;  %v5821_v6 = vpack.c.bf16 %v566_v43, %v564_v27 }
 0x2f6   : > { %v5791_v12 = vpack.c.bf16 %v557_v1, %v555_v48  ;;  %v5795_v56 = vpack.c.bf16 %v562_v17, %v560_v2  ;;  %v561_v19 = vld [vmem:[%s4901_s19 + $0x250] sm:$0xff]  ;;  %v563_v22 = vld [vmem:[%s4901_s19 + $0x260] sm:$0xff]  ;;  %v514_v20 = vld [vmem:[%s4901_s19 + $0xd8] sm:$0xff] }
 0x2f7   : > { %1391 = vmatmul.mubr.bf16.vlgmr.msra.gmra.mrb[64].mxu0 %v5702_v63  ;;  %1531 = vmatmul.mubr.bf16.vlgmr.msra.gmra.mrb[0].mxu1 %v5704_v45  ;;  %7991 = vst [vmem:[#allocation48_spill] sm:$0xff] %v5733_v7  ;;  %v5817_v21 = vpack.c.bf16 %v561_v19, %v559_v42  ;;  %8006 = vst [vmem:[#allocation42_spill] sm:$0xff] %v5821_v6  ;;  %v5839_v0 = vpack.c.bf16 %v514_v20, %v512_v32  ;;  %v511_v48 = vld [vmem:[%s4901_s19 + $0xc0] sm:$0xff]  ;;  %v513_v1 = vld [vmem:[%s4901_s19 + $0xd0] sm:$0xff] }
 0x2f8   : > { %1400 = vmatprep.mubr.bf16.mxu0 %v5708_v49  ;;  %1540 = vmatprep.mubr.bf16.mxu1 %v5710_v59  ;;  %8000 = vst [vmem:[#allocation58_spill] sm:$0xff] %v5791_v12  ;;  %8002 = vst [vmem:[#allocation61_spill] sm:$0xff] %v5795_v56  ;;  %v516_v2 = vld [vmem:[%s4901_s19 + $0xe8] sm:$0xff]  ;;  %v518_v17 = vld [vmem:[%s4901_s19 + $0xf8] sm:$0xff] }
 0x2f9   : > { %2264 = vmatpush1.bf16.msra.mxu0 %v7990_v37  ;;  %8004 = vst [vmem:[#allocation59_spill] sm:$0xff] %v5817_v21  ;;  %8009 = vst [vmem:[#allocation63_spill] sm:$0xff] %v5839_v0  ;;  %v5859_v61 = vpack.c.bf16 %v518_v17, %v516_v2  ;;  %v519_v27 = vld [vmem:[%s4901_s19 + $0x100] sm:$0xff]  ;;  %v521_v43 = vld [vmem:[%s4901_s19 + $0x110] sm:$0xff] }
 0x2fa   : > { %2265 = vmatprep.subr.bf16.mxu0 %v2250_v38  ;;  %v506_v38 = vld [vmem:[%s4901_s19 + $0x98] sm:$0xff]  ;;  %v575_v10 = vld [vmem:[%s4901_s19 + $0x2c0] sm:$0xff]  ;;  %v577_v15 = vld [vmem:[%s4901_s19 + $0x2d0] sm:$0xff] }
 0x2fb   : > { %v5793_v37 = vpack.c.bf16 %v506_v38, %v504_v5  ;;  %v567_v5 = vld [vmem:[%s4901_s19 + $0x280] sm:$0xff]  ;;  %v569_v38 = vld [vmem:[%s4901_s19 + $0x290] sm:$0xff]  ;;  %8013 = vst [vmem:[#allocation67_spill] sm:$0xff] %v5859_v61  ;;  %v5897_v32 = vpack.c.bf16 %v577_v15, %v575_v10  ;;  %v530_v2 = vld [vmem:[%s4901_s19 + $0x158] sm:$0xff] }
 0x2fc   : > { %v5857_v57 = vpack.c.bf16 %v569_v38, %v567_v5  ;;  %v581_v5 = vld [vmem:[%s4901_s19 + $0x2f0] sm:$0xff]  ;;  %v528_v38 = vld [vmem:[%s4901_s19 + $0x148] sm:$0xff]  ;;  %v590_v10 = vld [vmem:[%s4901_s19 + $0x338] sm:$0xff] }
 0x2fd   : > { %2266 = vmatpush1.bf16.msra.mxu0 %v2249_v46  ;;  %8001 = vst [vmem:[#allocation60_spill] sm:$0xff] %v5793_v37  ;;  %v4267_v46 = vld [vmem:[%s4898_s13 + $0xd0] sm:$0xff]  ;;  %8020 = vst [vmem:[#allocation74_spill] sm:$0xff] %v5897_v32  ;;  %v584_v17 = vld [vmem:[%s4901_s19 + $0x308] sm:$0xff] }
 0x2fe   : > { %2267 = vmatprep.subr.bf16.mxu0 %v2252_v33  ;;  %v2259_v31 = vpack.c.bf16 %v4267_v46, %v4266_v24  ;;  %v4269_v33 = vld [vmem:[%s4898_s13 + $0xf8] sm:$0xff]  ;;  %8012 = vst [vmem:[#allocation66_spill] sm:$0xff] %v5857_v57  ;;  %v515_v24 = vld [vmem:[%s4901_s19 + $0xe0] sm:$0xff]  ;;  %v517_v46 = vld [vmem:[%s4901_s19 + $0xf0] sm:$0xff] }
 0x2ff   : > { %1401 = vmatmul.mubr.bf16.gmra.mrb[68].mxu0 %v5733_v7  ;;  %1541 = vmatmul.mubr.bf16.gmra.mrb[4].mxu1 %v5735_v40  ;;  %v2262_v18 = vpack.c.bf16 %v4269_v33, %v4268_v41  ;;  %v573_v41 = vld [vmem:[%s4901_s19 + $0x2b0] sm:$0xff]  ;;  %v520_v33 = vld [vmem:[%s4901_s19 + $0x108] sm:$0xff]  ;;  %v5875_v42 = vpack.c.bf16 %v517_v46, %v515_v24  ;;  %v5919_v46 = vpack.c.bf16 %v530_v2, %v528_v38  ;;  %v538_v38 = vld [vmem:[%s4901_s19 + $0x198] sm:$0xff] }
 0x300   : > { %1410 = vmatprep.mubr.bf16.mxu0 %v5737_v9  ;;  %1550 = vmatprep.mubr.bf16.mxu1 %v5739_v8  ;;  %v592_v2 = vld [vmem:[%s4901_s19 + $0x348] sm:$0xff] }
 0x301   : > { %2268 = vmatpush1.bf16.msra.mxu0 %v2251_v28  ;;  %v505_v28 = vld [vmem:[%s4901_s19 + $0x90] sm:$0xff]  ;;  %8015 = vst [vmem:[#allocation69_spill] sm:$0xff] %v5875_v42  ;;  %8025 = vst [vmem:[#allocation79_spill] sm:$0xff] %v5919_v46 }
 0x302   : > { %2269 = vmatprep.subr.bf16.mxu0 %v2254_v25  ;;  %v508_v25 = vld [vmem:[%s4901_s19 + $0xa8] sm:$0xff]  ;;  %v5815_v47 = vpack.c.bf16 %v505_v28, %v503_v30  ;;  %v578_v28 = vld [vmem:[%s4901_s19 + $0x2d8] sm:$0xff] }
 0x303   : > { %v5819_v26 = vpack.c.bf16 %v510_v3, %v508_v25  ;;  %v576_v30 = vld [vmem:[%s4901_s19 + $0x2c8] sm:$0xff] }
 0x304   : > { %8003 = vst [vmem:[#allocation57_spill] sm:$0xff] %v5815_v47  ;;  %v5881_v3 = vpack.c.bf16 %v578_v28, %v576_v30  ;;  %v585_v30 = vld [vmem:[%s4901_s19 + $0x310] sm:$0xff]  ;;  %v532_v28 = vld [vmem:[%s4901_s19 + $0x168] sm:$0xff] }
 0x305   : > { %2270 = vmatpush1.bf16.msra.mxu0 %v2253_v23  ;;  %8005 = vst [vmem:[#allocation62_spill] sm:$0xff] %v5819_v26  ;;  %v507_v23 = vld [vmem:[%s4901_s19 + $0xa0] sm:$0xff] }
 0x306   : > { %2271 = vmatprep.subr.bf16.mxu0 %v2256_v29  ;;  %v565_v29 = vld [vmem:[%s4901_s19 + $0x270] sm:$0xff]  ;;  %v5835_v13 = vpack.c.bf16 %v509_v54, %v507_v23  ;;  %8018 = vst [vmem:[#allocation72_spill] sm:$0xff] %v5881_v3  ;;  %v526_v23 = vld [vmem:[%s4901_s19 + $0x138] sm:$0xff]  ;;  %v580_v54 = vld [vmem:[%s4901_s19 + $0x2e8] sm:$0xff] }
 0x307   : > { %1411 = vmatmul.mubr.bf16.gmra.mrb[72].mxu0 %v5761_v11  ;;  %1551 = vmatmul.mubr.bf16.gmra.mrb[8].mxu1 %v5763_v52 }
 0x308   : > { %1420 = vmatprep.mubr.bf16.mxu0 %v5765_v16  ;;  %1560 = vmatprep.mubr.bf16.mxu1 %v5767_v60  ;;  %8007 = vst [vmem:[#allocation25_spill] sm:$0xff] %v5835_v13 }
 0x309   : > { %2272 = vmatpush1.bf16.msra.mxu0 %v2255_v39  ;;  %v568_v39 = vld [vmem:[%s4901_s19 + $0x288] sm:$0xff] }
 0x30a   : > { %2273 = vmatprep.subr.bf16.mxu0 %v2258_v50  ;;  %v5837_v50 = vpack.c.bf16 %v565_v29, %v563_v22  ;;  %v5841_v55 = vpack.c.bf16 %v570_v4, %v568_v39  ;;  %v582_v22 = vld [vmem:[%s4901_s19 + $0x2f8] sm:$0xff]  ;;  %v5895_v29 = vpack.c.bf16 %v521_v43, %v519_v27  ;;  %v523_v4 = vld [vmem:[%s4901_s19 + $0x120] sm:$0xff]  ;;  %v588_v43 = vld [vmem:[%s4901_s19 + $0x328] sm:$0xff] }
 0x30b   : > { %v5901_v39 = vpack.c.bf16 %v582_v22, %v580_v54  ;;  %v534_v27 = vld [vmem:[%s4901_s19 + $0x178] sm:$0xff]  ;;  %v5941_v54 = vpack.c.bf16 %v590_v10, %v588_v43  ;;  %v531_v22 = vld [vmem:[%s4901_s19 + $0x160] sm:$0xff]  ;;  %v593_v43 = vld [vmem:[%s4901_s19 + $0x350] sm:$0xff] }
 0x30c   : > { %8008 = vst [vmem:[#allocation24_spill] sm:$0xff] %v5837_v50  ;;  %8010 = vst [vmem:[#allocation64_spill] sm:$0xff] %v5841_v55  ;;  %v540_v10 = vld [vmem:[%s4901_s19 + $0x1a8] sm:$0xff] }
 0x30d   : > { %2274 = vmatpush1.bf16.msra.mxu0 %v2257_v51  ;;  %v5855_v51 = vpack.c.bf16 %v513_v1, %v511_v48  ;;  %8019 = vst [vmem:[#allocation73_spill] sm:$0xff] %v5895_v29  ;;  %8022 = vst [vmem:[#allocation76_spill] sm:$0xff] %v5901_v39  ;;  %v525_v48 = vld [vmem:[%s4901_s19 + $0x130] sm:$0xff]  ;;  %v579_v1 = vld [vmem:[%s4901_s19 + $0x2e0] sm:$0xff] }
 0x30e   : > { %2275 = vmatprep.subr.bf16.mxu0 %v2260_v44  ;;  %v5861_v44 = vpack.c.bf16 %v574_v62, %v572_v35  ;;  %v586_v35 = vld [vmem:[%s4901_s19 + $0x318] sm:$0xff]  ;;  %v5915_v62 = vpack.c.bf16 %v525_v48, %v523_v4  ;;  %v5917_v24 = vpack.c.bf16 %v581_v5, %v579_v1  ;;  %8030 = vst [vmem:[#allocation84_spill] sm:$0xff] %v5941_v54  ;;  %v533_v4 = vld [vmem:[%s4901_s19 + $0x170] sm:$0xff]  ;;  %v587_v48 = vld [vmem:[%s4901_s19 + $0x320] sm:$0xff] }
 0x30f   : > { %1421 = vmatmul.mubr.bf16.gmra.mrb[76].mxu0 %v5789_v34  ;;  %1561 = vmatmul.mubr.bf16.gmra.mrb[12].mxu1 %v5791_v12  ;;  %8011 = vst [vmem:[#allocation65_spill] sm:$0xff] %v5855_v51  ;;  %v589_v1 = vld [vmem:[%s4901_s19 + $0x330] sm:$0xff]  ;;  %v536_v5 = vld [vmem:[%s4901_s19 + $0x188] sm:$0xff] }
 0x310   : > { %1430 = vmatprep.mubr.bf16.mxu0 %v5793_v37  ;;  %1570 = vmatprep.mubr.bf16.mxu1 %v5795_v56  ;;  %8014 = vst [vmem:[#allocation68_spill] sm:$0xff] %v5861_v44  ;;  %8023 = vst [vmem:[#allocation77_spill] sm:$0xff] %v5915_v62 }
 0x311   : > { %2276 = vmatpush1.bf16.msra.mxu0 %v2259_v31  ;;  %v571_v31 = vld [vmem:[%s4901_s19 + $0x2a0] sm:$0xff]  ;;  %8024 = vst [vmem:[#allocation78_spill] sm:$0xff] %v5917_v24 }
 0x312   : > { %2277 = vmatprep.subr.bf16.mxu0 %v2262_v18  ;;  %v522_v18 = vld [vmem:[%s4901_s19 + $0x118] sm:$0xff]  ;;  %v5877_v19 = vpack.c.bf16 %v573_v41, %v571_v31  ;;  %v5921_v31 = vpack.c.bf16 %v586_v35, %v584_v17  ;;  %v527_v41 = vld [vmem:[%s4901_s19 + $0x140] sm:$0xff]  ;;  %v5955_v35 = vpack.c.bf16 %v533_v4, %v531_v22  ;;  %v596_v4 = vld [vmem:[%s4901_s19 + $0x368] sm:$0xff] }
 0x313   : > { %v5879_v25 = vpack.c.bf16 %v522_v18, %v520_v33  ;;  %v529_v33 = vld [vmem:[%s4901_s19 + $0x150] sm:$0xff]  ;;  %v583_v18 = vld [vmem:[%s4901_s19 + $0x300] sm:$0xff]  ;;  %v594_v17 = vld [vmem:[%s4901_s19 + $0x358] sm:$0xff] }
 0x314   : > { %8016 = vst [vmem:[#allocation70_spill] sm:$0xff] %v5877_v19  ;;  %8026 = vst [vmem:[#allocation80_spill] sm:$0xff] %v5921_v31  ;;  %v5935_v15 = vpack.c.bf16 %v529_v33, %v527_v41  ;;  %v5957_v41 = vpack.c.bf16 %v589_v1, %v587_v48  ;;  %v5959_v33 = vpack.c.bf16 %v538_v38, %v536_v5  ;;  %v542_v22 = vld [vmem:[%s4901_s19 + $0x1b8] sm:$0xff] }
 0x315   : > { %2278 = vmatpush1.bf16.msra.mxu0 %v2261_v53  ;;  %8017 = vst [vmem:[#allocation71_spill] sm:$0xff] %v5879_v25  ;;  %v524_v53 = vld [vmem:[%s4901_s19 + $0x128] sm:$0xff]  ;;  %8031 = vst [vmem:[#allocation85_spill] sm:$0xff] %v5955_v35  ;;  %v598_v48 = vld [vmem:[%s4901_s19 + $0x378] sm:$0xff]  ;;  %v5979_v38 = vpack.c.bf16 %v542_v22, %v540_v10 }
 0x316   : > { %v5899_v20 = vpack.c.bf16 %v526_v23, %v524_v53  ;;  %8027 = vst [vmem:[#allocation81_spill] sm:$0xff] %v5935_v15  ;;  %v5937_v53 = vpack.c.bf16 %v585_v30, %v583_v18  ;;  %v5939_v23 = vpack.c.bf16 %v534_v27, %v532_v28  ;;  %8032 = vst [vmem:[#allocation86_spill] sm:$0xff] %v5957_v41  ;;  %v535_v30 = vld [vmem:[%s4901_s19 + $0x180] sm:$0xff]  ;;  %v537_v28 = vld [vmem:[%s4901_s19 + $0x190] sm:$0xff] }
 0x317   : > { %1431 = vmatmul.mubr.bf16.gmra.mrb[80].mxu0 %v5815_v47  ;;  %1571 = vmatmul.mubr.bf16.gmra.mrb[16].mxu1 %v5817_v21  ;;  %8033 = vst [vmem:[#allocation87_spill] sm:$0xff] %v5959_v33  ;;  %v5961_v18 = vpack.c.bf16 %v594_v17, %v592_v2  ;;  %v591_v27 = vld [vmem:[%s4901_s19 + $0x340] sm:$0xff]  ;;  %v5975_v1 = vpack.c.bf16 %v537_v28, %v535_v30  ;;  %8037 = vst [vmem:[#allocation91_spill] sm:$0xff] %v5979_v38  ;;  %v597_v28 = vld [vmem:[%s4901_s19 + $0x370] sm:$0xff] }
 0x318   : > { %1440 = vmatprep.mubr.bf16.mxu0 %v5819_v26  ;;  %1580 = vmatprep.mubr.bf16.mxu1 %v5821_v6  ;;  %8021 = vst [vmem:[#allocation75_spill] sm:$0xff] %v5899_v20  ;;  %8028 = vst [vmem:[#allocation82_spill] sm:$0xff] %v5937_v53  ;;  %v5977_v5 = vpack.c.bf16 %v593_v43, %v591_v27  ;;  %v5981_v2 = vpack.c.bf16 %v598_v48, %v596_v4  ;;  %v539_v17 = vld [vmem:[%s4901_s19 + $0x1a0] sm:$0xff]  ;;  %v600_v27 = vld [vmem:[%s4901_s19 + $0x388] sm:$0xff] }
 0x319   : > { %8029 = vst [vmem:[#allocation83_spill] sm:$0xff] %v5939_v23  ;;  %8034 = vst [vmem:[#allocation88_spill] sm:$0xff] %v5961_v18  ;;  %v595_v30 = vld [vmem:[%s4901_s19 + $0x360] sm:$0xff]  ;;  %v602_v43 = vld [vmem:[%s4901_s19 + $0x398] sm:$0xff] }
 0x31a   : > { %8035 = vst [vmem:[#allocation89_spill] sm:$0xff] %v5975_v1  ;;  %8036 = vst [vmem:[#allocation90_spill] sm:$0xff] %v5977_v5  ;;  %v5995_v22 = vpack.c.bf16 %v597_v28, %v595_v30  ;;  %v5997_v4 = vpack.c.bf16 %v602_v43, %v600_v27  ;;  %v599_v48 = vld [vmem:[%s4901_s19 + $0x380] sm:$0xff]  ;;  %v606_v30 = vld [vmem:[%s4901_s19 + $0x3b8] sm:$0xff] }
 0x31b   : > { %8038 = vst [vmem:[#allocation92_spill] sm:$0xff] %v5981_v2 }
 0x31c   : > { %8040 = vst [vmem:[#allocation94_spill] sm:$0xff] %v5995_v22  ;;  %8041 = vst [vmem:[#allocation95_spill] sm:$0xff] %v5997_v4 }
 0x31f   : > { %1441 = vmatmul.mubr.bf16.gmra.mrb[84].mxu0 %v5835_v13  ;;  %1581 = vmatmul.mubr.bf16.gmra.mrb[20].mxu1 %v5837_v50 }
 0x320   : > { %1450 = vmatprep.mubr.bf16.mxu0 %v5839_v0  ;;  %1590 = vmatprep.mubr.bf16.mxu1 %v5841_v55 }
 0x327   : > { %1451 = vmatmul.mubr.bf16.gmra.mrb[88].mxu0 %v5855_v51  ;;  %1591 = vmatmul.mubr.bf16.gmra.mrb[24].mxu1 %v5857_v57 }
 0x328   : > { %1460 = vmatprep.mubr.bf16.mxu0 %v5859_v61  ;;  %1600 = vmatprep.mubr.bf16.mxu1 %v5861_v44 }
 0x32f   : > { %1461 = vmatmul.mubr.bf16.gmra.mrb[92].mxu0 %v5875_v42  ;;  %1601 = vmatmul.mubr.bf16.gmra.mrb[28].mxu1 %v5877_v19 }
 0x330   : > { %1470 = vmatprep.mubr.bf16.mxu0 %v5879_v25  ;;  %1610 = vmatprep.mubr.bf16.mxu1 %v5881_v3 }
 0x337   : > { %1471 = vmatmul.mubr.bf16.gmra.mrb[96].mxu0 %v5895_v29  ;;  %1611 = vmatmul.mubr.bf16.gmra.mrb[32].mxu1 %v5897_v32 }
 0x338   : > { %1480 = vmatprep.mubr.bf16.mxu0 %v5899_v20  ;;  %1620 = vmatprep.mubr.bf16.mxu1 %v5901_v39 }
 0x33f   : > { %1481 = vmatmul.mubr.bf16.gmra.mrb[100].mxu0 %v5915_v62  ;;  %1621 = vmatmul.mubr.bf16.gmra.mrb[36].mxu1 %v5917_v24  ;;  %v614_v24 = vld [vmem:[%s4901_s19 + $0x3f8] sm:$0xff] }
 0x340   : > { %1490 = vmatprep.mubr.bf16.mxu0 %v5919_v46  ;;  %1630 = vmatprep.mubr.bf16.mxu1 %v5921_v31  ;;  %v612_v31 = vld [vmem:[%s4901_s19 + $0x3e8] sm:$0xff] }
 0x347   : > { %1491 = vmatmul.mubr.bf16.gmra.mrb[104].mxu0 %v5935_v15  ;;  %1631 = vmatmul.mubr.bf16.gmra.mrb[40].mxu1 %v5937_v53  ;;  %v2226_v53 = vld [vmem:[#allocation2 + $0x18] sm:$0xff] }
 0x348   : > { %1500 = vmatprep.mubr.bf16.mxu0 %v5939_v23  ;;  %1640 = vmatprep.mubr.bf16.mxu1 %v5941_v54  ;;  %v2225_v54 = vld [vmem:[#allocation2 + $0x10] sm:$0xff] }
 0x34f   : > { %1501 = vmatmul.mubr.bf16.gmra.mrb[108].mxu0 %v5955_v35  ;;  %1641 = vmatmul.mubr.bf16.gmra.mrb[44].mxu1 %v5957_v41  ;;  %v2223_v41 = vld [vmem:[#allocation2] sm:$0xff] }
 0x350   : > { %1510 = vmatprep.mubr.bf16.mxu0 %v5959_v33  ;;  %1650 = vmatprep.mubr.bf16.mxu1 %v5961_v18  ;;  %v541_v18 = vld [vmem:[%s4901_s19 + $0x1b0] sm:$0xff] }
 0x351   : > { %v5993_v10 = vpack.c.bf16 %v541_v18, %v539_v17  ;;  %v2224_v18 = vld [vmem:[#allocation2 + $0x8] sm:$0xff] }
 0x352   : > { %v604_v17 = vld [vmem:[%s4901_s19 + $0x3a8] sm:$0xff]  ;;  %v2239_v27 = vpack.c.bf16 %v2224_v18, %v2223_v41  ;;  %v2240_v18 = vpack.c.bf16 %v2226_v53, %v2225_v54  ;;  %v6031_v54 = vpack.c.bf16 %v614_v24, %v612_v31  ;;  %v2231_v24 = vld [vmem:[#allocation2 + $0x40] sm:$0xff] }
 0x353   : > { %8039 = vst [vmem:[#allocation93_spill] sm:$0xff] %v5993_v10  ;;  %v6009_v43 = vpack.c.bf16 %v606_v30, %v604_v17  ;;  %v607_v30 = vld [vmem:[%s4901_s19 + $0x3c0] sm:$0xff]  ;;  %v2232_v31 = vld [vmem:[#allocation2 + $0x48] sm:$0xff] }
 0x354   : > { %8048 = vst [vmem:[#allocation101_spill] sm:$0xff] %v6031_v54 }
 0x355   : > { %8044 = vst [vmem:[#allocation97_spill] sm:$0xff] %v6009_v43 }
 0x357   : > { %1511 = vmatmul.mubr.bf16.gmra.mrb[112].mxu0 %v5975_v1  ;;  %1651 = vmatmul.mubr.bf16.gmra.mrb[48].mxu1 %v5977_v5  ;;  %v601_v5 = vld [vmem:[%s4901_s19 + $0x390] sm:$0xff] }
 0x358   : > { %1520 = vmatprep.mubr.bf16.mxu0 %v5979_v38  ;;  %1660 = vmatprep.mubr.bf16.mxu1 %v5981_v2  ;;  %v8042_v2 = vmov 0   ;;  %v6007_v28 = vpack.c.bf16 %v601_v5, %v599_v48  ;;  %v608_v5 = vld [vmem:[%s4901_s19 + $0x3c8] sm:$0xff]  ;;  %v610_v48 = vld [vmem:[%s4901_s19 + $0x3d8] sm:$0xff] }
 0x359   : > { %v6020_v17 = vpack.c.bf16 %v610_v48, %v608_v5  ;;  %v613_v5 = vld [vmem:[%s4901_s19 + $0x3f0] sm:$0xff] }
 0x35a   : > { %8043 = vst [vmem:[#allocation96_spill] sm:$0xff] %v6007_v28  ;;  %v2229_v48 = vld [vmem:[#allocation2 + $0x30] sm:$0xff] }
 0x35b   : > { %8046 = vst [vmem:[#allocation99_spill] sm:$0xff] %v6020_v17 }
 0x35f   : > { %1521 = vmatmul.mubr.bf16.gmra.mrb[116].mxu0 %v5993_v10  ;;  %1661 = vmatmul.mubr.bf16.gmra.mrb[52].mxu1 %v5995_v22  ;;  %v603_v22 = vld [vmem:[%s4901_s19 + $0x3a0] sm:$0xff] }
 0x360   : > { %1670 = vmatprep.mubr.bf16.mxu1 %v5997_v4  ;;  %2295 = vmatprep.mubr.bf16.mxu0 %v8042_v2  ;;  %v605_v4 = vld [vmem:[%s4901_s19 + $0x3b0] sm:$0xff] }
 0x361   : > { %v6018_v41 = vpack.c.bf16 %v605_v4, %v603_v22  ;;  %v611_v4 = vld [vmem:[%s4901_s19 + $0x3e0] sm:$0xff] }
 0x363   : > { %8045 = vst [vmem:[#allocation98_spill] sm:$0xff] %v6018_v41 }
 0x367   : > { %1671 = vmatmul.mubr.bf16.gmra.mrb[56].mxu1 %v6007_v28  ;;  %2296 = vmatmul.mubr.bf16.vlgmr.msra.gmra.mrb[120].mxu0 %v2239_v27  ;;  %v609_v27 = vld [vmem:[%s4901_s19 + $0x3d0] sm:$0xff]  ;;  %v2228_v28 = vld [vmem:[#allocation2 + $0x28] sm:$0xff] }
 0x368   : > { %1680 = vmatprep.mubr.bf16.mxu1 %v6009_v43  ;;  %2305 = vmatprep.mubr.bf16.mxu0 %v8042_v2  ;;  %v2227_v43 = vld [vmem:[#allocation2 + $0x20] sm:$0xff]  ;;  %v6029_v22 = vpack.c.bf16 %v609_v27, %v607_v30  ;;  %v2234_v30 = vld [vmem:[#allocation2 + $0x58] sm:$0xff] }
 0x369   : > { %v2241_v53 = vpack.c.bf16 %v2228_v28, %v2227_v43  ;;  %v2243_v28 = vpack.c.bf16 %v2232_v31, %v2231_v24  ;;  %v2233_v43 = vld [vmem:[#allocation2 + $0x50] sm:$0xff]  ;;  %v1318_v24 = vrot.slane %v5695_v36, 4 }
 0x36a   : > { %8047 = vst [vmem:[#allocation100_spill] sm:$0xff] %v6029_v22  ;;  %v2244_v27 = vpack.c.bf16 %v2234_v30, %v2233_v43 }
 0x36f   : > { %1681 = vmatmul.mubr.bf16.gmra.mrb[60].mxu1 %v6018_v41  ;;  %2306 = vmatmul.mubr.bf16.gmra.mrb[124].mxu0 %v2240_v18  ;;  %v2230_v18 = vld [vmem:[#allocation2 + $0x38] sm:$0xff] }
 0x370   : > { %1690 = vmatprep.mubr.bf16.mxu1 %v6020_v17  ;;  %2315 = vmatprep.mubr.bf16.mxu0 %v8042_v2  ;;  %v6038_v17 = vpack.c.bf16 %v613_v5, %v611_v4  ;;  %v2242_v41 = vpack.c.bf16 %v2230_v18, %v2229_v48  ;;  %v2236_v4 = vld [vmem:[#allocation2 + $0x68] sm:$0xff]  ;;  %v2238_v48 = vld [vmem:[#allocation2 + $0x78] sm:$0xff] }
 0x372   : > { %8049 = vst [vmem:[#allocation102_spill] sm:$0xff] %v6038_v17 }
 0x377   : > { %1691 = vmatmul.mubr.bf16.gmra.mrb[64].mxu1 %v6029_v22  ;;  %2316 = vmatmul.mubr.bf16.gmra.mrb[128].mxu0 %v2241_v53  ;;  %v2235_v53 = vld [vmem:[#allocation2 + $0x60] sm:$0xff] }
 0x378   : > { %1700 = vmatprep.mubr.bf16.mxu1 %v6031_v54  ;;  %2325 = vmatprep.mubr.bf16.mxu0 %v8042_v2  ;;  %v2245_v5 = vpack.c.bf16 %v2236_v4, %v2235_v53 }
 0x37f   : > { %1701 = vmatmul.mubr.bf16.gmra.mrb[68].mxu1 %v6038_v17  ;;  %2326 = vmatmul.mubr.bf16.gmra.mrb[132].mxu0 %v2242_v41  ;;  %v2237_v41 = vld [vmem:[#allocation2 + $0x70] sm:$0xff] }
 0x380   : > { %2335 = vmatprep.mubr.bf16.mxu0 %v8042_v2  ;;  %2991 = vmatprep.mubr.bf16.mxu1 %v5554_v14  ;;  %v2246_v18 = vpack.c.bf16 %v2238_v48, %v2237_v41  ;;  %v1281_v14 = vrot.slane %v5671_v58, 4 }
 0x382   : > { %v1282_v31 = vadd.f32 %v1281_v14, %v5671_v58 }
 0x384   : > { %v1283_v43 = vrot.slane %v1282_v31, 2 }
 0x387   : > { %2336 = vmatmul.mubr.bf16.gmra.mrb[136].mxu0 %v2243_v28  ;;  %v1319_v28 = vadd.f32 %v1318_v24, %v5695_v36 }
 0x388   : > { %2345 = vmatprep.mubr.bf16.mxu0 %v8042_v2 }
 0x389   : > { %v1320_v30 = vrot.slane %v1319_v28, 2 }
 0x38b   : > { %v1321_v53 = vadd.f32 %v1320_v30, %v1319_v28 }
 0x38f   : > { %2346 = vmatmul.mubr.bf16.gmra.mrb[140].mxu0 %v2244_v27  ;;  %v1284_v27 = vadd.f32 %v1283_v43, %v1282_v31 }
 0x390   : > { %2355 = vmatprep.mubr.bf16.mxu0 %v8042_v2 }
 0x391   : > { %v1285_v4 = vrot.slane %v1284_v27, 1 }
 0x393   : > { %v1286_v17 = vadd.f32 %v1285_v4, %v1284_v27 }
 0x395   : > { %4106 = vrcp.f32 %v1286_v17 }
 0x397   : > { %2356 = vmatmul.mubr.bf16.gmra.mrb[144].mxu0 %v2245_v5  ;;  %v1322_v5 = vrot.slane %v1321_v53, 1 }
 0x398   : > { %2365 = vmatprep.mubr.bf16.mxu0 %v8042_v2 }
 0x399   : > { %v1323_v41 = vadd.f32 %v1322_v5, %v1321_v53 }
 0x39b   : > { %4108 = vrcp.f32 %v1323_v41 }
 0x39f   : > { %2366 = vmatmul.mubr.bf16.gmra.mrb[148].mxu0 %v2246_v18  ;;  %v6052_v48 = vpop.eup %4106 }
 0x3a0   : > { %2424 = vmatprep.mubr.bf16.mxu0 %v8042_v2 }
 0x3a5   : > { %v6054_v22 = vpop.eup %4108 }
 0x3ca   : > { %v1392_v18 = vpop.f32.mrb[64].mxu0  ;;  %v1532_v54 = vpop.f32.mrb[0].mxu1 }
 0x3cb   : > { %v1711_v58 = vmul.f32 %v6052_v48, %v1392_v18  ;;  %v1767_v36 = vmul.f32 %v6052_v48, %v1532_v54  ;;  %v1394_v14 = vpop.f32.mrb[65].mxu0  ;;  %v1534_v24 = vpop.f32.mrb[1].mxu1 }
 0x3cc   : > { %v1712_v31 = vmul.f32 %v6054_v22, %v1394_v14  ;;  %v1768_v28 = vmul.f32 %v6054_v22, %v1534_v24  ;;  %v1396_v43 = vpop.f32.mrb[66].mxu0  ;;  %v1536_v17 = vpop.f32.mrb[2].mxu1 }
 0x3cd   : > { %1839 = vst [vmem:[%s6060_s26] sm:$0xff] %v1711_v58  ;;  %1895 = vst [vmem:[%s6060_s26 + $0x1c0] sm:$0xff] %v1767_v36  ;;  %v1713_v54 = vmul.f32 %v6052_v48, %v1396_v43  ;;  %v1769_v30 = vmul.f32 %v6052_v48, %v1536_v17  ;;  %v1398_v27 = vpop.f32.mrb[67].mxu0  ;;  %v1538_v53 = vpop.f32.mrb[3].mxu1 }
 0x3ce   : > { %1840 = vst [vmem:[%s6060_s26 + $0x8] sm:$0xff] %v1712_v31  ;;  %1896 = vst [vmem:[%s6060_s26 + $0x1c8] sm:$0xff] %v1768_v28  ;;  %v1714_v4 = vmul.f32 %v6054_v22, %v1398_v27  ;;  %v1770_v5 = vmul.f32 %v6054_v22, %v1538_v53 }
 0x3cf   : > { %1841 = vst [vmem:[%s6060_s26 + $0x10] sm:$0xff] %v1713_v54  ;;  %1897 = vst [vmem:[%s6060_s26 + $0x1d0] sm:$0xff] %v1769_v30 }
 0x3d0   : > { %1842 = vst [vmem:[%s6060_s26 + $0x18] sm:$0xff] %v1714_v4  ;;  %1898 = vst [vmem:[%s6060_s26 + $0x1d8] sm:$0xff] %v1770_v5 }
 0x3d2   : > { %v1402_v41 = vpop.f32.mrb[68].mxu0  ;;  %v1542_v18 = vpop.f32.mrb[4].mxu1 }
 0x3d3   : > { %v1715_v58 = vmul.f32 %v6052_v48, %v1402_v41  ;;  %v1771_v36 = vmul.f32 %v6052_v48, %v1542_v18  ;;  %v1404_v14 = vpop.f32.mrb[69].mxu0  ;;  %v1544_v24 = vpop.f32.mrb[5].mxu1 }
 0x3d4   : > { %v1716_v31 = vmul.f32 %v6054_v22, %v1404_v14  ;;  %v1772_v28 = vmul.f32 %v6054_v22, %v1544_v24  ;;  %v1406_v43 = vpop.f32.mrb[70].mxu0  ;;  %v1546_v17 = vpop.f32.mrb[6].mxu1 }
 0x3d5   : > { %1843 = vst [vmem:[%s6060_s26 + $0x20] sm:$0xff] %v1715_v58  ;;  %1899 = vst [vmem:[%s6060_s26 + $0x1e0] sm:$0xff] %v1771_v36  ;;  %v1717_v54 = vmul.f32 %v6052_v48, %v1406_v43  ;;  %v1773_v30 = vmul.f32 %v6052_v48, %v1546_v17  ;;  %v1408_v27 = vpop.f32.mrb[71].mxu0  ;;  %v1548_v53 = vpop.f32.mrb[7].mxu1 }
 0x3d6   : > { %1844 = vst [vmem:[%s6060_s26 + $0x28] sm:$0xff] %v1716_v31  ;;  %1900 = vst [vmem:[%s6060_s26 + $0x1e8] sm:$0xff] %v1772_v28  ;;  %v1718_v4 = vmul.f32 %v6054_v22, %v1408_v27  ;;  %v1774_v5 = vmul.f32 %v6054_v22, %v1548_v53 }
 0x3d7   : > { %1845 = vst [vmem:[%s6060_s26 + $0x30] sm:$0xff] %v1717_v54  ;;  %1901 = vst [vmem:[%s6060_s26 + $0x1f0] sm:$0xff] %v1773_v30 }
 0x3d8   : > { %1846 = vst [vmem:[%s6060_s26 + $0x38] sm:$0xff] %v1718_v4  ;;  %1902 = vst [vmem:[%s6060_s26 + $0x1f8] sm:$0xff] %v1774_v5 }
 0x3da   : > { %v1412_v41 = vpop.f32.mrb[72].mxu0  ;;  %v1552_v18 = vpop.f32.mrb[8].mxu1 }
 0x3db   : > { %v1719_v58 = vmul.f32 %v6052_v48, %v1412_v41  ;;  %v1775_v36 = vmul.f32 %v6052_v48, %v1552_v18  ;;  %v1414_v14 = vpop.f32.mrb[73].mxu0  ;;  %v1554_v24 = vpop.f32.mrb[9].mxu1 }
 0x3dc   : > { %v1720_v31 = vmul.f32 %v6054_v22, %v1414_v14  ;;  %v1776_v28 = vmul.f32 %v6054_v22, %v1554_v24  ;;  %v1416_v43 = vpop.f32.mrb[74].mxu0  ;;  %v1556_v17 = vpop.f32.mrb[10].mxu1 }
 0x3dd   : > { %1847 = vst [vmem:[%s6060_s26 + $0x40] sm:$0xff] %v1719_v58  ;;  %1903 = vst [vmem:[%s6060_s26 + $0x200] sm:$0xff] %v1775_v36  ;;  %v1721_v54 = vmul.f32 %v6052_v48, %v1416_v43  ;;  %v1777_v30 = vmul.f32 %v6052_v48, %v1556_v17  ;;  %v1418_v27 = vpop.f32.mrb[75].mxu0  ;;  %v1558_v53 = vpop.f32.mrb[11].mxu1 }
 0x3de   : > { %1848 = vst [vmem:[%s6060_s26 + $0x48] sm:$0xff] %v1720_v31  ;;  %1904 = vst [vmem:[%s6060_s26 + $0x208] sm:$0xff] %v1776_v28  ;;  %v1722_v4 = vmul.f32 %v6054_v22, %v1418_v27  ;;  %v1778_v5 = vmul.f32 %v6054_v22, %v1558_v53 }
 0x3df   : > { %1849 = vst [vmem:[%s6060_s26 + $0x50] sm:$0xff] %v1721_v54  ;;  %1905 = vst [vmem:[%s6060_s26 + $0x210] sm:$0xff] %v1777_v30 }
 0x3e0   : > { %1850 = vst [vmem:[%s6060_s26 + $0x58] sm:$0xff] %v1722_v4  ;;  %1906 = vst [vmem:[%s6060_s26 + $0x218] sm:$0xff] %v1778_v5 }
 0x3e2   : > { %v1422_v41 = vpop.f32.mrb[76].mxu0  ;;  %v1562_v18 = vpop.f32.mrb[12].mxu1 }
 0x3e3   : > { %v1723_v58 = vmul.f32 %v6052_v48, %v1422_v41  ;;  %v1779_v36 = vmul.f32 %v6052_v48, %v1562_v18  ;;  %v1424_v14 = vpop.f32.mrb[77].mxu0  ;;  %v1564_v24 = vpop.f32.mrb[13].mxu1 }
 0x3e4   : > { %v1724_v31 = vmul.f32 %v6054_v22, %v1424_v14  ;;  %v1780_v28 = vmul.f32 %v6054_v22, %v1564_v24  ;;  %v1426_v43 = vpop.f32.mrb[78].mxu0  ;;  %v1566_v17 = vpop.f32.mrb[14].mxu1 }
 0x3e5   : > { %1851 = vst [vmem:[%s6060_s26 + $0x60] sm:$0xff] %v1723_v58  ;;  %1907 = vst [vmem:[%s6060_s26 + $0x220] sm:$0xff] %v1779_v36  ;;  %v1725_v54 = vmul.f32 %v6052_v48, %v1426_v43  ;;  %v1781_v30 = vmul.f32 %v6052_v48, %v1566_v17  ;;  %v1428_v27 = vpop.f32.mrb[79].mxu0  ;;  %v1568_v53 = vpop.f32.mrb[15].mxu1 }
 0x3e6   : > { %1852 = vst [vmem:[%s6060_s26 + $0x68] sm:$0xff] %v1724_v31  ;;  %1908 = vst [vmem:[%s6060_s26 + $0x228] sm:$0xff] %v1780_v28  ;;  %v1726_v4 = vmul.f32 %v6054_v22, %v1428_v27  ;;  %v1782_v5 = vmul.f32 %v6054_v22, %v1568_v53 }
 0x3e7   : > { %1853 = vst [vmem:[%s6060_s26 + $0x70] sm:$0xff] %v1725_v54  ;;  %1909 = vst [vmem:[%s6060_s26 + $0x230] sm:$0xff] %v1781_v30 }
 0x3e8   : > { %1854 = vst [vmem:[%s6060_s26 + $0x78] sm:$0xff] %v1726_v4  ;;  %1910 = vst [vmem:[%s6060_s26 + $0x238] sm:$0xff] %v1782_v5 }
 0x3ea   : > { %v1432_v41 = vpop.f32.mrb[80].mxu0  ;;  %v1572_v18 = vpop.f32.mrb[16].mxu1 }
 0x3eb   : > { %v1727_v58 = vmul.f32 %v6052_v48, %v1432_v41  ;;  %v1783_v36 = vmul.f32 %v6052_v48, %v1572_v18  ;;  %v1434_v14 = vpop.f32.mrb[81].mxu0  ;;  %v1574_v24 = vpop.f32.mrb[17].mxu1 }
 0x3ec   : > { %v1728_v31 = vmul.f32 %v6054_v22, %v1434_v14  ;;  %v1784_v28 = vmul.f32 %v6054_v22, %v1574_v24  ;;  %v1436_v43 = vpop.f32.mrb[82].mxu0  ;;  %v1576_v17 = vpop.f32.mrb[18].mxu1 }
 0x3ed   : > { %1855 = vst [vmem:[%s6060_s26 + $0x80] sm:$0xff] %v1727_v58  ;;  %1911 = vst [vmem:[%s6060_s26 + $0x240] sm:$0xff] %v1783_v36  ;;  %v1729_v54 = vmul.f32 %v6052_v48, %v1436_v43  ;;  %v1785_v30 = vmul.f32 %v6052_v48, %v1576_v17  ;;  %v1438_v27 = vpop.f32.mrb[83].mxu0  ;;  %v1578_v53 = vpop.f32.mrb[19].mxu1 }
 0x3ee   : > { %1856 = vst [vmem:[%s6060_s26 + $0x88] sm:$0xff] %v1728_v31  ;;  %1912 = vst [vmem:[%s6060_s26 + $0x248] sm:$0xff] %v1784_v28  ;;  %v1730_v4 = vmul.f32 %v6054_v22, %v1438_v27  ;;  %v1786_v5 = vmul.f32 %v6054_v22, %v1578_v53 }
 0x3ef   : > { %1857 = vst [vmem:[%s6060_s26 + $0x90] sm:$0xff] %v1729_v54  ;;  %1913 = vst [vmem:[%s6060_s26 + $0x250] sm:$0xff] %v1785_v30 }
 0x3f0   : > { %1858 = vst [vmem:[%s6060_s26 + $0x98] sm:$0xff] %v1730_v4  ;;  %1914 = vst [vmem:[%s6060_s26 + $0x258] sm:$0xff] %v1786_v5 }
 0x3f2   : > { %v1442_v41 = vpop.f32.mrb[84].mxu0  ;;  %v1582_v18 = vpop.f32.mrb[20].mxu1 }
 0x3f3   : > { %v1731_v58 = vmul.f32 %v6052_v48, %v1442_v41  ;;  %v1787_v36 = vmul.f32 %v6052_v48, %v1582_v18  ;;  %v1444_v14 = vpop.f32.mrb[85].mxu0  ;;  %v1584_v24 = vpop.f32.mrb[21].mxu1 }
 0x3f4   : > { %v1732_v31 = vmul.f32 %v6054_v22, %v1444_v14  ;;  %v1788_v28 = vmul.f32 %v6054_v22, %v1584_v24  ;;  %v1446_v43 = vpop.f32.mrb[86].mxu0  ;;  %v1586_v17 = vpop.f32.mrb[22].mxu1 }
 0x3f5   : > { %1859 = vst [vmem:[%s6060_s26 + $0xa0] sm:$0xff] %v1731_v58  ;;  %1915 = vst [vmem:[%s6060_s26 + $0x260] sm:$0xff] %v1787_v36  ;;  %v1733_v54 = vmul.f32 %v6052_v48, %v1446_v43  ;;  %v1789_v30 = vmul.f32 %v6052_v48, %v1586_v17  ;;  %v1448_v27 = vpop.f32.mrb[87].mxu0  ;;  %v1588_v53 = vpop.f32.mrb[23].mxu1 }
 0x3f6   : > { %1860 = vst [vmem:[%s6060_s26 + $0xa8] sm:$0xff] %v1732_v31  ;;  %1916 = vst [vmem:[%s6060_s26 + $0x268] sm:$0xff] %v1788_v28  ;;  %v1734_v4 = vmul.f32 %v6054_v22, %v1448_v27  ;;  %v1790_v5 = vmul.f32 %v6054_v22, %v1588_v53 }
 0x3f7   : > { %1861 = vst [vmem:[%s6060_s26 + $0xb0] sm:$0xff] %v1733_v54  ;;  %1917 = vst [vmem:[%s6060_s26 + $0x270] sm:$0xff] %v1789_v30 }
 0x3f8   : > { %1862 = vst [vmem:[%s6060_s26 + $0xb8] sm:$0xff] %v1734_v4  ;;  %1918 = vst [vmem:[%s6060_s26 + $0x278] sm:$0xff] %v1790_v5 }
 0x3fa   : > { %v1452_v41 = vpop.f32.mrb[88].mxu0  ;;  %v1592_v18 = vpop.f32.mrb[24].mxu1 }
 0x3fb   : > { %v1735_v58 = vmul.f32 %v6052_v48, %v1452_v41  ;;  %v1791_v36 = vmul.f32 %v6052_v48, %v1592_v18  ;;  %v1454_v14 = vpop.f32.mrb[89].mxu0  ;;  %v1594_v24 = vpop.f32.mrb[25].mxu1 }
 0x3fc   : > { %v1736_v31 = vmul.f32 %v6054_v22, %v1454_v14  ;;  %v1792_v28 = vmul.f32 %v6054_v22, %v1594_v24  ;;  %v1456_v43 = vpop.f32.mrb[90].mxu0  ;;  %v1596_v17 = vpop.f32.mrb[26].mxu1 }
 0x3fd   : > { %1863 = vst [vmem:[%s6060_s26 + $0xc0] sm:$0xff] %v1735_v58  ;;  %1919 = vst [vmem:[%s6060_s26 + $0x280] sm:$0xff] %v1791_v36  ;;  %v1737_v54 = vmul.f32 %v6052_v48, %v1456_v43  ;;  %v1793_v30 = vmul.f32 %v6052_v48, %v1596_v17  ;;  %v1458_v27 = vpop.f32.mrb[91].mxu0  ;;  %v1598_v53 = vpop.f32.mrb[27].mxu1 }
 0x3fe   : > { %1864 = vst [vmem:[%s6060_s26 + $0xc8] sm:$0xff] %v1736_v31  ;;  %1920 = vst [vmem:[%s6060_s26 + $0x288] sm:$0xff] %v1792_v28  ;;  %v1738_v4 = vmul.f32 %v6054_v22, %v1458_v27  ;;  %v1794_v5 = vmul.f32 %v6054_v22, %v1598_v53 }
 0x3ff   : > { %1865 = vst [vmem:[%s6060_s26 + $0xd0] sm:$0xff] %v1737_v54  ;;  %1921 = vst [vmem:[%s6060_s26 + $0x290] sm:$0xff] %v1793_v30 }
 0x400   : > { %1866 = vst [vmem:[%s6060_s26 + $0xd8] sm:$0xff] %v1738_v4  ;;  %1922 = vst [vmem:[%s6060_s26 + $0x298] sm:$0xff] %v1794_v5 }
 0x402   : > { %v1462_v41 = vpop.f32.mrb[92].mxu0  ;;  %v1602_v18 = vpop.f32.mrb[28].mxu1 }
 0x403   : > { %v1739_v58 = vmul.f32 %v6052_v48, %v1462_v41  ;;  %v1795_v36 = vmul.f32 %v6052_v48, %v1602_v18  ;;  %v1464_v14 = vpop.f32.mrb[93].mxu0  ;;  %v1604_v24 = vpop.f32.mrb[29].mxu1 }
 0x404   : > { %v1740_v31 = vmul.f32 %v6054_v22, %v1464_v14  ;;  %v1796_v28 = vmul.f32 %v6054_v22, %v1604_v24  ;;  %v1466_v43 = vpop.f32.mrb[94].mxu0  ;;  %v1606_v17 = vpop.f32.mrb[30].mxu1 }
 0x405   : > { %1867 = vst [vmem:[%s6060_s26 + $0xe0] sm:$0xff] %v1739_v58  ;;  %1923 = vst [vmem:[%s6060_s26 + $0x2a0] sm:$0xff] %v1795_v36  ;;  %v1741_v54 = vmul.f32 %v6052_v48, %v1466_v43  ;;  %v1797_v30 = vmul.f32 %v6052_v48, %v1606_v17  ;;  %v1468_v27 = vpop.f32.mrb[95].mxu0  ;;  %v1608_v53 = vpop.f32.mrb[31].mxu1 }
 0x406   : > { %1868 = vst [vmem:[%s6060_s26 + $0xe8] sm:$0xff] %v1740_v31  ;;  %1924 = vst [vmem:[%s6060_s26 + $0x2a8] sm:$0xff] %v1796_v28  ;;  %v1742_v4 = vmul.f32 %v6054_v22, %v1468_v27  ;;  %v1798_v5 = vmul.f32 %v6054_v22, %v1608_v53 }
 0x407   : > { %1869 = vst [vmem:[%s6060_s26 + $0xf0] sm:$0xff] %v1741_v54  ;;  %1925 = vst [vmem:[%s6060_s26 + $0x2b0] sm:$0xff] %v1797_v30 }
 0x408   : > { %1870 = vst [vmem:[%s6060_s26 + $0xf8] sm:$0xff] %v1742_v4  ;;  %1926 = vst [vmem:[%s6060_s26 + $0x2b8] sm:$0xff] %v1798_v5 }
 0x40a   : > { %v1472_v41 = vpop.f32.mrb[96].mxu0  ;;  %v1612_v18 = vpop.f32.mrb[32].mxu1 }
 0x40b   : > { %v1743_v58 = vmul.f32 %v6052_v48, %v1472_v41  ;;  %v1799_v36 = vmul.f32 %v6052_v48, %v1612_v18  ;;  %v1474_v14 = vpop.f32.mrb[97].mxu0  ;;  %v1614_v24 = vpop.f32.mrb[33].mxu1 }
 0x40c   : > { %v1744_v31 = vmul.f32 %v6054_v22, %v1474_v14  ;;  %v1800_v28 = vmul.f32 %v6054_v22, %v1614_v24  ;;  %v1476_v43 = vpop.f32.mrb[98].mxu0  ;;  %v1616_v17 = vpop.f32.mrb[34].mxu1 }
 0x40d   : > { %1871 = vst [vmem:[%s6060_s26 + $0x100] sm:$0xff] %v1743_v58  ;;  %1927 = vst [vmem:[%s6060_s26 + $0x2c0] sm:$0xff] %v1799_v36  ;;  %v1745_v54 = vmul.f32 %v6052_v48, %v1476_v43  ;;  %v1801_v30 = vmul.f32 %v6052_v48, %v1616_v17  ;;  %v1478_v27 = vpop.f32.mrb[99].mxu0  ;;  %v1618_v53 = vpop.f32.mrb[35].mxu1 }
 0x40e   : > { %1872 = vst [vmem:[%s6060_s26 + $0x108] sm:$0xff] %v1744_v31  ;;  %1928 = vst [vmem:[%s6060_s26 + $0x2c8] sm:$0xff] %v1800_v28  ;;  %v1746_v4 = vmul.f32 %v6054_v22, %v1478_v27  ;;  %v1802_v5 = vmul.f32 %v6054_v22, %v1618_v53 }
 0x40f   : > { %1873 = vst [vmem:[%s6060_s26 + $0x110] sm:$0xff] %v1745_v54  ;;  %1929 = vst [vmem:[%s6060_s26 + $0x2d0] sm:$0xff] %v1801_v30 }
 0x410   : > { %1874 = vst [vmem:[%s6060_s26 + $0x118] sm:$0xff] %v1746_v4  ;;  %1930 = vst [vmem:[%s6060_s26 + $0x2d8] sm:$0xff] %v1802_v5 }
 0x412   : > { %v1482_v41 = vpop.f32.mrb[100].mxu0  ;;  %v1622_v18 = vpop.f32.mrb[36].mxu1 }
 0x413   : > { %v1747_v58 = vmul.f32 %v6052_v48, %v1482_v41  ;;  %v1803_v36 = vmul.f32 %v6052_v48, %v1622_v18  ;;  %v1484_v14 = vpop.f32.mrb[101].mxu0  ;;  %v1624_v24 = vpop.f32.mrb[37].mxu1 }
 0x414   : > { %v1748_v31 = vmul.f32 %v6054_v22, %v1484_v14  ;;  %v1804_v28 = vmul.f32 %v6054_v22, %v1624_v24  ;;  %v1486_v43 = vpop.f32.mrb[102].mxu0  ;;  %v1626_v17 = vpop.f32.mrb[38].mxu1 }
 0x415   : > { %1875 = vst [vmem:[%s6060_s26 + $0x120] sm:$0xff] %v1747_v58  ;;  %1931 = vst [vmem:[%s6060_s26 + $0x2e0] sm:$0xff] %v1803_v36  ;;  %v1749_v54 = vmul.f32 %v6052_v48, %v1486_v43  ;;  %v1805_v30 = vmul.f32 %v6052_v48, %v1626_v17  ;;  %v1488_v27 = vpop.f32.mrb[103].mxu0  ;;  %v1628_v53 = vpop.f32.mrb[39].mxu1 }
 0x416   : > { %1876 = vst [vmem:[%s6060_s26 + $0x128] sm:$0xff] %v1748_v31  ;;  %1932 = vst [vmem:[%s6060_s26 + $0x2e8] sm:$0xff] %v1804_v28  ;;  %v1750_v4 = vmul.f32 %v6054_v22, %v1488_v27  ;;  %v1806_v5 = vmul.f32 %v6054_v22, %v1628_v53 }
 0x417   : > { %1877 = vst [vmem:[%s6060_s26 + $0x130] sm:$0xff] %v1749_v54  ;;  %1933 = vst [vmem:[%s6060_s26 + $0x2f0] sm:$0xff] %v1805_v30 }
 0x418   : > { %1878 = vst [vmem:[%s6060_s26 + $0x138] sm:$0xff] %v1750_v4  ;;  %1934 = vst [vmem:[%s6060_s26 + $0x2f8] sm:$0xff] %v1806_v5 }
 0x41a   : > { %v1492_v41 = vpop.f32.mrb[104].mxu0  ;;  %v1632_v18 = vpop.f32.mrb[40].mxu1 }
 0x41b   : > { %v1751_v58 = vmul.f32 %v6052_v48, %v1492_v41  ;;  %v1807_v36 = vmul.f32 %v6052_v48, %v1632_v18  ;;  %v1494_v14 = vpop.f32.mrb[105].mxu0  ;;  %v1634_v24 = vpop.f32.mrb[41].mxu1 }
 0x41c   : > { %v1752_v31 = vmul.f32 %v6054_v22, %v1494_v14  ;;  %v1808_v28 = vmul.f32 %v6054_v22, %v1634_v24  ;;  %v1496_v43 = vpop.f32.mrb[106].mxu0  ;;  %v1636_v17 = vpop.f32.mrb[42].mxu1 }
 0x41d   : > { %1879 = vst [vmem:[%s6060_s26 + $0x140] sm:$0xff] %v1751_v58  ;;  %1935 = vst [vmem:[%s6060_s26 + $0x300] sm:$0xff] %v1807_v36  ;;  %v1753_v54 = vmul.f32 %v6052_v48, %v1496_v43  ;;  %v1809_v30 = vmul.f32 %v6052_v48, %v1636_v17  ;;  %v1498_v27 = vpop.f32.mrb[107].mxu0  ;;  %v1638_v53 = vpop.f32.mrb[43].mxu1 }
 0x41e   : > { %1880 = vst [vmem:[%s6060_s26 + $0x148] sm:$0xff] %v1752_v31  ;;  %1936 = vst [vmem:[%s6060_s26 + $0x308] sm:$0xff] %v1808_v28  ;;  %v1754_v4 = vmul.f32 %v6054_v22, %v1498_v27  ;;  %v1810_v5 = vmul.f32 %v6054_v22, %v1638_v53 }
 0x41f   : > { %1881 = vst [vmem:[%s6060_s26 + $0x150] sm:$0xff] %v1753_v54  ;;  %1937 = vst [vmem:[%s6060_s26 + $0x310] sm:$0xff] %v1809_v30 }
 0x420   : > { %1882 = vst [vmem:[%s6060_s26 + $0x158] sm:$0xff] %v1754_v4  ;;  %1938 = vst [vmem:[%s6060_s26 + $0x318] sm:$0xff] %v1810_v5 }
 0x422   : > { %v1502_v41 = vpop.f32.mrb[108].mxu0  ;;  %v1642_v18 = vpop.f32.mrb[44].mxu1 }
 0x423   : > { %v1755_v58 = vmul.f32 %v6052_v48, %v1502_v41  ;;  %v1811_v36 = vmul.f32 %v6052_v48, %v1642_v18  ;;  %v1504_v14 = vpop.f32.mrb[109].mxu0  ;;  %v1644_v24 = vpop.f32.mrb[45].mxu1 }
 0x424   : > { %v1756_v31 = vmul.f32 %v6054_v22, %v1504_v14  ;;  %v1812_v28 = vmul.f32 %v6054_v22, %v1644_v24  ;;  %v1506_v43 = vpop.f32.mrb[110].mxu0  ;;  %v1646_v17 = vpop.f32.mrb[46].mxu1 }
 0x425   : > { %1883 = vst [vmem:[%s6060_s26 + $0x160] sm:$0xff] %v1755_v58  ;;  %1939 = vst [vmem:[%s6060_s26 + $0x320] sm:$0xff] %v1811_v36  ;;  %v1757_v54 = vmul.f32 %v6052_v48, %v1506_v43  ;;  %v1813_v30 = vmul.f32 %v6052_v48, %v1646_v17  ;;  %v1508_v27 = vpop.f32.mrb[111].mxu0  ;;  %v1648_v53 = vpop.f32.mrb[47].mxu1 }
 0x426   : > { %1884 = vst [vmem:[%s6060_s26 + $0x168] sm:$0xff] %v1756_v31  ;;  %1940 = vst [vmem:[%s6060_s26 + $0x328] sm:$0xff] %v1812_v28  ;;  %v1758_v4 = vmul.f32 %v6054_v22, %v1508_v27  ;;  %v1814_v5 = vmul.f32 %v6054_v22, %v1648_v53 }
 0x427   : > { %1885 = vst [vmem:[%s6060_s26 + $0x170] sm:$0xff] %v1757_v54  ;;  %1941 = vst [vmem:[%s6060_s26 + $0x330] sm:$0xff] %v1813_v30 }
 0x428   : > { %1886 = vst [vmem:[%s6060_s26 + $0x178] sm:$0xff] %v1758_v4  ;;  %1942 = vst [vmem:[%s6060_s26 + $0x338] sm:$0xff] %v1814_v5 }
 0x42a   : > { %v1512_v41 = vpop.f32.mrb[112].mxu0  ;;  %v1652_v18 = vpop.f32.mrb[48].mxu1 }
 0x42b   : > { %v1759_v58 = vmul.f32 %v6052_v48, %v1512_v41  ;;  %v1815_v36 = vmul.f32 %v6052_v48, %v1652_v18  ;;  %v1514_v14 = vpop.f32.mrb[113].mxu0  ;;  %v1654_v24 = vpop.f32.mrb[49].mxu1 }
 0x42c   : > { %v1760_v31 = vmul.f32 %v6054_v22, %v1514_v14  ;;  %v1816_v28 = vmul.f32 %v6054_v22, %v1654_v24  ;;  %v1516_v43 = vpop.f32.mrb[114].mxu0  ;;  %v1656_v17 = vpop.f32.mrb[50].mxu1 }
 0x42d   : > { %1887 = vst [vmem:[%s6060_s26 + $0x180] sm:$0xff] %v1759_v58  ;;  %1943 = vst [vmem:[%s6060_s26 + $0x340] sm:$0xff] %v1815_v36  ;;  %v1761_v54 = vmul.f32 %v6052_v48, %v1516_v43  ;;  %v1817_v30 = vmul.f32 %v6052_v48, %v1656_v17  ;;  %v1518_v27 = vpop.f32.mrb[115].mxu0  ;;  %v1658_v53 = vpop.f32.mrb[51].mxu1 }
 0x42e   : > { %1888 = vst [vmem:[%s6060_s26 + $0x188] sm:$0xff] %v1760_v31  ;;  %1944 = vst [vmem:[%s6060_s26 + $0x348] sm:$0xff] %v1816_v28  ;;  %v1762_v4 = vmul.f32 %v6054_v22, %v1518_v27  ;;  %v1818_v5 = vmul.f32 %v6054_v22, %v1658_v53 }
 0x42f   : > { %1889 = vst [vmem:[%s6060_s26 + $0x190] sm:$0xff] %v1761_v54  ;;  %1945 = vst [vmem:[%s6060_s26 + $0x350] sm:$0xff] %v1817_v30 }
 0x430   : > { %1890 = vst [vmem:[%s6060_s26 + $0x198] sm:$0xff] %v1762_v4  ;;  %1946 = vst [vmem:[%s6060_s26 + $0x358] sm:$0xff] %v1818_v5 }
 0x432   : > { %v1522_v41 = vpop.f32.mrb[116].mxu0  ;;  %v1662_v18 = vpop.f32.mrb[52].mxu1 }
 0x433   : > { %v1763_v58 = vmul.f32 %v6052_v48, %v1522_v41  ;;  %v1819_v36 = vmul.f32 %v6052_v48, %v1662_v18  ;;  %v1524_v14 = vpop.f32.mrb[117].mxu0  ;;  %v1664_v24 = vpop.f32.mrb[53].mxu1 }
 0x434   : > { %v1764_v31 = vmul.f32 %v6054_v22, %v1524_v14  ;;  %v1820_v28 = vmul.f32 %v6054_v22, %v1664_v24  ;;  %v1526_v43 = vpop.f32.mrb[118].mxu0  ;;  %v1666_v17 = vpop.f32.mrb[54].mxu1 }
 0x435   : > { %1891 = vst [vmem:[%s6060_s26 + $0x1a0] sm:$0xff] %v1763_v58  ;;  %1947 = vst [vmem:[%s6060_s26 + $0x360] sm:$0xff] %v1819_v36  ;;  %v1765_v54 = vmul.f32 %v6052_v48, %v1526_v43  ;;  %v1821_v30 = vmul.f32 %v6052_v48, %v1666_v17  ;;  %v1528_v27 = vpop.f32.mrb[119].mxu0  ;;  %v1668_v53 = vpop.f32.mrb[55].mxu1 }
 0x436   : > { %1892 = vst [vmem:[%s6060_s26 + $0x1a8] sm:$0xff] %v1764_v31  ;;  %1948 = vst [vmem:[%s6060_s26 + $0x368] sm:$0xff] %v1820_v28  ;;  %v1766_v4 = vmul.f32 %v6054_v22, %v1528_v27  ;;  %v1822_v5 = vmul.f32 %v6054_v22, %v1668_v53 }
 0x437   : > { %1893 = vst [vmem:[%s6060_s26 + $0x1b0] sm:$0xff] %v1765_v54  ;;  %1949 = vst [vmem:[%s6060_s26 + $0x370] sm:$0xff] %v1821_v30 }
 0x438   : > { %1894 = vst [vmem:[%s6060_s26 + $0x1b8] sm:$0xff] %v1766_v4  ;;  %1950 = vst [vmem:[%s6060_s26 + $0x378] sm:$0xff] %v1822_v5 }
 0x43a   : > { %v1672_v41 = vpop.f32.mrb[56].mxu1  ;;  %v2297_v18 = vpop.f32.mrb[120].mxu0 }
 0x43b   : > { %v1823_v58 = vmul.f32 %v6052_v48, %v1672_v41  ;;  %v1674_v36 = vpop.f32.mrb[57].mxu1  ;;  %v2299_v14 = vpop.f32.mrb[121].mxu0 }
 0x43c   : > { %v1824_v24 = vmul.f32 %v6054_v22, %v1674_v36  ;;  %v1676_v31 = vpop.f32.mrb[58].mxu1  ;;  %v2301_v28 = vpop.f32.mrb[122].mxu0 }
 0x43d   : > { %1951 = vst [vmem:[%s6060_s26 + $0x380] sm:$0xff] %v1823_v58  ;;  %v1825_v43 = vmul.f32 %v6052_v48, %v1676_v31  ;;  %v2376_v17 = vpack.c.bf16 %v2301_v28, %v2297_v18  ;;  %v1678_v54 = vpop.f32.mrb[59].mxu1  ;;  %v2303_v30 = vpop.f32.mrb[123].mxu0 }
 0x43e   : > { %1952 = vst [vmem:[%s6060_s26 + $0x388] sm:$0xff] %v1824_v24  ;;  %v1826_v27 = vmul.f32 %v6054_v22, %v1678_v54  ;;  %v2377_v53 = vpack.c.bf16 %v2303_v30, %v2299_v14 }
 0x43f   : > { %1953 = vst [vmem:[%s6060_s26 + $0x390] sm:$0xff] %v1825_v43 }
 0x440   : > { %1954 = vst [vmem:[%s6060_s26 + $0x398] sm:$0xff] %v1826_v27  ;;  %2392 = vmatprep.subr.bf16.mxu0 %v2377_v53 }
 0x441   : > { %2393 = vmatpush1.bf16.msra.mxu0 %v2376_v17 }
 0x442   : > { %v1682_v4 = vpop.f32.mrb[60].mxu1  ;;  %v2307_v5 = vpop.f32.mrb[124].mxu0 }
 0x443   : > { %v1827_v41 = vmul.f32 %v6052_v48, %v1682_v4  ;;  %v1684_v58 = vpop.f32.mrb[61].mxu1  ;;  %v2309_v18 = vpop.f32.mrb[125].mxu0 }
 0x444   : > { %v1828_v36 = vmul.f32 %v6054_v22, %v1684_v58  ;;  %v1686_v31 = vpop.f32.mrb[62].mxu1  ;;  %v2311_v24 = vpop.f32.mrb[126].mxu0 }
 0x445   : > { %1955 = vst [vmem:[%s6060_s26 + $0x3a0] sm:$0xff] %v1827_v41  ;;  %v1829_v14 = vmul.f32 %v6052_v48, %v1686_v31  ;;  %v2378_v28 = vpack.c.bf16 %v2311_v24, %v2307_v5  ;;  %v1688_v43 = vpop.f32.mrb[63].mxu1  ;;  %v2313_v54 = vpop.f32.mrb[127].mxu0 }
 0x446   : > { %1956 = vst [vmem:[%s6060_s26 + $0x3a8] sm:$0xff] %v1828_v36  ;;  %v1830_v17 = vmul.f32 %v6054_v22, %v1688_v43  ;;  %v2379_v30 = vpack.c.bf16 %v2313_v54, %v2309_v18 }
 0x447   : > { %1957 = vst [vmem:[%s6060_s26 + $0x3b0] sm:$0xff] %v1829_v14 }
 0x448   : > { %1958 = vst [vmem:[%s6060_s26 + $0x3b8] sm:$0xff] %v1830_v17  ;;  %2394 = vmatprep.subr.bf16.mxu0 %v2379_v30 }
 0x449   : > { %2395 = vmatpush1.bf16.msra.mxu0 %v2378_v28 }
 0x44a   : > { %v1692_v27 = vpop.f32.mrb[64].mxu1  ;;  %v2317_v53 = vpop.f32.mrb[128].mxu0 }
 0x44b   : > { %v1831_v4 = vmul.f32 %v6052_v48, %v1692_v27  ;;  %v1694_v41 = vpop.f32.mrb[65].mxu1  ;;  %v2319_v5 = vpop.f32.mrb[129].mxu0 }
 0x44c   : > { %v1832_v58 = vmul.f32 %v6054_v22, %v1694_v41  ;;  %v1696_v31 = vpop.f32.mrb[66].mxu1  ;;  %v2321_v36 = vpop.f32.mrb[130].mxu0 }
 0x44d   : > { %1959 = vst [vmem:[%s6060_s26 + $0x3c0] sm:$0xff] %v1831_v4  ;;  %v1833_v18 = vmul.f32 %v6052_v48, %v1696_v31  ;;  %v2380_v24 = vpack.c.bf16 %v2321_v36, %v2317_v53  ;;  %v1698_v14 = vpop.f32.mrb[67].mxu1  ;;  %v2323_v43 = vpop.f32.mrb[131].mxu0 }
 0x44e   : > { %1960 = vst [vmem:[%s6060_s26 + $0x3c8] sm:$0xff] %v1832_v58  ;;  %v1834_v28 = vmul.f32 %v6054_v22, %v1698_v14  ;;  %v2381_v54 = vpack.c.bf16 %v2323_v43, %v2319_v5 }
 0x44f   : > { %1961 = vst [vmem:[%s6060_s26 + $0x3d0] sm:$0xff] %v1833_v18 }
 0x450   : > { %1962 = vst [vmem:[%s6060_s26 + $0x3d8] sm:$0xff] %v1834_v28  ;;  %2396 = vmatprep.subr.bf16.mxu0 %v2381_v54 }
 0x451   : > { %2397 = vmatpush1.bf16.msra.mxu0 %v2380_v24 }
 0x452   : > { %v1702_v17 = vpop.f32.mrb[68].mxu1  ;;  %v2327_v30 = vpop.f32.mrb[132].mxu0 }
 0x453   : > { %v1835_v27 = vmul.f32 %v6052_v48, %v1702_v17  ;;  %v1704_v4 = vpop.f32.mrb[69].mxu1  ;;  %v2329_v53 = vpop.f32.mrb[133].mxu0 }
 0x454   : > { %v1836_v41 = vmul.f32 %v6054_v22, %v1704_v4  ;;  %v1706_v31 = vpop.f32.mrb[70].mxu1  ;;  %v2331_v58 = vpop.f32.mrb[134].mxu0 }
 0x455   : > { %1963 = vst [vmem:[%s6060_s26 + $0x3e0] sm:$0xff] %v1835_v27  ;;  %v1837_v5 = vmul.f32 %v6052_v48, %v1706_v31  ;;  %v2382_v36 = vpack.c.bf16 %v2331_v58, %v2327_v30  ;;  %v1708_v18 = vpop.f32.mrb[71].mxu1  ;;  %v2333_v14 = vpop.f32.mrb[135].mxu0 }
 0x456   : > { %1964 = vst [vmem:[%s6060_s26 + $0x3e8] sm:$0xff] %v1836_v41  ;;  %v1838_v24 = vmul.f32 %v6054_v22, %v1708_v18  ;;  %v2383_v43 = vpack.c.bf16 %v2333_v14, %v2329_v53 }
 0x457   : > { %1965 = vst [vmem:[%s6060_s26 + $0x3f0] sm:$0xff] %v1837_v5 }
 0x458   : > { %1966 = vst [vmem:[%s6060_s26 + $0x3f8] sm:$0xff] %v1838_v24  ;;  %2398 = vmatprep.subr.bf16.mxu0 %v2383_v43 }
 0x459   : > { %2399 = vmatpush1.bf16.msra.mxu0 %v2382_v36 }
 0x45a   : > { %v2337_v28 = vpop.f32.mrb[136].mxu0 }
 0x45b   : > { %v2339_v54 = vpop.f32.mrb[137].mxu0 }
 0x45c   : > { %v2341_v17 = vpop.f32.mrb[138].mxu0 }
 0x45d   : > { %v2384_v4 = vpack.c.bf16 %v2341_v17, %v2337_v28  ;;  %v2343_v39 = vpop.f32.mrb[139].mxu0  ;;  %v8050_v17 = vld [vmem:[#allocation26_spill] sm:$0xff] }
 0x45e   : > { %v2385_v32 = vpack.c.bf16 %v2343_v39, %v2339_v54 }
 0x460   : > { %2400 = vmatprep.subr.bf16.mxu0 %v2385_v32 }
 0x461   : > { %2401 = vmatpush1.bf16.msra.mxu0 %v2384_v4  ;;  %v8051_v4 = vld [vmem:[#allocation27_spill] sm:$0xff] }
 0x462   : > { %v2347_v48 = vpop.f32.mrb[140].mxu0 }
 0x463   : > { %v2349_v30 = vpop.f32.mrb[141].mxu0 }
 0x464   : > { %v2351_v27 = vpop.f32.mrb[142].mxu0 }
 0x465   : > { %v2386_v31 = vpack.c.bf16 %v2351_v27, %v2347_v48  ;;  %v2353_v41 = vpop.f32.mrb[143].mxu0  ;;  %v8052_v48 = vld [vmem:[#allocation28_spill] sm:$0xff]  ;;  %v8054_v27 = vld [vmem:[#allocation30_spill] sm:$0xff] }
 0x466   : > { %v2387_v58 = vpack.c.bf16 %v2353_v41, %v2349_v30  ;;  %v8053_v30 = vld [vmem:[#allocation29_spill] sm:$0xff]  ;;  %v8056_v41 = vld [vmem:[#allocation32_spill] sm:$0xff] }
 0x468   : > { %2402 = vmatprep.subr.bf16.mxu0 %v2387_v58  ;;  %v8057_v58 = vld [vmem:[#allocation33_spill] sm:$0xff] }
 0x469   : > { %2403 = vmatpush1.bf16.msra.mxu0 %v2386_v31  ;;  %v8055_v31 = vld [vmem:[#allocation31_spill] sm:$0xff] }
 0x46a   : > { %v2357_v22 = vpop.f32.mrb[144].mxu0 }
 0x46b   : > { %v2359_v53 = vpop.f32.mrb[145].mxu0 }
 0x46c   : > { %v2361_v5 = vpop.f32.mrb[146].mxu0 }
 0x46d   : > { %v2388_v36 = vpack.c.bf16 %v2361_v5, %v2357_v22  ;;  %v2363_v18 = vpop.f32.mrb[147].mxu0  ;;  %v8058_v22 = vld [vmem:[#allocation34_spill] sm:$0xff]  ;;  %v8060_v5 = vld [vmem:[#allocation36_spill] sm:$0xff] }
 0x46e   : > { %v2389_v14 = vpack.c.bf16 %v2363_v18, %v2359_v53  ;;  %v8059_v53 = vld [vmem:[#allocation35_spill] sm:$0xff]  ;;  %v8062_v18 = vld [vmem:[#allocation38_spill] sm:$0xff] }
 0x470   : > { %2404 = vmatprep.subr.bf16.mxu0 %v2389_v14  ;;  %v8063_v14 = vld [vmem:[#allocation39_spill] sm:$0xff] }
 0x471   : > { %2405 = vmatpush1.bf16.msra.mxu0 %v2388_v36  ;;  %v8061_v36 = vld [vmem:[#allocation37_spill] sm:$0xff] }
 0x472   : > { %v2367_v24 = vpop.f32.mrb[148].mxu0 }
 0x473   : > { %v2369_v39 = vpop.f32.mrb[149].mxu0 }
 0x474   : > { %v2371_v32 = vpop.f32.mrb[150].mxu0 }
 0x475   : > { %v2390_v43 = vpack.c.bf16 %v2371_v32, %v2367_v24  ;;  %v2373_v28 = vpop.f32.mrb[151].mxu0  ;;  %v8064_v24 = vld [vmem:[#allocation40_spill] sm:$0xff] }
 0x476   : > { %v2391_v54 = vpack.c.bf16 %v2373_v28, %v2369_v39  ;;  %v8065_v39 = vld [vmem:[#allocation41_spill] sm:$0xff] }
 0x478   : > { %2406 = vmatprep.subr.bf16.mxu0 %v2391_v54 }
 0x479   : > { %2407 = vmatpush1.bf16.msra.mxu0 %v2390_v43 }
 0x47c   : > { %2425 = vmatmul.mubr.bf16.vlgmr.msra.gmra.mrb[152].mxu0 %v8050_v17 }
 0x47d   : > { %2434 = vmatprep.mubr.bf16.mxu0 %v8042_v2 }
 0x484   : > { %2435 = vmatmul.mubr.bf16.gmra.mrb[156].mxu0 %v8051_v4 }
 0x485   : > { %2444 = vmatprep.mubr.bf16.mxu0 %v8042_v2 }
 0x48c   : > { %2445 = vmatmul.mubr.bf16.gmra.mrb[160].mxu0 %v8052_v48 }
 0x48d   : > { %2454 = vmatprep.mubr.bf16.mxu0 %v8042_v2 }
 0x494   : > { %2455 = vmatmul.mubr.bf16.gmra.mrb[164].mxu0 %v8053_v30 }
 0x495   : > { %2464 = vmatprep.mubr.bf16.mxu0 %v8042_v2 }
 0x49c   : > { %2465 = vmatmul.mubr.bf16.gmra.mrb[168].mxu0 %v8054_v27 }
 0x49d   : > { %2474 = vmatprep.mubr.bf16.mxu0 %v8042_v2 }
 0x4a4   : > { %2475 = vmatmul.mubr.bf16.gmra.mrb[172].mxu0 %v8055_v31 }
 0x4a5   : > { %2484 = vmatprep.mubr.bf16.mxu0 %v8042_v2 }
 0x4ac   : > { %2485 = vmatmul.mubr.bf16.gmra.mrb[176].mxu0 %v8056_v41 }
 0x4ad   : > { %2494 = vmatprep.mubr.bf16.mxu0 %v8042_v2 }
 0x4b4   : > { %2495 = vmatmul.mubr.bf16.gmra.mrb[180].mxu0 %v8057_v58 }
 0x4b5   : > { %2504 = vmatprep.mubr.bf16.mxu0 %v8042_v2 }
 0x4bc   : > { %2505 = vmatmul.mubr.bf16.gmra.mrb[184].mxu0 %v8058_v22 }
 0x4bd   : > { %2514 = vmatprep.mubr.bf16.mxu0 %v8042_v2 }
 0x4c4   : > { %2515 = vmatmul.mubr.bf16.gmra.mrb[188].mxu0 %v8059_v53 }
 0x4c5   : > { %2524 = vmatprep.mubr.bf16.mxu0 %v8042_v2 }
 0x4cc   : > { %2525 = vmatmul.mubr.bf16.gmra.mrb[192].mxu0 %v8060_v5 }
 0x4cd   : > { %2534 = vmatprep.mubr.bf16.mxu0 %v8042_v2 }
 0x4d4   : > { %2535 = vmatmul.mubr.bf16.gmra.mrb[196].mxu0 %v8061_v36 }
 0x4d5   : > { %2544 = vmatprep.mubr.bf16.mxu0 %v8042_v2 }
 0x4dc   : > { %2545 = vmatmul.mubr.bf16.gmra.mrb[200].mxu0 %v8062_v18 }
 0x4dd   : > { %2554 = vmatprep.mubr.bf16.mxu0 %v8042_v2 }
 0x4e4   : > { %2555 = vmatmul.mubr.bf16.gmra.mrb[204].mxu0 %v8063_v14 }
 0x4e5   : > { %2564 = vmatprep.mubr.bf16.mxu0 %v8042_v2 }
 0x4ec   : > { %2565 = vmatmul.mubr.bf16.gmra.mrb[208].mxu0 %v8064_v24 }
 0x4ed   : > { %2574 = vmatprep.mubr.bf16.mxu0 %v8042_v2 }
 0x4f4   : > { %2575 = vmatmul.mubr.bf16.gmra.mrb[212].mxu0 %v8065_v39 }
 0x54f   : > { %v6345_v32 = vpop.f32.mrb[152].mxu0 }
 0x550   : > { %v6347_v43 = vpop.f32.mrb[153].mxu0 }
 0x551   : > { %v6349_v28 = vpop.f32.mrb[154].mxu0 }
 0x552   : > { %v6351_v54 = vpop.f32.mrb[155].mxu0 }
 0x557   : > { %v6353_v17 = vpop.f32.mrb[156].mxu0 }
 0x558   : > { %v2585_v4 = vmax.f32 %v6345_v32, %v6353_v17  ;;  %v6357_v48 = vpop.f32.mrb[157].mxu0 }
 0x559   : > { %v2622_v2 = vmax.f32 %v6347_v43, %v6357_v48  ;;  %v6361_v30 = vpop.f32.mrb[158].mxu0 }
 0x55a   : > { %v2586_v27 = vmax.f32 %v6349_v28, %v6361_v30  ;;  %v6365_v31 = vpop.f32.mrb[159].mxu0 }
 0x55b   : > { %v2623_v41 = vmax.f32 %v6351_v54, %v6365_v31 }
 0x55f   : > { %v6369_v58 = vpop.f32.mrb[160].mxu0 }
 0x560   : > { %v2587_v22 = vmax.f32 %v2585_v4, %v6369_v58  ;;  %v6372_v53 = vpop.f32.mrb[161].mxu0 }
 0x561   : > { %v2624_v5 = vmax.f32 %v2622_v2, %v6372_v53  ;;  %v6375_v36 = vpop.f32.mrb[162].mxu0 }
 0x562   : > { %v2588_v18 = vmax.f32 %v2586_v27, %v6375_v36  ;;  %v6378_v14 = vpop.f32.mrb[163].mxu0 }
 0x563   : > { %v2625_v24 = vmax.f32 %v2623_v41, %v6378_v14 }
 0x567   : > { %v6381_v39 = vpop.f32.mrb[164].mxu0 }
 0x568   : > { %v2589_v3 = vmax.f32 %v2587_v22, %v6381_v39  ;;  %v6384_v19 = vpop.f32.mrb[165].mxu0 }
 0x569   : > { %v2626_v4 = vmax.f32 %v2624_v5, %v6384_v19  ;;  %v6387_v44 = vpop.f32.mrb[166].mxu0 }
 0x56a   : > { %v2590_v2 = vmax.f32 %v2588_v18, %v6387_v44  ;;  %v6390_v57 = vpop.f32.mrb[167].mxu0 }
 0x56b   : > { %v2627_v27 = vmax.f32 %v2625_v24, %v6390_v57 }
 0x56f   : > { %v6393_v55 = vpop.f32.mrb[168].mxu0 }
 0x570   : > { %v2591_v41 = vmax.f32 %v2589_v3, %v6393_v55  ;;  %v6396_v50 = vpop.f32.mrb[169].mxu0 }
 0x571   : > { %v2628_v22 = vmax.f32 %v2626_v4, %v6396_v50  ;;  %v6399_v6 = vpop.f32.mrb[170].mxu0 }
 0x572   : > { %v2592_v5 = vmax.f32 %v2590_v2, %v6399_v6  ;;  %v6402_v21 = vpop.f32.mrb[171].mxu0 }
 0x573   : > { %v2629_v18 = vmax.f32 %v2627_v27, %v6402_v21 }
 0x577   : > { %v6405_v56 = vpop.f32.mrb[172].mxu0 }
 0x578   : > { %v2593_v24 = vmax.f32 %v2591_v41, %v6405_v56  ;;  %v6408_v12 = vpop.f32.mrb[173].mxu0 }
 0x579   : > { %v2630_v3 = vmax.f32 %v2628_v22, %v6408_v12  ;;  %v6411_v60 = vpop.f32.mrb[174].mxu0 }
 0x57a   : > { %v2594_v4 = vmax.f32 %v2592_v5, %v6411_v60  ;;  %v6414_v52 = vpop.f32.mrb[175].mxu0 }
 0x57b   : > { %8066 = vst [vmem:[#allocation26_spill] sm:$0xff] %v6414_v52  ;;  %v2631_v2 = vmax.f32 %v2629_v18, %v6414_v52 }
 0x57f   : > { %v6417_v8 = vpop.f32.mrb[176].mxu0 }
 0x580   : > { %v2595_v27 = vmax.f32 %v2593_v24, %v6417_v8  ;;  %v6420_v40 = vpop.f32.mrb[177].mxu0 }
 0x581   : > { %8067 = vst [vmem:[#allocation27_spill] sm:$0xff] %v6420_v40  ;;  %v2632_v41 = vmax.f32 %v2630_v3, %v6420_v40  ;;  %v6423_v59 = vpop.f32.mrb[178].mxu0 }
 0x582   : > { %v2596_v22 = vmax.f32 %v2594_v4, %v6423_v59  ;;  %v6426_v45 = vpop.f32.mrb[179].mxu0 }
 0x583   : > { %8068 = vst [vmem:[#allocation28_spill] sm:$0xff] %v6426_v45  ;;  %v2633_v5 = vmax.f32 %v2631_v2, %v6426_v45 }
 0x587   : > { %v6429_v10 = vpop.f32.mrb[180].mxu0 }
 0x588   : > { %v2597_v18 = vmax.f32 %v2595_v27, %v6429_v10  ;;  %v6432_v38 = vpop.f32.mrb[181].mxu0 }
 0x589   : > { %8069 = vst [vmem:[#allocation29_spill] sm:$0xff] %v6432_v38  ;;  %v2634_v24 = vmax.f32 %v2632_v41, %v6432_v38  ;;  %v6435_v1 = vpop.f32.mrb[182].mxu0 }
 0x58a   : > { %v2598_v3 = vmax.f32 %v2596_v22, %v6435_v1  ;;  %v6438_v33 = vpop.f32.mrb[183].mxu0 }
 0x58b   : > { %8070 = vst [vmem:[#allocation30_spill] sm:$0xff] %v6438_v33  ;;  %v2635_v4 = vmax.f32 %v2633_v5, %v6438_v33 }
 0x58f   : > { %v6441_v35 = vpop.f32.mrb[184].mxu0 }
 0x590   : > { %v2599_v2 = vmax.f32 %v2597_v18, %v6441_v35  ;;  %v6444_v23 = vpop.f32.mrb[185].mxu0 }
 0x591   : > { %8071 = vst [vmem:[#allocation31_spill] sm:$0xff] %v6444_v23  ;;  %v2636_v27 = vmax.f32 %v2634_v24, %v6444_v23  ;;  %v6447_v15 = vpop.f32.mrb[186].mxu0 }
 0x592   : > { %v2600_v41 = vmax.f32 %v2598_v3, %v6447_v15  ;;  %v6450_v46 = vpop.f32.mrb[187].mxu0 }
 0x593   : > { %8072 = vst [vmem:[#allocation32_spill] sm:$0xff] %v6450_v46  ;;  %v2637_v22 = vmax.f32 %v2635_v4, %v6450_v46 }
 0x597   : > { %v6453_v62 = vpop.f32.mrb[188].mxu0 }
 0x598   : > { %v2601_v5 = vmax.f32 %v2599_v2, %v6453_v62  ;;  %v6456_v20 = vpop.f32.mrb[189].mxu0 }
 0x599   : > { %8073 = vst [vmem:[#allocation33_spill] sm:$0xff] %v6456_v20  ;;  %v2638_v18 = vmax.f32 %v2636_v27, %v6456_v20  ;;  %v6459_v29 = vpop.f32.mrb[190].mxu0 }
 0x59a   : > { %v2602_v24 = vmax.f32 %v2600_v41, %v6459_v29  ;;  %v6462_v25 = vpop.f32.mrb[191].mxu0 }
 0x59b   : > { %8074 = vst [vmem:[#allocation34_spill] sm:$0xff] %v6462_v25  ;;  %v2639_v3 = vmax.f32 %v2637_v22, %v6462_v25 }
 0x59f   : > { %v6465_v42 = vpop.f32.mrb[192].mxu0 }
 0x5a0   : > { %v2603_v4 = vmax.f32 %v2601_v5, %v6465_v42  ;;  %v6468_v61 = vpop.f32.mrb[193].mxu0 }
 0x5a1   : > { %8075 = vst [vmem:[#allocation35_spill] sm:$0xff] %v6468_v61  ;;  %v2640_v2 = vmax.f32 %v2638_v18, %v6468_v61  ;;  %v6471_v51 = vpop.f32.mrb[194].mxu0 }
 0x5a2   : > { %v2604_v27 = vmax.f32 %v2602_v24, %v6471_v51  ;;  %v6474_v0 = vpop.f32.mrb[195].mxu0 }
 0x5a3   : > { %8076 = vst [vmem:[#allocation36_spill] sm:$0xff] %v6474_v0  ;;  %v2641_v41 = vmax.f32 %v2639_v3, %v6474_v0 }
 0x5a7   : > { %v6477_v13 = vpop.f32.mrb[196].mxu0 }
 0x5a8   : > { %v2605_v22 = vmax.f32 %v2603_v4, %v6477_v13  ;;  %v6480_v26 = vpop.f32.mrb[197].mxu0 }
 0x5a9   : > { %8077 = vst [vmem:[#allocation37_spill] sm:$0xff] %v6480_v26  ;;  %v2642_v5 = vmax.f32 %v2640_v2, %v6480_v26  ;;  %v6483_v47 = vpop.f32.mrb[198].mxu0 }
 0x5aa   : > { %v2606_v18 = vmax.f32 %v2604_v27, %v6483_v47  ;;  %v6486_v37 = vpop.f32.mrb[199].mxu0 }
 0x5ab   : > { %8078 = vst [vmem:[#allocation38_spill] sm:$0xff] %v6486_v37  ;;  %v2643_v24 = vmax.f32 %v2641_v41, %v6486_v37 }
 0x5af   : > { %v6489_v34 = vpop.f32.mrb[200].mxu0 }
 0x5b0   : > { %v2607_v3 = vmax.f32 %v2605_v22, %v6489_v34  ;;  %v6492_v16 = vpop.f32.mrb[201].mxu0 }
 0x5b1   : > { %8079 = vst [vmem:[#allocation39_spill] sm:$0xff] %v6492_v16  ;;  %v2644_v4 = vmax.f32 %v2642_v5, %v6492_v16  ;;  %v6495_v11 = vpop.f32.mrb[202].mxu0 }
 0x5b2   : > { %v2608_v2 = vmax.f32 %v2606_v18, %v6495_v11  ;;  %v6498_v9 = vpop.f32.mrb[203].mxu0 }
 0x5b3   : > { %8080 = vst [vmem:[#allocation40_spill] sm:$0xff] %v6498_v9  ;;  %v2645_v27 = vmax.f32 %v2643_v24, %v6498_v9 }
 0x5b7   : > { %v6501_v7 = vpop.f32.mrb[204].mxu0 }
 0x5b8   : > { %v2609_v41 = vmax.f32 %v2607_v3, %v6501_v7  ;;  %v6504_v49 = vpop.f32.mrb[205].mxu0 }
 0x5b9   : > { %8081 = vst [vmem:[#allocation41_spill] sm:$0xff] %v6504_v49  ;;  %v2646_v22 = vmax.f32 %v2644_v4, %v6504_v49  ;;  %v6507_v63 = vpop.f32.mrb[206].mxu0 }
 0x5ba   : > { %v2610_v5 = vmax.f32 %v2608_v2, %v6507_v63  ;;  %v6510_v16 = vpop.f32.mrb[207].mxu0 }
 0x5bb   : > { %8082 = vst [vmem:[#allocation103_spill] sm:$0xff] %v6510_v16  ;;  %v2647_v18 = vmax.f32 %v2645_v27, %v6510_v16 }
 0x5bf   : > { %v6513_v37 = vpop.f32.mrb[208].mxu0 }
 0x5c0   : > { %v2611_v24 = vmax.f32 %v2609_v41, %v6513_v37  ;;  %v6516_v9 = vpop.f32.mrb[209].mxu0 }
 0x5c1   : > { %8083 = vst [vmem:[#allocation104_spill] sm:$0xff] %v6516_v9  ;;  %v2648_v3 = vmax.f32 %v2646_v22, %v6516_v9  ;;  %v6519_v26 = vpop.f32.mrb[210].mxu0 }
 0x5c2   : > { %v2612_v4 = vmax.f32 %v2610_v5, %v6519_v26  ;;  %v6522_v49 = vpop.f32.mrb[211].mxu0 }
 0x5c3   : > { %8084 = vst [vmem:[#allocation105_spill] sm:$0xff] %v6522_v49  ;;  %v2649_v2 = vmax.f32 %v2647_v18, %v6522_v49 }
 0x5c7   : > { %v6525_v0 = vpop.f32.mrb[212].mxu0 }
 0x5c8   : > { %v2613_v27 = vmax.f32 %v2611_v24, %v6525_v0  ;;  %v6528_v16 = vpop.f32.mrb[213].mxu0 }
 0x5c9   : > { %8085 = vst [vmem:[#allocation106_spill] sm:$0xff] %v6528_v16  ;;  %v2650_v41 = vmax.f32 %v2648_v3, %v6528_v16  ;;  %v6531_v61 = vpop.f32.mrb[214].mxu0 }
 0x5ca   : > { %v2614_v22 = vmax.f32 %v2612_v4, %v6531_v61  ;;  %v6534_v9 = vpop.f32.mrb[215].mxu0 }
 0x5cb   : > { %8086 = vst [vmem:[#allocation107_spill] sm:$0xff] %v6534_v9  ;;  %v2651_v5 = vmax.f32 %v2649_v2, %v6534_v9 }
 0x5cc   : > { %v2615_v25 = vmax.f32 %v2613_v27, %v2614_v22 }
 0x5cd   : > { %v2652_v20 = vmax.f32 %v2650_v41, %v2651_v5 }
 0x5ce   : > { %v2616_v46 = vrot.slane %v2615_v25, 4 }
 0x5cf   : > { %v2653_v18 = vrot.slane %v2652_v20, 4 }
 0x5d0   : > { %v2617_v49 = vmax.f32 %v2615_v25, %v2616_v46 }
 0x5d1   : > { %v2654_v23 = vmax.f32 %v2652_v20, %v2653_v18 }
 0x5d2   : > { %v2618_v33 = vrot.slane %v2617_v49, 2 }
 0x5d3   : > { %v2655_v24 = vrot.slane %v2654_v23, 2 }
 0x5d4   : > { %v2619_v38 = vmax.f32 %v2617_v49, %v2618_v33 }
 0x5d5   : > { %v2656_v45 = vmax.f32 %v2654_v23, %v2655_v24 }
 0x5d6   : > { %v2620_v40 = vrot.slane %v2619_v38, 1 }
 0x5d7   : > { %v2657_v3 = vrot.slane %v2656_v45, 1 }
 0x5d8   : > { %v6537_v16 = vmax.f32 %v2619_v38, %v2620_v40 }
 0x5d9   : > { %v6539_v52 = vmax.f32 %v2656_v45, %v2657_v3 }
 0x5da   : > { %v2659_v4 = vsub.f32 %v6345_v32, %v6537_v16  ;;  %v2661_v2 = vsub.f32 %v6349_v28, %v6537_v16  ;;  %v2663_v25 = vsub.f32 %v6353_v17, %v6537_v16  ;;  %v2665_v20 = vsub.f32 %v6361_v30, %v6537_v16 }
 0x5db   : > { %v2667_v49 = vsub.f32 %v6369_v58, %v6537_v16  ;;  %v2669_v40 = vsub.f32 %v6375_v36, %v6537_v16  ;;  %v2671_v45 = vsub.f32 %v6381_v39, %v6537_v16  ;;  %v2673_v46 = vsub.f32 %v6387_v44, %v6537_v16 }
 0x5dc   : > { %v2675_v23 = vsub.f32 %v6393_v55, %v6537_v16  ;;  %v2677_v33 = vsub.f32 %v6399_v6, %v6537_v16  ;;  %v2679_v38 = vsub.f32 %v6405_v56, %v6537_v16  ;;  %v2681_v32 = vsub.f32 %v6411_v60, %v6537_v16 }
 0x5dd   : > { %v2683_v28 = vsub.f32 %v6417_v8, %v6537_v16  ;;  %v2685_v17 = vsub.f32 %v6423_v59, %v6537_v16  ;;  %v2687_v44 = vsub.f32 %v6429_v10, %v6537_v16  ;;  %v2689_v55 = vsub.f32 %v6435_v1, %v6537_v16 }
 0x5de   : > { %v2691_v6 = vsub.f32 %v6441_v35, %v6537_v16  ;;  %v2693_v56 = vsub.f32 %v6447_v15, %v6537_v16  ;;  %v2695_v60 = vsub.f32 %v6453_v62, %v6537_v16  ;;  %v2697_v8 = vsub.f32 %v6459_v29, %v6537_v16  ;;  %v8106_v15 = vld [vmem:[#allocation106_spill] sm:$0xff] }
 0x5df   : > { %v2699_v59 = vsub.f32 %v6465_v42, %v6537_v16  ;;  %v2701_v10 = vsub.f32 %v6471_v51, %v6537_v16  ;;  %v2703_v1 = vsub.f32 %v6477_v13, %v6537_v16  ;;  %v2705_v35 = vsub.f32 %v6483_v47, %v6537_v16 }
 0x5e0   : > { %v2723_v58 = vmul.f32 1.442695, %v2659_v4  ;;  %v2727_v36 = vmul.f32 1.442695, %v2661_v2  ;;  %v2731_v39 = vmul.f32 1.442695, %v2663_v25 }
 0x5e1   : > { %v2735_v41 = vmul.f32 1.442695, %v2665_v20  ;;  %v2739_v5 = vmul.f32 1.442695, %v2667_v49  ;;  %v2743_v18 = vmul.f32 1.442695, %v2669_v40 }
 0x5e2   : > { %4110 = vpow2.f32 %v2723_v58  ;;  %v2747_v24 = vmul.f32 1.442695, %v2671_v45  ;;  %v2751_v3 = vmul.f32 1.442695, %v2673_v46  ;;  %v2755_v47 = vmul.f32 1.442695, %v2675_v23 }
 0x5e3   : > { %4112 = vpow2.f32 %v2727_v36  ;;  %v2759_v30 = vmul.f32 1.442695, %v2677_v33  ;;  %v2763_v4 = vmul.f32 1.442695, %v2679_v38  ;;  %v2767_v2 = vmul.f32 1.442695, %v2681_v32 }
 0x5e4   : > { %4114 = vpow2.f32 %v2731_v39  ;;  %v2771_v25 = vmul.f32 1.442695, %v2683_v28  ;;  %v2775_v27 = vmul.f32 1.442695, %v2685_v17  ;;  %v2779_v20 = vmul.f32 1.442695, %v2687_v44 }
 0x5e5   : > { %4116 = vpow2.f32 %v2735_v41  ;;  %v2783_v13 = vmul.f32 1.442695, %v2689_v55  ;;  %v2787_v22 = vmul.f32 1.442695, %v2691_v6  ;;  %v2791_v58 = vmul.f32 1.442695, %v2693_v56 }
 0x5e6   : > { %4118 = vpow2.f32 %v2739_v5  ;;  %v2795_v49 = vmul.f32 1.442695, %v2695_v60  ;;  %v2799_v40 = vmul.f32 1.442695, %v2697_v8  ;;  %v2803_v36 = vmul.f32 1.442695, %v2699_v59 }
 0x5e7   : > { %4120 = vpow2.f32 %v2743_v18  ;;  %v6609_v45 = vmul.f32 1.442695, %v2701_v10  ;;  %v6611_v46 = vmul.f32 1.442695, %v2703_v1  ;;  %v6613_v23 = vmul.f32 1.442695, %v2705_v35 }
 0x5e8   : > { %4122 = vpow2.f32 %v2747_v24  ;;  %v8087_v59 = vld [vmem:[#allocation26_spill] sm:$0xff]  ;;  %v8089_v39 = vld [vmem:[#allocation28_spill] sm:$0xff]  ;;  %v8090_v18 = vld [vmem:[#allocation29_spill] sm:$0xff] }
 0x5e9   : > { %4124 = vpow2.f32 %v2751_v3  ;;  %v8091_v3 = vld [vmem:[#allocation30_spill] sm:$0xff]  ;;  %v8093_v8 = vld [vmem:[#allocation32_spill] sm:$0xff]  ;;  %v8094_v60 = vld [vmem:[#allocation33_spill] sm:$0xff] }
 0x5ea   : > { %4126 = vpow2.f32 %v2755_v47  ;;  %v8088_v47 = vld [vmem:[#allocation27_spill] sm:$0xff]  ;;  %v8095_v24 = vld [vmem:[#allocation34_spill] sm:$0xff]  ;;  %v8097_v44 = vld [vmem:[#allocation36_spill] sm:$0xff] }
 0x5eb   : > { %4128 = vpow2.f32 %v2759_v30  ;;  %v8096_v55 = vld [vmem:[#allocation35_spill] sm:$0xff]  ;;  %v8098_v41 = vld [vmem:[#allocation37_spill] sm:$0xff]  ;;  %v8099_v32 = vld [vmem:[#allocation38_spill] sm:$0xff] }
 0x5ec   : > { %v6623_v17 = vpop.eup %4110  ;;  %4130 = vpow2.f32 %v2763_v4  ;;  %v8100_v4 = vld [vmem:[#allocation39_spill] sm:$0xff]  ;;  %v8101_v33 = vld [vmem:[#allocation40_spill] sm:$0xff] }
 0x5ed   : > { %v6631_v56 = vpop.eup %4112  ;;  %4132 = vpow2.f32 %v2767_v2  ;;  %v8092_v2 = vld [vmem:[#allocation31_spill] sm:$0xff] }
 0x5ee   : > { %v6639_v1 = vpop.eup %4114  ;;  %4134 = vpow2.f32 %v2771_v25  ;;  %v2851_v35 = vadd.f32 %v6631_v56, %v6623_v17  ;;  %v8105_v25 = vld [vmem:[#allocation105_spill] sm:$0xff] }
 0x5ef   : > { %v6647_v5 = vpop.eup %4116  ;;  %4136 = vpow2.f32 %v2775_v27  ;;  %v8103_v27 = vld [vmem:[#allocation103_spill] sm:$0xff] }
 0x5f0   : > { %v6655_v10 = vpop.eup %4118  ;;  %4138 = vpow2.f32 %v2779_v20  ;;  %v2852_v30 = vadd.f32 %v6639_v1, %v2851_v35 }
 0x5f1   : > { %v6662_v6 = vpop.eup %4120  ;;  %4140 = vpow2.f32 %v2783_v13 }
 0x5f2   : > { %v6670_v28 = vpop.eup %4122  ;;  %4142 = vpow2.f32 %v2787_v22  ;;  %v2853_v35 = vadd.f32 %v6647_v5, %v2852_v30 }
 0x5f3   : > { %v6677_v38 = vpop.eup %4124  ;;  %4144 = vpow2.f32 %v2791_v58 }
 0x5f4   : > { %v6685_v42 = vpop.eup %4126  ;;  %4146 = vpow2.f32 %v2795_v49  ;;  %v2854_v30 = vadd.f32 %v6655_v10, %v2853_v35  ;;  %v8107_v35 = vsub.f32 %v6489_v34, %v6537_v16 }
 0x5f5   : > { %v6692_v62 = vpop.eup %4128  ;;  %4148 = vpow2.f32 %v2799_v40  ;;  %v8108_v40 = vsub.f32 %v6495_v11, %v6537_v16 }
 0x5f6   : > { %v6700_v51 = vpop.eup %4130  ;;  %4150 = vpow2.f32 %v2803_v36  ;;  %v2819_v13 = vmul.f32 1.442695, %v8107_v35  ;;  %v2855_v58 = vadd.f32 %v6662_v6, %v2854_v30  ;;  %v8109_v36 = vsub.f32 %v6501_v7, %v6537_v16 }
 0x5f7   : > { %v6706_v29 = vpop.eup %4132  ;;  %4152 = vpow2.f32 %v6609_v45  ;;  %v2823_v22 = vmul.f32 1.442695, %v8108_v40  ;;  %v8110_v45 = vsub.f32 %v6507_v63, %v6537_v16  ;;  %v8114_v63 = vsub.f32 %v6525_v0, %v6537_v16 }
 0x5f8   : > { %v6712_v20 = vpop.eup %4134  ;;  %4154 = vpow2.f32 %v6611_v46  ;;  %v2827_v49 = vmul.f32 1.442695, %v8109_v36  ;;  %v2856_v34 = vadd.f32 %v6670_v28, %v2855_v58  ;;  %v8111_v46 = vsub.f32 %v6513_v37, %v6537_v16 }
 0x5f9   : > { %v6719_v35 = vpop.eup %4136  ;;  %4156 = vpow2.f32 %v6613_v23  ;;  %v2831_v30 = vmul.f32 1.442695, %v8110_v45  ;;  %v8112_v58 = vsub.f32 %v6519_v26, %v6537_v16 }
 0x5fa   : > { %v6725_v11 = vpop.eup %4138  ;;  %4158 = vpow2.f32 %v2819_v13  ;;  %v2835_v40 = vmul.f32 1.442695, %v8111_v46  ;;  %v2857_v7 = vadd.f32 %v6677_v38, %v2856_v34  ;;  %v2843_v13 = vmul.f32 1.442695, %v8114_v63 }
 0x5fb   : > { %v6731_v36 = vpop.eup %4140  ;;  %4160 = vpow2.f32 %v2823_v22  ;;  %v2839_v23 = vmul.f32 1.442695, %v8112_v58  ;;  %v8115_v34 = vsub.f32 %v6531_v61, %v6537_v16  ;;  %v8118_v16 = vsub.f32 %v6357_v48, %v6539_v52 }
 0x5fc   : > { %v6736_v9 = vpop.eup %4142  ;;  %4162 = vpow2.f32 %v2827_v49  ;;  %v2858_v45 = vadd.f32 %v6685_v42, %v2857_v7  ;;  %v8116_v49 = vsub.f32 %v6347_v43, %v6539_v52  ;;  %v8117_v7 = vsub.f32 %v6351_v54, %v6539_v52 }
 0x5fd   : > { %8113 = vst [vmem:[#allocation26_spill] sm:$0xff] %v6736_v9  ;;  %v6742_v37 = vpop.eup %4144  ;;  %4164 = vpow2.f32 %v2831_v30  ;;  %v2847_v22 = vmul.f32 1.442695, %v8115_v34  ;;  %v2733_v61 = vmul.f32 1.442695, %v8118_v16  ;;  %v8119_v43 = vsub.f32 %v6365_v31, %v6539_v52 }
 0x5fe   : > { %v6747_v46 = vpop.eup %4146  ;;  %4166 = vpow2.f32 %v2835_v40  ;;  %v2859_v26 = vadd.f32 %v6692_v62, %v2858_v45  ;;  %v2725_v58 = vmul.f32 1.442695, %v8116_v49  ;;  %v2729_v30 = vmul.f32 1.442695, %v8117_v7 }
 0x5ff   : > { %v6753_v0 = vpop.eup %4148  ;;  %4168 = vpow2.f32 %v2839_v23  ;;  %v2737_v45 = vmul.f32 1.442695, %v8119_v43  ;;  %v8120_v23 = vsub.f32 %v6372_v53, %v6539_v52  ;;  %v8121_v54 = vsub.f32 %v6378_v14, %v6539_v52 }
 0x600   : > { %v6761_v63 = vpop.eup %4150  ;;  %4170 = vpow2.f32 %v2843_v13  ;;  %v2860_v40 = vadd.f32 %v6700_v51, %v2859_v26  ;;  %v8122_v13 = vsub.f32 %v6384_v19, %v6539_v52  ;;  %v8123_v26 = vsub.f32 %v6390_v57, %v6539_v52 }
 0x601   : > { %v2741_v34 = vmul.f32 1.442695, %v8120_v23  ;;  %v6770_v49 = vpop.eup %4152  ;;  %4172 = vpow2.f32 %v2847_v22  ;;  %v2745_v48 = vmul.f32 1.442695, %v8121_v54  ;;  %v8124_v22 = vsub.f32 %v6396_v50, %v6539_v52 }
 0x602   : > { %v2749_v7 = vmul.f32 1.442695, %v8122_v13  ;;  %v2753_v31 = vmul.f32 1.442695, %v8123_v26  ;;  %v6781_v16 = vpop.eup %4154  ;;  %v2861_v53 = vadd.f32 %v6706_v29, %v2860_v40  ;;  %4174 = vpow2.f32 %v2725_v58 }
 0x603   : > { %v2757_v43 = vmul.f32 1.442695, %v8124_v22  ;;  %v8125_v14 = vsub.f32 %v6402_v21, %v6539_v52  ;;  %v6790_v54 = vpop.eup %4156  ;;  %4176 = vpow2.f32 %v2729_v30 }
 0x604   : > { %v6798_v40 = vpop.eup %4158  ;;  %v2862_v50 = vadd.f32 %v6712_v20, %v2861_v53  ;;  %4178 = vpow2.f32 %v2733_v61 }
 0x605   : > { %v2761_v23 = vmul.f32 1.442695, %v8125_v14  ;;  %v6805_v13 = vpop.eup %4160  ;;  %4180 = vpow2.f32 %v2737_v45  ;;  %v8126_v45 = vsub.f32 %v6408_v12, %v6539_v52  ;;  %v8127_v14 = vsub.f32 %v8087_v59, %v6539_v52 }
 0x606   : > { %v6813_v53 = vpop.eup %4162  ;;  %v2863_v61 = vadd.f32 %v6719_v35, %v2862_v50  ;;  %4182 = vpow2.f32 %v2741_v34 }
 0x607   : > { %v6820_v21 = vpop.eup %4164  ;;  %4184 = vpow2.f32 %v2745_v48  ;;  %v2765_v30 = vmul.f32 1.442695, %v8126_v45  ;;  %v2769_v22 = vmul.f32 1.442695, %v8127_v14 }
 0x608   : > { %v6828_v50 = vpop.eup %4166  ;;  %v2864_v34 = vadd.f32 %v6725_v11, %v2863_v61  ;;  %4186 = vpow2.f32 %v2749_v7  ;;  %v8128_v7 = vsub.f32 %v8088_v47, %v6539_v52  ;;  %v8133_v47 = vsub.f32 %v8093_v8, %v6539_v52 }
 0x609   : > { %v6836_v58 = vpop.eup %4168  ;;  %4188 = vpow2.f32 %v2753_v31  ;;  %v8129_v31 = vsub.f32 %v8089_v39, %v6539_v52  ;;  %v8132_v39 = vsub.f32 %v8092_v2, %v6539_v52  ;;  %v8136_v8 = vsub.f32 %v8096_v55, %v6539_v52 }
 0x60a   : > { %v6841_v26 = vpop.eup %4170  ;;  %v2865_v19 = vadd.f32 %v6731_v36, %v2864_v34  ;;  %4190 = vpow2.f32 %v2757_v43  ;;  %v2773_v12 = vmul.f32 1.442695, %v8128_v7  ;;  %v8130_v43 = vsub.f32 %v8090_v18, %v6539_v52 }
 0x60b   : > { %v6849_v45 = vpop.eup %4172  ;;  %4192 = vpow2.f32 %v2761_v23  ;;  %v2777_v59 = vmul.f32 1.442695, %v8129_v31  ;;  %v8131_v23 = vsub.f32 %v8091_v3, %v6539_v52  ;;  %v2789_v31 = vmul.f32 1.442695, %v8132_v39 }
 0x60c   : > { %v4175_v14 = vpop.eup %4174  ;;  %v2866_v48 = vadd.f32 %v6736_v9, %v2865_v19  ;;  %4194 = vpow2.f32 %v2765_v30  ;;  %v2781_v34 = vmul.f32 1.442695, %v8130_v43  ;;  %v8134_v3 = vsub.f32 %v8094_v60, %v6539_v52 }
 0x60d   : > { %v4177_v7 = vpop.eup %4176  ;;  %4196 = vpow2.f32 %v2769_v22  ;;  %v2785_v61 = vmul.f32 1.442695, %v8131_v23  ;;  %v2793_v22 = vmul.f32 1.442695, %v8133_v47  ;;  %v2805_v47 = vmul.f32 1.442695, %v8136_v8 }
 0x60e   : > { %v4179_v57 = vpop.eup %4178  ;;  %v2867_v19 = vadd.f32 %v6742_v37, %v2866_v48  ;;  %4198 = vpow2.f32 %v2773_v12  ;;  %v2888_v30 = vadd.f32 %v4177_v7, %v4175_v14  ;;  %v2928_v18 = vpack.c.bf16 %v4177_v7, %v4175_v14 }
 0x60f   : > { %v4181_v43 = vpop.eup %4180  ;;  %4200 = vpow2.f32 %v2777_v59  ;;  %v2797_v23 = vmul.f32 1.442695, %v8134_v3  ;;  %v8135_v59 = vsub.f32 %v8095_v24, %v6539_v52  ;;  %v8137_v60 = vpack.c.bf16 %v6631_v56, %v6623_v17 }
 0x610   : > { %v4183_v9 = vpop.eup %4182  ;;  %v2868_v2 = vadd.f32 %v6747_v46, %v2867_v19  ;;  %4202 = vpow2.f32 %v2781_v34  ;;  %v2889_v39 = vadd.f32 %v4179_v57, %v2888_v30  ;;  %2959 = vmatprep.subr.bf16.mxu1 %v2928_v18  ;;  %v2930_v48 = vpack.c.bf16 %v4181_v43, %v4179_v57 }
 0x611   : > { %v4185_v12 = vpop.eup %4184  ;;  %4204 = vpow2.f32 %v2785_v61  ;;  %v2801_v14 = vmul.f32 1.442695, %v8135_v59  ;;  %2960 = vmatpush1.bf16.msra.mxu1 %v8137_v60  ;;  %v8138_v24 = vsub.f32 %v8097_v44, %v6539_v52  ;;  %v8139_v55 = vsub.f32 %v8098_v41, %v6539_v52  ;;  %v8144_v60 = vld [vmem:[#allocation41_spill] sm:$0xff] }
 0x612   : > { %v4187_v7 = vpop.eup %4186  ;;  %v2869_v34 = vadd.f32 %v6753_v0, %v2868_v2  ;;  %4206 = vpow2.f32 %v2789_v31  ;;  %v2890_v19 = vadd.f32 %v4181_v43, %v2889_v39  ;;  %2961 = vmatprep.subr.bf16.mxu1 %v2930_v48  ;;  %v2932_v57 = vpack.c.bf16 %v4185_v12, %v4183_v9 }
 0x613   : > { %v4189_v61 = vpop.eup %4188  ;;  %4208 = vpow2.f32 %v2793_v22  ;;  %v2809_v30 = vmul.f32 1.442695, %v8138_v24  ;;  %v2813_v18 = vmul.f32 1.442695, %v8139_v55  ;;  %v8140_v43 = vsub.f32 %v8099_v32, %v6539_v52 }
 0x614   : > { %v4191_v3 = vpop.eup %4190  ;;  %v2870_v17 = vadd.f32 %v6761_v63, %v2869_v34  ;;  %4210 = vpow2.f32 %v2797_v23  ;;  %v2891_v56 = vadd.f32 %v4183_v9, %v2890_v19  ;;  %v2934_v2 = vpack.c.bf16 %v4189_v61, %v4187_v7 }
 0x615   : > { %v4193_v31 = vpop.eup %4192  ;;  %4212 = vpow2.f32 %v2801_v14  ;;  %v2817_v22 = vmul.f32 1.442695, %v8140_v43  ;;  %v8141_v44 = vsub.f32 %v8100_v4, %v6539_v52  ;;  %v8142_v41 = vpack.c.bf16 %v6647_v5, %v6639_v1 }
 0x616   : > { %v4195_v48 = vpop.eup %4194  ;;  %v2871_v59 = vadd.f32 %v6770_v49, %v2870_v17  ;;  %4214 = vpow2.f32 %v2805_v47  ;;  %v2892_v9 = vadd.f32 %v4185_v12, %v2891_v56  ;;  %v2936_v23 = vpack.c.bf16 %v4193_v31, %v4191_v3 }
 0x617   : > { %v2821_v39 = vmul.f32 1.442695, %v8141_v44  ;;  %2962 = vmatpush1.bf16.msra.mxu1 %v8142_v41  ;;  %v4197_v14 = vpop.eup %4196  ;;  %4216 = vpow2.f32 %v2809_v30  ;;  %v8143_v32 = vsub.f32 %v8101_v33, %v6539_v52  ;;  %v8145_v4 = vsub.f32 %v8144_v60, %v6539_v52  ;;  %v8147_v30 = vld [vmem:[#allocation104_spill] sm:$0xff] }
 0x618   : > { %2963 = vmatprep.subr.bf16.mxu1 %v2932_v57  ;;  %v4199_v19 = vpop.eup %4198  ;;  %v2872_v1 = vadd.f32 %v6781_v16, %v2871_v59  ;;  %4218 = vpow2.f32 %v2813_v18  ;;  %v2893_v5 = vadd.f32 %v4187_v7, %v2892_v9  ;;  %v2938_v24 = vpack.c.bf16 %v4197_v14, %v4195_v48 }
 0x619   : > { %v2825_v8 = vmul.f32 1.442695, %v8143_v32  ;;  %v2829_v34 = vmul.f32 1.442695, %v8145_v4  ;;  %v4201_v47 = vpop.eup %4200  ;;  %4220 = vpow2.f32 %v2817_v22  ;;  %v8146_v12 = vsub.f32 %v8103_v27, %v6539_v52 }
 0x61a   : > { %v8148_v33 = vsub.f32 %v8147_v30, %v6539_v52  ;;  %v8149_v17 = vpack.c.bf16 %v6662_v6, %v6655_v10  ;;  %v4203_v56 = vpop.eup %4202  ;;  %v2873_v43 = vadd.f32 %v6790_v54, %v2872_v1  ;;  %4222 = vpow2.f32 %v2821_v39 }
 0x61b   : > { %v2833_v57 = vmul.f32 1.442695, %v8146_v12  ;;  %v2894_v7 = vadd.f32 %v4189_v61, %v2893_v5  ;;  %v2940_v18 = vpack.c.bf16 %v4201_v47, %v4199_v19  ;;  %v4205_v22 = vpop.eup %4204  ;;  %4224 = vpow2.f32 %v2825_v8  ;;  %v8152_v61 = vld [vmem:[#allocation107_spill] sm:$0xff] }
 0x61c   : > { %v2837_v55 = vmul.f32 1.442695, %v8148_v33  ;;  %2964 = vmatpush1.bf16.msra.mxu1 %v8149_v17  ;;  %v8150_v27 = vsub.f32 %v8105_v25, %v6539_v52  ;;  %v8151_v41 = vsub.f32 %v8106_v15, %v6539_v52  ;;  %v4207_v9 = vpop.eup %4206  ;;  %v2874_v6 = vadd.f32 %v6798_v40, %v2873_v43 }
 0x61d   : > { %2965 = vmatprep.subr.bf16.mxu1 %v2934_v2  ;;  %4226 = vpow2.f32 %v2829_v34  ;;  %v2895_v10 = vadd.f32 %v4191_v3, %v2894_v7  ;;  %v2942_v32 = vpack.c.bf16 %v4205_v22, %v4203_v56  ;;  %v4209_v39 = vpop.eup %4208  ;;  %v8153_v2 = vsub.f32 %v8152_v61, %v6539_v52 }
 0x61e   : > { %v2841_v44 = vmul.f32 1.442695, %v8150_v27  ;;  %v2845_v59 = vmul.f32 1.442695, %v8151_v41  ;;  %4228 = vpow2.f32 %v2833_v57  ;;  %v8154_v25 = vpack.c.bf16 %v6677_v38, %v6670_v28  ;;  %v4211_v60 = vpop.eup %4210 }
 0x61f   : > { %v2849_v8 = vmul.f32 1.442695, %v8153_v2  ;;  %v2875_v15 = vadd.f32 %v6805_v13, %v2874_v6  ;;  %4230 = vpow2.f32 %v2837_v55  ;;  %v2896_v4 = vadd.f32 %v4193_v31, %v2895_v10  ;;  %v4213_v34 = vpop.eup %4212 }
 0x620   : > { %2966 = vmatpush1.bf16.msra.mxu1 %v8154_v25  ;;  %v2944_v1 = vpack.c.bf16 %v4209_v39, %v4207_v9  ;;  %4232 = vpow2.f32 %v2841_v44  ;;  %v4215_v3 = vpop.eup %4214  ;;  %v2946_v52 = vpack.c.bf16 %v4213_v34, %v4211_v60  ;;  %v8155_v38 = vpack.c.bf16 %v6692_v62, %v6685_v42 }
 0x621   : > { %2967 = vmatprep.subr.bf16.mxu1 %v2936_v23  ;;  %v2876_v5 = vadd.f32 %v6813_v53, %v2875_v15  ;;  %4234 = vpow2.f32 %v2845_v59  ;;  %v2897_v12 = vadd.f32 %v4195_v48, %v2896_v4  ;;  %v4217_v57 = vpop.eup %4216  ;;  %v8156_v27 = vpack.c.bf16 %v6706_v29, %v6700_v51 }
 0x622   : > { %4236 = vpow2.f32 %v2849_v8  ;;  %v4219_v28 = vpop.eup %4218  ;;  %v2948_v23 = vpack.c.bf16 %v4217_v57, %v4215_v3  ;;  %v8158_v15 = vpack.c.bf16 %v6731_v36, %v6725_v11  ;;  %v8162_v11 = vpack.c.bf16 %v6770_v49, %v6761_v63 }
 0x623   : > { %v2877_v30 = vadd.f32 %v6820_v21, %v2876_v5  ;;  %v2898_v31 = vadd.f32 %v4197_v14, %v2897_v12  ;;  %v4221_v33 = vpop.eup %4220  ;;  %v8165_v63 = vpack.c.bf16 %v6820_v21, %v6813_v53  ;;  %v8171_v21 = vld [vmem:[#allocation50_spill] sm:$0xff]  ;;  %v8172_v53 = vld [vmem:[#allocation52_spill] sm:$0xff] }
 0x624   : > { %2968 = vmatpush1.bf16.msra.mxu1 %v8155_v38  ;;  %v4223_v55 = vpop.eup %4222  ;;  %v2950_v7 = vpack.c.bf16 %v4221_v33, %v4219_v28  ;;  %v8173_v38 = vld [vmem:[#allocation54_spill] sm:$0xff] }
 0x625   : > { %2969 = vmatprep.subr.bf16.mxu1 %v2938_v24  ;;  %v2878_v17 = vadd.f32 %v6828_v50, %v2877_v30  ;;  %v2899_v43 = vadd.f32 %v4199_v19, %v2898_v31  ;;  %v4225_v48 = vpop.eup %4224  ;;  %v8157_v19 = vpack.c.bf16 %v6719_v35, %v6712_v20  ;;  %v8159_v20 = vld [vmem:[#allocation26_spill] sm:$0xff]  ;;  %v8179_v30 = vld [vmem:[#allocation63_spill] sm:$0xff]  ;;  %v8180_v31 = vld [vmem:[#allocation65_spill] sm:$0xff] }
 0x626   : > { %v2952_v41 = vpack.c.bf16 %v4225_v48, %v4223_v55  ;;  %v8160_v35 = vpack.c.bf16 %v6742_v37, %v8159_v20  ;;  %v8163_v37 = vpack.c.bf16 %v6790_v54, %v6781_v16  ;;  %v8166_v16 = vpack.c.bf16 %v6836_v58, %v6828_v50  ;;  %v8175_v50 = vld [vmem:[#allocation60_spill] sm:$0xff] }
 0x627   : > { %v4227_v44 = vpop.eup %4226  ;;  %v2879_v62 = vadd.f32 %v6836_v58, %v2878_v17  ;;  %v2900_v42 = vadd.f32 %v4201_v47, %v2899_v43  ;;  %v8174_v58 = vld [vmem:[#allocation56_spill] sm:$0xff]  ;;  %v8184_v17 = vld [vmem:[#allocation73_spill] sm:$0xff]  ;;  %v8185_v43 = vld [vmem:[#allocation75_spill] sm:$0xff] }
 0x628   : > { %2970 = vmatpush1.bf16.msra.mxu1 %v8156_v27  ;;  %v4229_v14 = vpop.eup %4228  ;;  %v8188_v27 = vld [vmem:[#allocation81_spill] sm:$0xff]  ;;  %v8209_v20 = vld [vmem:[#allocation68_spill] sm:$0xff] }
 0x629   : > { %2971 = vmatprep.subr.bf16.mxu1 %v2940_v18  ;;  %v4231_v24 = vpop.eup %4230  ;;  %v2880_v59 = vadd.f32 %v6841_v26, %v2879_v62  ;;  %v2901_v6 = vadd.f32 %v4203_v56, %v2900_v42  ;;  %v2954_v10 = vpack.c.bf16 %v4229_v14, %v4227_v44  ;;  %v8190_v62 = vld [vmem:[#allocation85_spill] sm:$0xff]  ;;  %v8191_v42 = vld [vmem:[#allocation87_spill] sm:$0xff] }
 0x62a   : > { %v4233_v61 = vpop.eup %4232 }
 0x62b   : > { %v4235_v2 = vpop.eup %4234  ;;  %v6947_v29 = vadd.f32 %v6849_v45, %v2880_v59  ;;  %v2902_v51 = vadd.f32 %v4205_v22, %v2901_v6  ;;  %v2956_v47 = vpack.c.bf16 %v4233_v61, %v4231_v24  ;;  %v8161_v22 = vpack.c.bf16 %v6753_v0, %v6747_v46  ;;  %v8195_v59 = vld [vmem:[#allocation43_spill] sm:$0xff]  ;;  %v8196_v6 = vld [vmem:[#allocation45_spill] sm:$0xff] }
 0x62c   : > { %2972 = vmatpush1.bf16.msra.mxu1 %v8157_v19  ;;  %v4237_v18 = vpop.eup %4236  ;;  %v8164_v46 = vpack.c.bf16 %v6805_v13, %v6798_v40  ;;  %v8167_v40 = vpack.c.bf16 %v6849_v45, %v6841_v26  ;;  %v8168_v13 = vld [vmem:[#allocation44_spill] sm:$0xff]  ;;  %v8177_v26 = vld [vmem:[#allocation62_spill] sm:$0xff]  ;;  %v8178_v45 = vld [vmem:[#allocation25_spill] sm:$0xff] }
 0x62d   : > { %2973 = vmatprep.subr.bf16.mxu1 %v2942_v32  ;;  %v2903_v8 = vadd.f32 %v4207_v9, %v2902_v51  ;;  %v2958_v25 = vpack.c.bf16 %v4237_v18, %v4235_v2  ;;  %v8199_v19 = vld [vmem:[#allocation51_spill] sm:$0xff] }
 0x62e   : > { %v8201_v51 = vld [vmem:[#allocation55_spill] sm:$0xff] }
 0x62f   : > { %v2904_v56 = vadd.f32 %v4209_v39, %v2903_v8  ;;  %v8204_v8 = vld [vmem:[#allocation59_spill] sm:$0xff] }
 0x630   : > { %2974 = vmatpush1.bf16.msra.mxu1 %v8158_v15  ;;  %v8206_v15 = vld [vmem:[#allocation24_spill] sm:$0xff] }
 0x631   : > { %2975 = vmatprep.subr.bf16.mxu1 %v2944_v1  ;;  %v2905_v4 = vadd.f32 %v4211_v60, %v2904_v56  ;;  %v8207_v56 = vld [vmem:[#allocation64_spill] sm:$0xff] }
 0x633   : > { %v2906_v5 = vadd.f32 %v4213_v34, %v2905_v4  ;;  %v8208_v4 = vld [vmem:[#allocation66_spill] sm:$0xff] }
 0x634   : > { %2976 = vmatpush1.bf16.msra.mxu1 %v8160_v35  ;;  %v8210_v35 = vld [vmem:[#allocation70_spill] sm:$0xff] }
 0x635   : > { %2977 = vmatprep.subr.bf16.mxu1 %v2946_v52  ;;  %v2907_v12 = vadd.f32 %v4215_v3, %v2906_v5  ;;  %v8169_v52 = vld [vmem:[#allocation46_spill] sm:$0xff]  ;;  %v8211_v5 = vld [vmem:[#allocation72_spill] sm:$0xff] }
 0x637   : > { %v2908_v9 = vadd.f32 %v4217_v57, %v2907_v12  ;;  %v8170_v57 = vld [vmem:[#allocation48_spill] sm:$0xff]  ;;  %v8212_v12 = vld [vmem:[#allocation74_spill] sm:$0xff] }
 0x638   : > { %2978 = vmatpush1.bf16.msra.mxu1 %v8161_v22  ;;  %v2882_v22 = vrot.slane %v6947_v29, 4 }
 0x639   : > { %2979 = vmatprep.subr.bf16.mxu1 %v2948_v23  ;;  %v2909_v32 = vadd.f32 %v4219_v28, %v2908_v9  ;;  %v8176_v28 = vld [vmem:[#allocation57_spill] sm:$0xff]  ;;  %v8181_v23 = vld [vmem:[#allocation67_spill] sm:$0xff]  ;;  %v8213_v9 = vld [vmem:[#allocation76_spill] sm:$0xff] }
 0x63b   : > { %v2910_v36 = vadd.f32 %v4221_v33, %v2909_v32  ;;  %v8182_v33 = vld [vmem:[#allocation69_spill] sm:$0xff] }
 0x63c   : > { %2980 = vmatpush1.bf16.msra.mxu1 %v8162_v11  ;;  %v2883_v11 = vadd.f32 %v2882_v22, %v6947_v29  ;;  %v8219_v29 = vld [vmem:[#allocation88_spill] sm:$0xff] }
 0x63d   : > { %2981 = vmatprep.subr.bf16.mxu1 %v2950_v7  ;;  %v2911_v39 = vadd.f32 %v4223_v55, %v2910_v36  ;;  %v8183_v55 = vld [vmem:[#allocation71_spill] sm:$0xff]  ;;  %v8186_v7 = vld [vmem:[#allocation77_spill] sm:$0xff] }
 0x63f   : > { %v2912_v60 = vadd.f32 %v4225_v48, %v2911_v39  ;;  %v8187_v48 = vld [vmem:[#allocation79_spill] sm:$0xff]  ;;  %v8214_v39 = vld [vmem:[#allocation78_spill] sm:$0xff] }
 0x640   : > { %2982 = vmatpush1.bf16.msra.mxu1 %v8163_v37  ;;  %v2884_v37 = vrot.slane %v2883_v11, 2 }
 0x641   : > { %2983 = vmatprep.subr.bf16.mxu1 %v2952_v41  ;;  %v2913_v1 = vadd.f32 %v4227_v44, %v2912_v60  ;;  %v8189_v44 = vld [vmem:[#allocation83_spill] sm:$0xff]  ;;  %v8192_v41 = vld [vmem:[#allocation89_spill] sm:$0xff]  ;;  %v8215_v60 = vld [vmem:[#allocation80_spill] sm:$0xff] }
 0x643   : > { %v2914_v0 = vadd.f32 %v4229_v14, %v2913_v1  ;;  %v8193_v14 = vld [vmem:[#allocation91_spill] sm:$0xff] }
 0x644   : > { %2984 = vmatpush1.bf16.msra.mxu1 %v8164_v46  ;;  %v2885_v46 = vadd.f32 %v2884_v37, %v2883_v11 }
 0x645   : > { %2985 = vmatprep.subr.bf16.mxu1 %v2954_v10  ;;  %v2915_v34 = vadd.f32 %v4231_v24, %v2914_v0  ;;  %v8194_v24 = vld [vmem:[#allocation93_spill] sm:$0xff]  ;;  %v8197_v10 = vld [vmem:[#allocation47_spill] sm:$0xff] }
 0x647   : > { %v2916_v49 = vadd.f32 %v4233_v61, %v2915_v34  ;;  %v8198_v61 = vld [vmem:[#allocation49_spill] sm:$0xff]  ;;  %v8216_v34 = vld [vmem:[#allocation82_spill] sm:$0xff] }
 0x648   : > { %2986 = vmatpush1.bf16.msra.mxu1 %v8165_v63  ;;  %v2886_v63 = vrot.slane %v2885_v46, 1 }
 0x649   : > { %2987 = vmatprep.subr.bf16.mxu1 %v2956_v47  ;;  %v2917_v3 = vadd.f32 %v4235_v2, %v2916_v49  ;;  %v8200_v2 = vld [vmem:[#allocation53_spill] sm:$0xff]  ;;  %v8202_v47 = vld [vmem:[#allocation58_spill] sm:$0xff]  ;;  %v8217_v49 = vld [vmem:[#allocation84_spill] sm:$0xff] }
 0x64b   : > { %v2918_v54 = vadd.f32 %v4237_v18, %v2917_v3  ;;  %v8203_v18 = vld [vmem:[#allocation61_spill] sm:$0xff] }
 0x64c   : > { %2988 = vmatpush1.bf16.msra.mxu1 %v8166_v16  ;;  %v2887_v16 = vadd.f32 %v2886_v63, %v2885_v46 }
 0x64d   : > { %2989 = vmatprep.subr.bf16.mxu1 %v2958_v25  ;;  %v8205_v25 = vld [vmem:[#allocation42_spill] sm:$0xff]  ;;  %v2919_v32 = vrot.slane %v2918_v54, 4 }
 0x64e   : > { %4238 = vrcp.f32 %v2887_v16 }
 0x64f   : > { %v2920_v36 = vadd.f32 %v2919_v32, %v2918_v54  ;;  %v8220_v54 = vld [vmem:[#allocation90_spill] sm:$0xff] }
 0x650   : > { %2990 = vmatpush1.bf16.msra.mxu1 %v8167_v40 }
 0x651   : > { %v2921_v1 = vrot.slane %v2920_v36, 2 }
 0x653   : > { %2992 = vmatmul.mubr.bf16.vlgmr.msra.gmra.mrb[72].mxu1 %v8168_v13  ;;  %v2922_v0 = vadd.f32 %v2921_v1, %v2920_v36  ;;  %v8218_v13 = vld [vmem:[#allocation86_spill] sm:$0xff] }
 0x654   : > { %3001 = vmatprep.mubr.bf16.mxu1 %v8169_v52  ;;  %v8221_v52 = vld [vmem:[#allocation92_spill] sm:$0xff] }
 0x655   : > { %v2923_v3 = vrot.slane %v2922_v0, 1 }
 0x657   : > { %v2924_v40 = vadd.f32 %v2923_v3, %v2922_v0 }
 0x659   : > { %4240 = vrcp.f32 %v2924_v40 }
 0x65b   : > { %3002 = vmatmul.mubr.bf16.gmra.mrb[76].mxu1 %v8170_v57  ;;  %v7032_v57 = vpop.eup %4238 }
 0x65c   : > { %3011 = vmatprep.mubr.bf16.mxu1 %v8171_v21 }
 0x663   : > { %3012 = vmatmul.mubr.bf16.gmra.mrb[80].mxu1 %v8172_v53  ;;  %v7034_v53 = vpop.eup %4240 }
 0x664   : > { %3021 = vmatprep.mubr.bf16.mxu1 %v8173_v38 }
 0x66b   : > { %3022 = vmatmul.mubr.bf16.gmra.mrb[84].mxu1 %v8174_v58 }
 0x66c   : > { %3031 = vmatprep.mubr.bf16.mxu1 %v8175_v50 }
 0x673   : > { %3032 = vmatmul.mubr.bf16.gmra.mrb[88].mxu1 %v8176_v28 }
 0x674   : > { %3041 = vmatprep.mubr.bf16.mxu1 %v8177_v26 }
 0x67b   : > { %3042 = vmatmul.mubr.bf16.gmra.mrb[92].mxu1 %v8178_v45 }
 0x67c   : > { %3051 = vmatprep.mubr.bf16.mxu1 %v8179_v30 }
 0x683   : > { %3052 = vmatmul.mubr.bf16.gmra.mrb[96].mxu1 %v8180_v31  ;;  %v8222_v31 = vld [vmem:[#allocation94_spill] sm:$0xff] }
 0x684   : > { %3061 = vmatprep.mubr.bf16.mxu1 %v8181_v23  ;;  %v8223_v23 = vld [vmem:[#allocation95_spill] sm:$0xff] }
 0x68b   : > { %3062 = vmatmul.mubr.bf16.gmra.mrb[100].mxu1 %v8182_v33 }
 0x68c   : > { %3071 = vmatprep.mubr.bf16.mxu1 %v8183_v55 }
 0x693   : > { %3072 = vmatmul.mubr.bf16.gmra.mrb[104].mxu1 %v8184_v17 }
 0x694   : > { %3081 = vmatprep.mubr.bf16.mxu1 %v8185_v43 }
 0x69b   : > { %3082 = vmatmul.mubr.bf16.gmra.mrb[108].mxu1 %v8186_v7 }
 0x69c   : > { %3091 = vmatprep.mubr.bf16.mxu1 %v8187_v48 }
 0x6a3   : > { %3092 = vmatmul.mubr.bf16.gmra.mrb[112].mxu1 %v8188_v27 }
 0x6a4   : > { %3101 = vmatprep.mubr.bf16.mxu1 %v8189_v44 }
 0x6ab   : > { %3102 = vmatmul.mubr.bf16.gmra.mrb[116].mxu1 %v8190_v62  ;;  %v8224_v62 = vld [vmem:[#allocation96_spill] sm:$0xff] }
 0x6ac   : > { %3111 = vmatprep.mubr.bf16.mxu1 %v8191_v42  ;;  %v8225_v42 = vld [vmem:[#allocation97_spill] sm:$0xff] }
 0x6b3   : > { %3112 = vmatmul.mubr.bf16.gmra.mrb[120].mxu1 %v8192_v41 }
 0x6b4   : > { %3121 = vmatprep.mubr.bf16.mxu1 %v8193_v14 }
 0x6bb   : > { %3122 = vmatmul.mubr.bf16.gmra.mrb[124].mxu1 %v8194_v24 }
 0x6bc   : > { %3131 = vmatprep.mubr.bf16.mxu1 %v8195_v59 }
 0x6c3   : > { %3132 = vmatmul.mubr.bf16.gmra.mrb[128].mxu1 %v8196_v6 }
 0x6c4   : > { %3141 = vmatprep.mubr.bf16.mxu1 %v8197_v10 }
 0x6cb   : > { %3142 = vmatmul.mubr.bf16.gmra.mrb[132].mxu1 %v8198_v61 }
 0x6cc   : > { %3151 = vmatprep.mubr.bf16.mxu1 %v8199_v19 }
 0x6d3   : > { %3152 = vmatmul.mubr.bf16.gmra.mrb[136].mxu1 %v8200_v2  ;;  %v8226_v2 = vld [vmem:[#allocation98_spill] sm:$0xff] }
 0x6d4   : > { %3161 = vmatprep.mubr.bf16.mxu1 %v8201_v51  ;;  %v8227_v51 = vld [vmem:[#allocation99_spill] sm:$0xff] }
 0x6db   : > { %3162 = vmatmul.mubr.bf16.gmra.mrb[140].mxu1 %v8202_v47 }
 0x6dc   : > { %3171 = vmatprep.mubr.bf16.mxu1 %v8203_v18 }
 0x6e3   : > { %3172 = vmatmul.mubr.bf16.gmra.mrb[144].mxu1 %v8204_v8 }
 0x6e4   : > { %3181 = vmatprep.mubr.bf16.mxu1 %v8205_v25 }
 0x6eb   : > { %3182 = vmatmul.mubr.bf16.gmra.mrb[148].mxu1 %v8206_v15 }
 0x6ec   : > { %3191 = vmatprep.mubr.bf16.mxu1 %v8207_v56 }
 0x6f3   : > { %3192 = vmatmul.mubr.bf16.gmra.mrb[152].mxu1 %v8208_v4 }
 0x6f4   : > { %3201 = vmatprep.mubr.bf16.mxu1 %v8209_v20 }
 0x6fb   : > { %3202 = vmatmul.mubr.bf16.gmra.mrb[156].mxu1 %v8210_v35  ;;  %v8228_v35 = vld [vmem:[#allocation100_spill] sm:$0xff] }
 0x6fc   : > { %3211 = vmatprep.mubr.bf16.mxu1 %v8211_v5  ;;  %v8229_v5 = vld [vmem:[#allocation101_spill] sm:$0xff] }
 0x703   : > { %3212 = vmatmul.mubr.bf16.gmra.mrb[160].mxu1 %v8212_v12 }
 0x704   : > { %3221 = vmatprep.mubr.bf16.mxu1 %v8213_v9 }
 0x70b   : > { %3222 = vmatmul.mubr.bf16.gmra.mrb[164].mxu1 %v8214_v39 }
 0x70c   : > { %3231 = vmatprep.mubr.bf16.mxu1 %v8215_v60  ;;  %v8230_v60 = vld [vmem:[#allocation102_spill] sm:$0xff] }
 0x713   : > { %3232 = vmatmul.mubr.bf16.gmra.mrb[168].mxu1 %v8216_v34 }
 0x714   : > { %3241 = vmatprep.mubr.bf16.mxu1 %v8217_v49 }
 0x71b   : > { %3242 = vmatmul.mubr.bf16.gmra.mrb[172].mxu1 %v8218_v13 }
 0x71c   : > { %3251 = vmatprep.mubr.bf16.mxu1 %v8219_v29 }
 0x723   : > { %3252 = vmatmul.mubr.bf16.gmra.mrb[176].mxu1 %v8220_v54 }
 0x724   : > { %3261 = vmatprep.mubr.bf16.mxu1 %v8221_v52 }
 0x726   : > { %v2993_v21 = vpop.f32.mrb[72].mxu1 }
 0x727   : > { %v3312_v38 = vmul.f32 %v7032_v57, %v2993_v21  ;;  %v2995_v58 = vpop.f32.mrb[73].mxu1 }
 0x728   : > { %v3313_v50 = vmul.f32 %v7034_v53, %v2995_v58  ;;  %v2997_v28 = vpop.f32.mrb[74].mxu1 }
 0x729   : > { %3440 = vst [vmem:[%s7039_s3] sm:$0xff] %v3312_v38  ;;  %v3314_v26 = vmul.f32 %v7032_v57, %v2997_v28  ;;  %v2999_v45 = vpop.f32.mrb[75].mxu1 }
 0x72a   : > { %3441 = vst [vmem:[%s7039_s3 + $0x8] sm:$0xff] %v3313_v50  ;;  %v3315_v30 = vmul.f32 %v7034_v53, %v2999_v45 }
 0x72b   : > { %3442 = vst [vmem:[%s7039_s3 + $0x10] sm:$0xff] %v3314_v26  ;;  %3262 = vmatmul.mubr.bf16.gmra.mrb[180].mxu1 %v8222_v31 }
 0x72c   : > { %3443 = vst [vmem:[%s7039_s3 + $0x18] sm:$0xff] %v3315_v30  ;;  %3271 = vmatprep.mubr.bf16.mxu1 %v8223_v23 }
 0x72e   : > { %v3003_v33 = vpop.f32.mrb[76].mxu1 }
 0x72f   : > { %v3316_v55 = vmul.f32 %v7032_v57, %v3003_v33  ;;  %v3005_v17 = vpop.f32.mrb[77].mxu1 }
 0x730   : > { %v3317_v43 = vmul.f32 %v7034_v53, %v3005_v17  ;;  %v3007_v7 = vpop.f32.mrb[78].mxu1 }
 0x731   : > { %3444 = vst [vmem:[%s7039_s3 + $0x20] sm:$0xff] %v3316_v55  ;;  %v3318_v48 = vmul.f32 %v7032_v57, %v3007_v7  ;;  %v3009_v27 = vpop.f32.mrb[79].mxu1 }
 0x732   : > { %3445 = vst [vmem:[%s7039_s3 + $0x28] sm:$0xff] %v3317_v43  ;;  %v3319_v44 = vmul.f32 %v7034_v53, %v3009_v27 }
 0x733   : > { %3446 = vst [vmem:[%s7039_s3 + $0x30] sm:$0xff] %v3318_v48  ;;  %3272 = vmatmul.mubr.bf16.gmra.mrb[184].mxu1 %v8224_v62 }
 0x734   : > { %3447 = vst [vmem:[%s7039_s3 + $0x38] sm:$0xff] %v3319_v44  ;;  %3281 = vmatprep.mubr.bf16.mxu1 %v8225_v42 }
 0x736   : > { %v3013_v41 = vpop.f32.mrb[80].mxu1 }
 0x737   : > { %v3320_v14 = vmul.f32 %v7032_v57, %v3013_v41  ;;  %v3015_v24 = vpop.f32.mrb[81].mxu1 }
 0x738   : > { %v3321_v59 = vmul.f32 %v7034_v53, %v3015_v24  ;;  %v3017_v6 = vpop.f32.mrb[82].mxu1 }
 0x739   : > { %3448 = vst [vmem:[%s7039_s3 + $0x40] sm:$0xff] %v3320_v14  ;;  %v3322_v10 = vmul.f32 %v7032_v57, %v3017_v6  ;;  %v3019_v61 = vpop.f32.mrb[83].mxu1 }
 0x73a   : > { %3449 = vst [vmem:[%s7039_s3 + $0x48] sm:$0xff] %v3321_v59  ;;  %v3323_v19 = vmul.f32 %v7034_v53, %v3019_v61 }
 0x73b   : > { %3450 = vst [vmem:[%s7039_s3 + $0x50] sm:$0xff] %v3322_v10  ;;  %3282 = vmatmul.mubr.bf16.gmra.mrb[188].mxu1 %v8226_v2 }
 0x73c   : > { %3451 = vst [vmem:[%s7039_s3 + $0x58] sm:$0xff] %v3323_v19  ;;  %3291 = vmatprep.mubr.bf16.mxu1 %v8227_v51 }
 0x73e   : > { %v3023_v47 = vpop.f32.mrb[84].mxu1 }
 0x73f   : > { %v3324_v18 = vmul.f32 %v7032_v57, %v3023_v47  ;;  %v3025_v8 = vpop.f32.mrb[85].mxu1 }
 0x740   : > { %v3325_v25 = vmul.f32 %v7034_v53, %v3025_v8  ;;  %v3027_v15 = vpop.f32.mrb[86].mxu1 }
 0x741   : > { %3452 = vst [vmem:[%s7039_s3 + $0x60] sm:$0xff] %v3324_v18  ;;  %v3326_v56 = vmul.f32 %v7032_v57, %v3027_v15  ;;  %v3029_v4 = vpop.f32.mrb[87].mxu1 }
 0x742   : > { %3453 = vst [vmem:[%s7039_s3 + $0x68] sm:$0xff] %v3325_v25  ;;  %v3327_v20 = vmul.f32 %v7034_v53, %v3029_v4 }
 0x743   : > { %3454 = vst [vmem:[%s7039_s3 + $0x70] sm:$0xff] %v3326_v56  ;;  %3292 = vmatmul.mubr.bf16.gmra.mrb[192].mxu1 %v8228_v35 }
 0x744   : > { %3455 = vst [vmem:[%s7039_s3 + $0x78] sm:$0xff] %v3327_v20  ;;  %3301 = vmatprep.mubr.bf16.mxu1 %v8229_v5 }
 0x746   : > { %v3033_v12 = vpop.f32.mrb[88].mxu1 }
 0x747   : > { %v3328_v22 = vmul.f32 %v7032_v57, %v3033_v12  ;;  %v3035_v9 = vpop.f32.mrb[89].mxu1 }
 0x748   : > { %v3329_v32 = vmul.f32 %v7034_v53, %v3035_v9  ;;  %v3037_v11 = vpop.f32.mrb[90].mxu1 }
 0x749   : > { %3456 = vst [vmem:[%s7039_s3 + $0x80] sm:$0xff] %v3328_v22  ;;  %v3330_v36 = vmul.f32 %v7032_v57, %v3037_v11  ;;  %v3039_v39 = vpop.f32.mrb[91].mxu1 }
 0x74a   : > { %3457 = vst [vmem:[%s7039_s3 + $0x88] sm:$0xff] %v3329_v32  ;;  %v3331_v37 = vmul.f32 %v7034_v53, %v3039_v39 }
 0x74b   : > { %3458 = vst [vmem:[%s7039_s3 + $0x90] sm:$0xff] %v3330_v36  ;;  %3302 = vmatmul.mubr.bf16.gmra.mrb[196].mxu1 %v8230_v60 }
 0x74c   : > { %3459 = vst [vmem:[%s7039_s3 + $0x98] sm:$0xff] %v3331_v37 }
 0x74e   : > { %v3043_v1 = vpop.f32.mrb[92].mxu1 }
 0x74f   : > { %v3332_v46 = vmul.f32 %v7032_v57, %v3043_v1  ;;  %v3045_v0 = vpop.f32.mrb[93].mxu1 }
 0x750   : > { %v3333_v34 = vmul.f32 %v7034_v53, %v3045_v0  ;;  %v3047_v63 = vpop.f32.mrb[94].mxu1 }
 0x751   : > { %3460 = vst [vmem:[%s7039_s3 + $0xa0] sm:$0xff] %v3332_v46  ;;  %v3334_v49 = vmul.f32 %v7032_v57, %v3047_v63  ;;  %v3049_v3 = vpop.f32.mrb[95].mxu1 }
 0x752   : > { %3461 = vst [vmem:[%s7039_s3 + $0xa8] sm:$0xff] %v3333_v34  ;;  %v3335_v16 = vmul.f32 %v7034_v53, %v3049_v3 }
 0x753   : > { %3462 = vst [vmem:[%s7039_s3 + $0xb0] sm:$0xff] %v3334_v49 }
 0x754   : > { %3463 = vst [vmem:[%s7039_s3 + $0xb8] sm:$0xff] %v3335_v16 }
 0x756   : > { %v3053_v40 = vpop.f32.mrb[96].mxu1 }
 0x757   : > { %v3336_v13 = vmul.f32 %v7032_v57, %v3053_v40  ;;  %v3055_v29 = vpop.f32.mrb[97].mxu1 }
 0x758   : > { %v3337_v54 = vmul.f32 %v7034_v53, %v3055_v29  ;;  %v3057_v52 = vpop.f32.mrb[98].mxu1 }
 0x759   : > { %3464 = vst [vmem:[%s7039_s3 + $0xc0] sm:$0xff] %v3336_v13  ;;  %v3338_v21 = vmul.f32 %v7032_v57, %v3057_v52  ;;  %v3059_v38 = vpop.f32.mrb[99].mxu1 }
 0x75a   : > { %3465 = vst [vmem:[%s7039_s3 + $0xc8] sm:$0xff] %v3337_v54  ;;  %v3339_v58 = vmul.f32 %v7034_v53, %v3059_v38 }
 0x75b   : > { %3466 = vst [vmem:[%s7039_s3 + $0xd0] sm:$0xff] %v3338_v21 }
 0x75c   : > { %3467 = vst [vmem:[%s7039_s3 + $0xd8] sm:$0xff] %v3339_v58 }
 0x75e   : > { %v3063_v50 = vpop.f32.mrb[100].mxu1 }
 0x75f   : > { %v3340_v28 = vmul.f32 %v7032_v57, %v3063_v50  ;;  %v3065_v26 = vpop.f32.mrb[101].mxu1 }
 0x760   : > { %v3341_v45 = vmul.f32 %v7034_v53, %v3065_v26  ;;  %v3067_v30 = vpop.f32.mrb[102].mxu1 }
 0x761   : > { %3468 = vst [vmem:[%s7039_s3 + $0xe0] sm:$0xff] %v3340_v28  ;;  %v3342_v31 = vmul.f32 %v7032_v57, %v3067_v30  ;;  %v3069_v23 = vpop.f32.mrb[103].mxu1 }
 0x762   : > { %3469 = vst [vmem:[%s7039_s3 + $0xe8] sm:$0xff] %v3341_v45  ;;  %v3343_v33 = vmul.f32 %v7034_v53, %v3069_v23 }
 0x763   : > { %3470 = vst [vmem:[%s7039_s3 + $0xf0] sm:$0xff] %v3342_v31 }
 0x764   : > { %3471 = vst [vmem:[%s7039_s3 + $0xf8] sm:$0xff] %v3343_v33 }
 0x766   : > { %v3073_v55 = vpop.f32.mrb[104].mxu1 }
 0x767   : > { %v3344_v17 = vmul.f32 %v7032_v57, %v3073_v55  ;;  %v3075_v43 = vpop.f32.mrb[105].mxu1 }
 0x768   : > { %v3345_v7 = vmul.f32 %v7034_v53, %v3075_v43  ;;  %v3077_v48 = vpop.f32.mrb[106].mxu1  ;;  %v1967_v43 = vld [vmem:[%s7177_s8] sm:$0xff] }
 0x769   : > { %3472 = vst [vmem:[%s7039_s3 + $0x100] sm:$0xff] %v3344_v17  ;;  %v3346_v27 = vmul.f32 %v7032_v57, %v3077_v48  ;;  %v3079_v44 = vpop.f32.mrb[107].mxu1  ;;  %v1969_v48 = vld [vmem:[%s7177_s8 + $0x10] sm:$0xff]  ;;  %2095 = vst [vmem:[%s6060_s26 + $0x400] sm:$0xff] %v1967_v43 }
 0x76a   : > { %3473 = vst [vmem:[%s7039_s3 + $0x108] sm:$0xff] %v3345_v7  ;;  %v3347_v62 = vmul.f32 %v7034_v53, %v3079_v44  ;;  %v1968_v7 = vld [vmem:[%s7177_s8 + $0x8] sm:$0xff]  ;;  %v1970_v44 = vld [vmem:[%s7177_s8 + $0x18] sm:$0xff]  ;;  %2097 = vst [vmem:[%s6060_s26 + $0x410] sm:$0xff] %v1969_v48 }
 0x76b   : > { %3474 = vst [vmem:[%s7039_s3 + $0x110] sm:$0xff] %v3346_v27  ;;  %2096 = vst [vmem:[%s6060_s26 + $0x408] sm:$0xff] %v1968_v7  ;;  %v2013_v43 = vld [vmem:[%s7177_s8 + $0x170] sm:$0xff]  ;;  %v2014_v7 = vld [vmem:[%s7177_s8 + $0x178] sm:$0xff] }
 0x76c   : > { %3475 = vst [vmem:[%s7039_s3 + $0x118] sm:$0xff] %v3347_v62  ;;  %v1971_v62 = vld [vmem:[%s7177_s8 + $0x20] sm:$0xff]  ;;  %2098 = vst [vmem:[%s6060_s26 + $0x418] sm:$0xff] %v1970_v44  ;;  %v2017_v44 = vld [vmem:[%s7177_s8 + $0x190] sm:$0xff] }
 0x76d   : > { %2099 = vst [vmem:[%s6060_s26 + $0x420] sm:$0xff] %v1971_v62  ;;  %v2015_v48 = vld [vmem:[%s7177_s8 + $0x180] sm:$0xff]  ;;  %2141 = vst [vmem:[%s6060_s26 + $0x570] sm:$0xff] %v2013_v43 }
 0x76e   : > { %v3083_v42 = vpop.f32.mrb[108].mxu1  ;;  %2142 = vst [vmem:[%s6060_s26 + $0x578] sm:$0xff] %v2014_v7  ;;  %2143 = vst [vmem:[%s6060_s26 + $0x580] sm:$0xff] %v2015_v48  ;;  %v2059_v43 = vld [vmem:[%s7177_s8 + $0x2e0] sm:$0xff]  ;;  %v2060_v7 = vld [vmem:[%s7177_s8 + $0x2e8] sm:$0xff] }
 0x76f   : > { %v3348_v41 = vmul.f32 %v7032_v57, %v3083_v42  ;;  %v3085_v14 = vpop.f32.mrb[109].mxu1  ;;  %v1972_v42 = vld [vmem:[%s7177_s8 + $0x28] sm:$0xff]  ;;  %2145 = vst [vmem:[%s6060_s26 + $0x590] sm:$0xff] %v2017_v44  ;;  %v2061_v48 = vld [vmem:[%s7177_s8 + $0x2f0] sm:$0xff]  ;;  %2187 = vst [vmem:[%s6060_s26 + $0x6e0] sm:$0xff] %v2059_v43 }
 0x770   : > { %v3349_v24 = vmul.f32 %v7034_v53, %v3085_v14  ;;  %v3087_v59 = vpop.f32.mrb[110].mxu1  ;;  %2100 = vst [vmem:[%s6060_s26 + $0x428] sm:$0xff] %v1972_v42  ;;  %v2018_v42 = vld [vmem:[%s7177_s8 + $0x198] sm:$0xff]  ;;  %v2063_v44 = vld [vmem:[%s7177_s8 + $0x300] sm:$0xff]  ;;  %2188 = vst [vmem:[%s6060_s26 + $0x6e8] sm:$0xff] %v2060_v7 }
 0x771   : > { %3476 = vst [vmem:[%s7039_s3 + $0x120] sm:$0xff] %v3348_v41  ;;  %v3350_v6 = vmul.f32 %v7032_v57, %v3087_v59  ;;  %v3089_v10 = vpop.f32.mrb[111].mxu1  ;;  %v1974_v59 = vld [vmem:[%s7177_s8 + $0x38] sm:$0xff]  ;;  %2146 = vst [vmem:[%s6060_s26 + $0x598] sm:$0xff] %v2018_v42  ;;  %v2065_v42 = vld [vmem:[%s7177_s8 + $0x310] sm:$0xff] }
 0x772   : > { %3477 = vst [vmem:[%s7039_s3 + $0x128] sm:$0xff] %v3349_v24  ;;  %v3351_v61 = vmul.f32 %v7034_v53, %v3089_v10  ;;  %v1973_v24 = vld [vmem:[%s7177_s8 + $0x30] sm:$0xff]  ;;  %2102 = vst [vmem:[%s6060_s26 + $0x438] sm:$0xff] %v1974_v59 }
 0x773   : > { %3478 = vst [vmem:[%s7039_s3 + $0x130] sm:$0xff] %v3350_v6  ;;  %v1975_v6 = vld [vmem:[%s7177_s8 + $0x40] sm:$0xff]  ;;  %2101 = vst [vmem:[%s6060_s26 + $0x430] sm:$0xff] %v1973_v24 }
 0x774   : > { %3479 = vst [vmem:[%s7039_s3 + $0x138] sm:$0xff] %v3351_v61  ;;  %2103 = vst [vmem:[%s6060_s26 + $0x440] sm:$0xff] %v1975_v6  ;;  %v2021_v6 = vld [vmem:[%s7177_s8 + $0x1b0] sm:$0xff] }
 0x775   : > { %2149 = vst [vmem:[%s6060_s26 + $0x5b0] sm:$0xff] %v2021_v6  ;;  %2189 = vst [vmem:[%s6060_s26 + $0x6f0] sm:$0xff] %v2061_v48 }
 0x776   : > { %v3093_v19 = vpop.f32.mrb[112].mxu1  ;;  %2191 = vst [vmem:[%s6060_s26 + $0x700] sm:$0xff] %v2063_v44  ;;  %2193 = vst [vmem:[%s6060_s26 + $0x710] sm:$0xff] %v2065_v42 }
 0x777   : > { %v3352_v2 = vmul.f32 %v7032_v57, %v3093_v19  ;;  %v3095_v51 = vpop.f32.mrb[113].mxu1  ;;  %v1976_v19 = vld [vmem:[%s7177_s8 + $0x48] sm:$0xff] }
 0x778   : > { %v3353_v47 = vmul.f32 %v7034_v53, %v3095_v51  ;;  %v3097_v18 = vpop.f32.mrb[114].mxu1  ;;  %v1978_v51 = vld [vmem:[%s7177_s8 + $0x58] sm:$0xff]  ;;  %2104 = vst [vmem:[%s6060_s26 + $0x448] sm:$0xff] %v1976_v19 }
 0x779   : > { %3480 = vst [vmem:[%s7039_s3 + $0x140] sm:$0xff] %v3352_v2  ;;  %v3354_v8 = vmul.f32 %v7032_v57, %v3097_v18  ;;  %v3099_v25 = vpop.f32.mrb[115].mxu1  ;;  %v1977_v2 = vld [vmem:[%s7177_s8 + $0x50] sm:$0xff]  ;;  %2106 = vst [vmem:[%s6060_s26 + $0x458] sm:$0xff] %v1978_v51  ;;  %v2024_v51 = vld [vmem:[%s7177_s8 + $0x1c8] sm:$0xff] }
 0x77a   : > { %3481 = vst [vmem:[%s7039_s3 + $0x148] sm:$0xff] %v3353_v47  ;;  %v3355_v15 = vmul.f32 %v7034_v53, %v3099_v25  ;;  %v1980_v25 = vld [vmem:[%s7177_s8 + $0x68] sm:$0xff]  ;;  %2105 = vst [vmem:[%s6060_s26 + $0x450] sm:$0xff] %v1977_v2 }
 0x77b   : > { %3482 = vst [vmem:[%s7039_s3 + $0x150] sm:$0xff] %v3354_v8  ;;  %v1979_v8 = vld [vmem:[%s7177_s8 + $0x60] sm:$0xff]  ;;  %2108 = vst [vmem:[%s6060_s26 + $0x468] sm:$0xff] %v1980_v25 }
 0x77c   : > { %3483 = vst [vmem:[%s7039_s3 + $0x158] sm:$0xff] %v3355_v15  ;;  %v1981_v15 = vld [vmem:[%s7177_s8 + $0x70] sm:$0xff]  ;;  %2107 = vst [vmem:[%s6060_s26 + $0x460] sm:$0xff] %v1979_v8 }
 0x77d   : > { %2109 = vst [vmem:[%s6060_s26 + $0x470] sm:$0xff] %v1981_v15  ;;  %v2027_v15 = vld [vmem:[%s7177_s8 + $0x1e0] sm:$0xff]  ;;  %2152 = vst [vmem:[%s6060_s26 + $0x5c8] sm:$0xff] %v2024_v51 }
 0x77e   : > { %v3103_v56 = vpop.f32.mrb[116].mxu1  ;;  %2155 = vst [vmem:[%s6060_s26 + $0x5e0] sm:$0xff] %v2027_v15 }
 0x77f   : > { %v3356_v4 = vmul.f32 %v7032_v57, %v3103_v56  ;;  %v3105_v20 = vpop.f32.mrb[117].mxu1 }
 0x780   : > { %v3357_v35 = vmul.f32 %v7034_v53, %v3105_v20  ;;  %v3107_v5 = vpop.f32.mrb[118].mxu1  ;;  %v1983_v20 = vld [vmem:[%s7177_s8 + $0x80] sm:$0xff] }
 0x781   : > { %3484 = vst [vmem:[%s7039_s3 + $0x160] sm:$0xff] %v3356_v4  ;;  %v3358_v12 = vmul.f32 %v7032_v57, %v3107_v5  ;;  %v3109_v22 = vpop.f32.mrb[119].mxu1  ;;  %v1982_v4 = vld [vmem:[%s7177_s8 + $0x78] sm:$0xff]  ;;  %v1985_v5 = vld [vmem:[%s7177_s8 + $0x90] sm:$0xff]  ;;  %2111 = vst [vmem:[%s6060_s26 + $0x480] sm:$0xff] %v1983_v20 }
 0x782   : > { %3485 = vst [vmem:[%s7039_s3 + $0x168] sm:$0xff] %v3357_v35  ;;  %v3359_v9 = vmul.f32 %v7034_v53, %v3109_v22  ;;  %v1984_v35 = vld [vmem:[%s7177_s8 + $0x88] sm:$0xff]  ;;  %v1987_v22 = vld [vmem:[%s7177_s8 + $0xa0] sm:$0xff]  ;;  %2110 = vst [vmem:[%s6060_s26 + $0x478] sm:$0xff] %v1982_v4 }
 0x783   : > { %3486 = vst [vmem:[%s7039_s3 + $0x170] sm:$0xff] %v3358_v12  ;;  %v1986_v12 = vld [vmem:[%s7177_s8 + $0x98] sm:$0xff]  ;;  %2112 = vst [vmem:[%s6060_s26 + $0x488] sm:$0xff] %v1984_v35  ;;  %v2029_v4 = vld [vmem:[%s7177_s8 + $0x1f0] sm:$0xff] }
 0x784   : > { %3487 = vst [vmem:[%s7039_s3 + $0x178] sm:$0xff] %v3359_v9  ;;  %v1988_v9 = vld [vmem:[%s7177_s8 + $0xa8] sm:$0xff]  ;;  %2113 = vst [vmem:[%s6060_s26 + $0x490] sm:$0xff] %v1985_v5  ;;  %v2030_v35 = vld [vmem:[%s7177_s8 + $0x1f8] sm:$0xff] }
 0x785   : > { %2114 = vst [vmem:[%s6060_s26 + $0x498] sm:$0xff] %v1986_v12  ;;  %2115 = vst [vmem:[%s6060_s26 + $0x4a0] sm:$0xff] %v1987_v22  ;;  %v2031_v5 = vld [vmem:[%s7177_s8 + $0x200] sm:$0xff]  ;;  %v2032_v12 = vld [vmem:[%s7177_s8 + $0x208] sm:$0xff] }
 0x786   : > { %v3113_v32 = vpop.f32.mrb[120].mxu1  ;;  %2116 = vst [vmem:[%s6060_s26 + $0x4a8] sm:$0xff] %v1988_v9  ;;  %2157 = vst [vmem:[%s6060_s26 + $0x5f0] sm:$0xff] %v2029_v4  ;;  %v2033_v22 = vld [vmem:[%s7177_s8 + $0x210] sm:$0xff]  ;;  %v2034_v9 = vld [vmem:[%s7177_s8 + $0x218] sm:$0xff] }
 0x787   : > { %v3360_v11 = vmul.f32 %v7032_v57, %v3113_v32  ;;  %v3115_v36 = vpop.f32.mrb[121].mxu1  ;;  %v1989_v32 = vld [vmem:[%s7177_s8 + $0xb0] sm:$0xff]  ;;  %2158 = vst [vmem:[%s6060_s26 + $0x5f8] sm:$0xff] %v2030_v35  ;;  %2159 = vst [vmem:[%s6060_s26 + $0x600] sm:$0xff] %v2031_v5  ;;  %v2075_v4 = vld [vmem:[%s7177_s8 + $0x360] sm:$0xff] }
 0x788   : > { %v3361_v39 = vmul.f32 %v7034_v53, %v3115_v36  ;;  %v3117_v37 = vpop.f32.mrb[122].mxu1  ;;  %v1991_v36 = vld [vmem:[%s7177_s8 + $0xc0] sm:$0xff]  ;;  %2117 = vst [vmem:[%s6060_s26 + $0x4b0] sm:$0xff] %v1989_v32  ;;  %2160 = vst [vmem:[%s6060_s26 + $0x608] sm:$0xff] %v2032_v12  ;;  %v2077_v35 = vld [vmem:[%s7177_s8 + $0x370] sm:$0xff] }
 0x789   : > { %3488 = vst [vmem:[%s7039_s3 + $0x180] sm:$0xff] %v3360_v11  ;;  %v3362_v60 = vmul.f32 %v7032_v57, %v3117_v37  ;;  %v3119_v1 = vpop.f32.mrb[123].mxu1  ;;  %v1990_v11 = vld [vmem:[%s7177_s8 + $0xb8] sm:$0xff]  ;;  %v1993_v37 = vld [vmem:[%s7177_s8 + $0xd0] sm:$0xff]  ;;  %2119 = vst [vmem:[%s6060_s26 + $0x4c0] sm:$0xff] %v1991_v36 }
 0x78a   : > { %3489 = vst [vmem:[%s7039_s3 + $0x188] sm:$0xff] %v3361_v39  ;;  %v3363_v46 = vmul.f32 %v7034_v53, %v3119_v1  ;;  %v1992_v39 = vld [vmem:[%s7177_s8 + $0xc8] sm:$0xff]  ;;  %2118 = vst [vmem:[%s6060_s26 + $0x4b8] sm:$0xff] %v1990_v11  ;;  %v1994_v1 = vld [vmem:[%s7177_s8 + $0xd8] sm:$0xff] }
 0x78b   : > { %3490 = vst [vmem:[%s7039_s3 + $0x190] sm:$0xff] %v3362_v60  ;;  %2120 = vst [vmem:[%s6060_s26 + $0x4c8] sm:$0xff] %v1992_v39  ;;  %v2035_v32 = vld [vmem:[%s7177_s8 + $0x220] sm:$0xff]  ;;  %v2036_v11 = vld [vmem:[%s7177_s8 + $0x228] sm:$0xff] }
 0x78c   : > { %3491 = vst [vmem:[%s7039_s3 + $0x198] sm:$0xff] %v3363_v46  ;;  %v1995_v46 = vld [vmem:[%s7177_s8 + $0xe0] sm:$0xff]  ;;  %2121 = vst [vmem:[%s6060_s26 + $0x4d0] sm:$0xff] %v1993_v37  ;;  %v2037_v36 = vld [vmem:[%s7177_s8 + $0x230] sm:$0xff] }
 0x78d   : > { %2122 = vst [vmem:[%s6060_s26 + $0x4d8] sm:$0xff] %v1994_v1  ;;  %2123 = vst [vmem:[%s6060_s26 + $0x4e0] sm:$0xff] %v1995_v46  ;;  %v2038_v39 = vld [vmem:[%s7177_s8 + $0x238] sm:$0xff]  ;;  %v2039_v37 = vld [vmem:[%s7177_s8 + $0x240] sm:$0xff] }
 0x78e   : > { %v3123_v0 = vpop.f32.mrb[124].mxu1  ;;  %2161 = vst [vmem:[%s6060_s26 + $0x610] sm:$0xff] %v2033_v22  ;;  %2162 = vst [vmem:[%s6060_s26 + $0x618] sm:$0xff] %v2034_v9  ;;  %v2041_v1 = vld [vmem:[%s7177_s8 + $0x250] sm:$0xff]  ;;  %v2078_v12 = vld [vmem:[%s7177_s8 + $0x378] sm:$0xff] }
 0x78f   : > { %v3364_v34 = vmul.f32 %v7032_v57, %v3123_v0  ;;  %v3125_v63 = vpop.f32.mrb[125].mxu1  ;;  %v1996_v0 = vld [vmem:[%s7177_s8 + $0xe8] sm:$0xff]  ;;  %2163 = vst [vmem:[%s6060_s26 + $0x620] sm:$0xff] %v2035_v32  ;;  %2164 = vst [vmem:[%s6060_s26 + $0x628] sm:$0xff] %v2036_v11  ;;  %v2079_v22 = vld [vmem:[%s7177_s8 + $0x380] sm:$0xff] }
 0x790   : > { %v3365_v49 = vmul.f32 %v7034_v53, %v3125_v63  ;;  %v3127_v3 = vpop.f32.mrb[126].mxu1  ;;  %2124 = vst [vmem:[%s6060_s26 + $0x4e8] sm:$0xff] %v1996_v0  ;;  %2165 = vst [vmem:[%s6060_s26 + $0x630] sm:$0xff] %v2037_v36  ;;  %v2042_v0 = vld [vmem:[%s7177_s8 + $0x258] sm:$0xff]  ;;  %v2080_v9 = vld [vmem:[%s7177_s8 + $0x388] sm:$0xff] }
 0x791   : > { %3492 = vst [vmem:[%s7039_s3 + $0x1a0] sm:$0xff] %v3364_v34  ;;  %v3366_v16 = vmul.f32 %v7032_v57, %v3127_v3  ;;  %v3129_v40 = vpop.f32.mrb[127].mxu1  ;;  %v1998_v3 = vld [vmem:[%s7177_s8 + $0xf8] sm:$0xff]  ;;  %2166 = vst [vmem:[%s6060_s26 + $0x638] sm:$0xff] %v2038_v39  ;;  %v2081_v32 = vld [vmem:[%s7177_s8 + $0x390] sm:$0xff] }
 0x792   : > { %3493 = vst [vmem:[%s7039_s3 + $0x1a8] sm:$0xff] %v3365_v49  ;;  %v3367_v13 = vmul.f32 %v7034_v53, %v3129_v40  ;;  %v1997_v49 = vld [vmem:[%s7177_s8 + $0xf0] sm:$0xff]  ;;  %2126 = vst [vmem:[%s6060_s26 + $0x4f8] sm:$0xff] %v1998_v3  ;;  %v2082_v11 = vld [vmem:[%s7177_s8 + $0x398] sm:$0xff] }
 0x793   : > { %3494 = vst [vmem:[%s7039_s3 + $0x1b0] sm:$0xff] %v3366_v16  ;;  %v1999_v16 = vld [vmem:[%s7177_s8 + $0x100] sm:$0xff]  ;;  %2125 = vst [vmem:[%s6060_s26 + $0x4f0] sm:$0xff] %v1997_v49  ;;  %v2084_v39 = vld [vmem:[%s7177_s8 + $0x3a8] sm:$0xff] }
 0x794   : > { %3495 = vst [vmem:[%s7039_s3 + $0x1b8] sm:$0xff] %v3367_v13  ;;  %2127 = vst [vmem:[%s6060_s26 + $0x500] sm:$0xff] %v1999_v16  ;;  %v2045_v16 = vld [vmem:[%s7177_s8 + $0x270] sm:$0xff]  ;;  %v2083_v36 = vld [vmem:[%s7177_s8 + $0x3a0] sm:$0xff] }
 0x795   : > { %2167 = vst [vmem:[%s6060_s26 + $0x640] sm:$0xff] %v2039_v37  ;;  %2169 = vst [vmem:[%s6060_s26 + $0x650] sm:$0xff] %v2041_v1  ;;  %v2085_v37 = vld [vmem:[%s7177_s8 + $0x3b0] sm:$0xff]  ;;  %v2087_v1 = vld [vmem:[%s7177_s8 + $0x3c0] sm:$0xff] }
 0x796   : > { %v3133_v29 = vpop.f32.mrb[128].mxu1  ;;  %2170 = vst [vmem:[%s6060_s26 + $0x658] sm:$0xff] %v2042_v0  ;;  %2173 = vst [vmem:[%s6060_s26 + $0x670] sm:$0xff] %v2045_v16  ;;  %v2089_v0 = vld [vmem:[%s7177_s8 + $0x3d0] sm:$0xff] }
 0x797   : > { %v3368_v54 = vmul.f32 %v7032_v57, %v3133_v29  ;;  %v3135_v52 = vpop.f32.mrb[129].mxu1  ;;  %v2000_v29 = vld [vmem:[%s7177_s8 + $0x108] sm:$0xff]  ;;  %2203 = vst [vmem:[%s6060_s26 + $0x760] sm:$0xff] %v2075_v4  ;;  %2205 = vst [vmem:[%s6060_s26 + $0x770] sm:$0xff] %v2077_v35 }
 0x798   : > { %v3369_v21 = vmul.f32 %v7034_v53, %v3135_v52  ;;  %v3137_v38 = vpop.f32.mrb[130].mxu1  ;;  %v2002_v52 = vld [vmem:[%s7177_s8 + $0x118] sm:$0xff]  ;;  %2128 = vst [vmem:[%s6060_s26 + $0x508] sm:$0xff] %v2000_v29  ;;  %2206 = vst [vmem:[%s6060_s26 + $0x778] sm:$0xff] %v2078_v12 }
 0x799   : > { %3496 = vst [vmem:[%s7039_s3 + $0x1c0] sm:$0xff] %v3368_v54  ;;  %v3370_v58 = vmul.f32 %v7032_v57, %v3137_v38  ;;  %v3139_v50 = vpop.f32.mrb[131].mxu1  ;;  %v2001_v54 = vld [vmem:[%s7177_s8 + $0x110] sm:$0xff]  ;;  %2130 = vst [vmem:[%s6060_s26 + $0x518] sm:$0xff] %v2002_v52  ;;  %v2048_v52 = vld [vmem:[%s7177_s8 + $0x288] sm:$0xff] }
 0x79a   : > { %3497 = vst [vmem:[%s7039_s3 + $0x1c8] sm:$0xff] %v3369_v21  ;;  %v3371_v28 = vmul.f32 %v7034_v53, %v3139_v50  ;;  %v2004_v50 = vld [vmem:[%s7177_s8 + $0x128] sm:$0xff]  ;;  %2129 = vst [vmem:[%s6060_s26 + $0x510] sm:$0xff] %v2001_v54 }
 0x79b   : > { %3498 = vst [vmem:[%s7039_s3 + $0x1d0] sm:$0xff] %v3370_v58  ;;  %v2003_v58 = vld [vmem:[%s7177_s8 + $0x120] sm:$0xff]  ;;  %2132 = vst [vmem:[%s6060_s26 + $0x528] sm:$0xff] %v2004_v50 }
 0x79c   : > { %3499 = vst [vmem:[%s7039_s3 + $0x1d8] sm:$0xff] %v3371_v28  ;;  %v2005_v28 = vld [vmem:[%s7177_s8 + $0x130] sm:$0xff]  ;;  %2131 = vst [vmem:[%s6060_s26 + $0x520] sm:$0xff] %v2003_v58 }
 0x79d   : > { %2133 = vst [vmem:[%s6060_s26 + $0x530] sm:$0xff] %v2005_v28  ;;  %v2051_v28 = vld [vmem:[%s7177_s8 + $0x2a0] sm:$0xff]  ;;  %2176 = vst [vmem:[%s6060_s26 + $0x688] sm:$0xff] %v2048_v52 }
 0x79e   : > { %v3143_v26 = vpop.f32.mrb[132].mxu1  ;;  %2179 = vst [vmem:[%s6060_s26 + $0x6a0] sm:$0xff] %v2051_v28  ;;  %2207 = vst [vmem:[%s6060_s26 + $0x780] sm:$0xff] %v2079_v22 }
 0x79f   : > { %v3372_v45 = vmul.f32 %v7032_v57, %v3143_v26  ;;  %v3145_v30 = vpop.f32.mrb[133].mxu1  ;;  %2208 = vst [vmem:[%s6060_s26 + $0x788] sm:$0xff] %v2080_v9  ;;  %2209 = vst [vmem:[%s6060_s26 + $0x790] sm:$0xff] %v2081_v32 }
 0x7a0   : > { %v3373_v31 = vmul.f32 %v7034_v53, %v3145_v30  ;;  %v3147_v23 = vpop.f32.mrb[134].mxu1  ;;  %v2007_v30 = vld [vmem:[%s7177_s8 + $0x140] sm:$0xff]  ;;  %2210 = vst [vmem:[%s6060_s26 + $0x798] sm:$0xff] %v2082_v11  ;;  %2211 = vst [vmem:[%s6060_s26 + $0x7a0] sm:$0xff] %v2083_v36 }
 0x7a1   : > { %3500 = vst [vmem:[%s7039_s3 + $0x1e0] sm:$0xff] %v3372_v45  ;;  %v3374_v33 = vmul.f32 %v7032_v57, %v3147_v23  ;;  %v3149_v55 = vpop.f32.mrb[135].mxu1  ;;  %v2006_v45 = vld [vmem:[%s7177_s8 + $0x138] sm:$0xff]  ;;  %v2009_v23 = vld [vmem:[%s7177_s8 + $0x150] sm:$0xff]  ;;  %2135 = vst [vmem:[%s6060_s26 + $0x540] sm:$0xff] %v2007_v30 }
 0x7a2   : > { %3501 = vst [vmem:[%s7039_s3 + $0x1e8] sm:$0xff] %v3373_v31  ;;  %v3375_v17 = vmul.f32 %v7034_v53, %v3149_v55  ;;  %v2008_v31 = vld [vmem:[%s7177_s8 + $0x148] sm:$0xff]  ;;  %v2011_v55 = vld [vmem:[%s7177_s8 + $0x160] sm:$0xff]  ;;  %2134 = vst [vmem:[%s6060_s26 + $0x538] sm:$0xff] %v2006_v45 }
 0x7a3   : > { %3502 = vst [vmem:[%s7039_s3 + $0x1f0] sm:$0xff] %v3374_v33  ;;  %v2010_v33 = vld [vmem:[%s7177_s8 + $0x158] sm:$0xff]  ;;  %2136 = vst [vmem:[%s6060_s26 + $0x548] sm:$0xff] %v2008_v31  ;;  %v2053_v45 = vld [vmem:[%s7177_s8 + $0x2b0] sm:$0xff] }
 0x7a4   : > { %3503 = vst [vmem:[%s7039_s3 + $0x1f8] sm:$0xff] %v3375_v17  ;;  %v2012_v17 = vld [vmem:[%s7177_s8 + $0x168] sm:$0xff]  ;;  %2137 = vst [vmem:[%s6060_s26 + $0x550] sm:$0xff] %v2009_v23  ;;  %v2054_v31 = vld [vmem:[%s7177_s8 + $0x2b8] sm:$0xff] }
 0x7a5   : > { %2138 = vst [vmem:[%s6060_s26 + $0x558] sm:$0xff] %v2010_v33  ;;  %2139 = vst [vmem:[%s6060_s26 + $0x560] sm:$0xff] %v2011_v55  ;;  %v2055_v23 = vld [vmem:[%s7177_s8 + $0x2c0] sm:$0xff]  ;;  %v2056_v33 = vld [vmem:[%s7177_s8 + $0x2c8] sm:$0xff] }
 0x7a6   : > { %v3153_v27 = vpop.f32.mrb[136].mxu1  ;;  %2140 = vst [vmem:[%s6060_s26 + $0x568] sm:$0xff] %v2012_v17  ;;  %2181 = vst [vmem:[%s6060_s26 + $0x6b0] sm:$0xff] %v2053_v45  ;;  %v2057_v55 = vld [vmem:[%s7177_s8 + $0x2d0] sm:$0xff]  ;;  %v2058_v17 = vld [vmem:[%s7177_s8 + $0x2d8] sm:$0xff] }
 0x7a7   : > { %v3376_v41 = vmul.f32 %v7032_v57, %v3153_v27  ;;  %v3155_v14 = vpop.f32.mrb[137].mxu1  ;;  %v2016_v27 = vld [vmem:[%s7177_s8 + $0x188] sm:$0xff]  ;;  %2182 = vst [vmem:[%s6060_s26 + $0x6b8] sm:$0xff] %v2054_v31  ;;  %2183 = vst [vmem:[%s6060_s26 + $0x6c0] sm:$0xff] %v2055_v23 }
 0x7a8   : > { %v3377_v10 = vmul.f32 %v7034_v53, %v3155_v14  ;;  %v3157_v61 = vpop.f32.mrb[138].mxu1  ;;  %v2020_v14 = vld [vmem:[%s7177_s8 + $0x1a8] sm:$0xff]  ;;  %2144 = vst [vmem:[%s6060_s26 + $0x588] sm:$0xff] %v2016_v27  ;;  %2184 = vst [vmem:[%s6060_s26 + $0x6c8] sm:$0xff] %v2056_v33  ;;  %v2062_v27 = vld [vmem:[%s7177_s8 + $0x2f8] sm:$0xff] }
 0x7a9   : > { %3504 = vst [vmem:[%s7039_s3 + $0x200] sm:$0xff] %v3376_v41  ;;  %v3378_v47 = vmul.f32 %v7032_v57, %v3157_v61  ;;  %v3159_v18 = vpop.f32.mrb[139].mxu1  ;;  %v2019_v41 = vld [vmem:[%s7177_s8 + $0x1a0] sm:$0xff]  ;;  %2148 = vst [vmem:[%s6060_s26 + $0x5a8] sm:$0xff] %v2020_v14  ;;  %v2066_v14 = vld [vmem:[%s7177_s8 + $0x318] sm:$0xff] }
 0x7aa   : > { %3505 = vst [vmem:[%s7039_s3 + $0x208] sm:$0xff] %v3377_v10  ;;  %v3379_v56 = vmul.f32 %v7034_v53, %v3159_v18  ;;  %v2022_v10 = vld [vmem:[%s7177_s8 + $0x1b8] sm:$0xff]  ;;  %v2023_v61 = vld [vmem:[%s7177_s8 + $0x1c0] sm:$0xff]  ;;  %2147 = vst [vmem:[%s6060_s26 + $0x5a0] sm:$0xff] %v2019_v41 }
 0x7ab   : > { %3506 = vst [vmem:[%s7039_s3 + $0x210] sm:$0xff] %v3378_v47  ;;  %v2025_v47 = vld [vmem:[%s7177_s8 + $0x1d0] sm:$0xff]  ;;  %v2026_v18 = vld [vmem:[%s7177_s8 + $0x1d8] sm:$0xff]  ;;  %2150 = vst [vmem:[%s6060_s26 + $0x5b8] sm:$0xff] %v2022_v10 }
 0x7ac   : > { %3507 = vst [vmem:[%s7039_s3 + $0x218] sm:$0xff] %v3379_v56  ;;  %2151 = vst [vmem:[%s6060_s26 + $0x5c0] sm:$0xff] %v2023_v61  ;;  %v2028_v56 = vld [vmem:[%s7177_s8 + $0x1e8] sm:$0xff]  ;;  %v2069_v61 = vld [vmem:[%s7177_s8 + $0x330] sm:$0xff] }
 0x7ad   : > { %2153 = vst [vmem:[%s6060_s26 + $0x5d0] sm:$0xff] %v2025_v47  ;;  %2154 = vst [vmem:[%s6060_s26 + $0x5d8] sm:$0xff] %v2026_v18  ;;  %v2072_v18 = vld [vmem:[%s7177_s8 + $0x348] sm:$0xff] }
 0x7ae   : > { %v3163_v60 = vpop.f32.mrb[140].mxu1  ;;  %2156 = vst [vmem:[%s6060_s26 + $0x5e8] sm:$0xff] %v2028_v56  ;;  %2185 = vst [vmem:[%s6060_s26 + $0x6d0] sm:$0xff] %v2057_v55 }
 0x7af   : > { %v3380_v34 = vmul.f32 %v7032_v57, %v3163_v60  ;;  %v3165_v63 = vpop.f32.mrb[141].mxu1  ;;  %v2040_v60 = vld [vmem:[%s7177_s8 + $0x248] sm:$0xff]  ;;  %2186 = vst [vmem:[%s6060_s26 + $0x6d8] sm:$0xff] %v2058_v17  ;;  %2190 = vst [vmem:[%s6060_s26 + $0x6f8] sm:$0xff] %v2062_v27 }
 0x7b0   : > { %v3381_v40 = vmul.f32 %v7034_v53, %v3165_v63  ;;  %v3167_v13 = vpop.f32.mrb[142].mxu1  ;;  %v2044_v63 = vld [vmem:[%s7177_s8 + $0x268] sm:$0xff]  ;;  %2168 = vst [vmem:[%s6060_s26 + $0x648] sm:$0xff] %v2040_v60  ;;  %2194 = vst [vmem:[%s6060_s26 + $0x718] sm:$0xff] %v2066_v14  ;;  %v2086_v60 = vld [vmem:[%s7177_s8 + $0x3b8] sm:$0xff] }
 0x7b1   : > { %3508 = vst [vmem:[%s7039_s3 + $0x220] sm:$0xff] %v3380_v34  ;;  %v3382_v21 = vmul.f32 %v7032_v57, %v3167_v13  ;;  %v3169_v38 = vpop.f32.mrb[143].mxu1  ;;  %v2043_v34 = vld [vmem:[%s7177_s8 + $0x260] sm:$0xff]  ;;  %2172 = vst [vmem:[%s6060_s26 + $0x668] sm:$0xff] %v2044_v63  ;;  %v2090_v63 = vld [vmem:[%s7177_s8 + $0x3d8] sm:$0xff] }
 0x7b2   : > { %3509 = vst [vmem:[%s7039_s3 + $0x228] sm:$0xff] %v3381_v40  ;;  %v3383_v26 = vmul.f32 %v7034_v53, %v3169_v38  ;;  %v2046_v40 = vld [vmem:[%s7177_s8 + $0x278] sm:$0xff]  ;;  %v2047_v13 = vld [vmem:[%s7177_s8 + $0x280] sm:$0xff]  ;;  %2171 = vst [vmem:[%s6060_s26 + $0x660] sm:$0xff] %v2043_v34 }
 0x7b3   : > { %3510 = vst [vmem:[%s7039_s3 + $0x230] sm:$0xff] %v3382_v21  ;;  %v2049_v21 = vld [vmem:[%s7177_s8 + $0x290] sm:$0xff]  ;;  %v2050_v38 = vld [vmem:[%s7177_s8 + $0x298] sm:$0xff]  ;;  %2174 = vst [vmem:[%s6060_s26 + $0x678] sm:$0xff] %v2046_v40 }
 0x7b4   : > { %3511 = vst [vmem:[%s7039_s3 + $0x238] sm:$0xff] %v3383_v26  ;;  %2175 = vst [vmem:[%s6060_s26 + $0x680] sm:$0xff] %v2047_v13  ;;  %v2052_v26 = vld [vmem:[%s7177_s8 + $0x2a8] sm:$0xff]  ;;  %v2093_v13 = vld [vmem:[%s7177_s8 + $0x3f0] sm:$0xff] }
 0x7b5   : > { %2177 = vst [vmem:[%s6060_s26 + $0x690] sm:$0xff] %v2049_v21  ;;  %2178 = vst [vmem:[%s6060_s26 + $0x698] sm:$0xff] %v2050_v38 }
 0x7b6   : > { %v3173_v62 = vpop.f32.mrb[144].mxu1  ;;  %2180 = vst [vmem:[%s6060_s26 + $0x6a8] sm:$0xff] %v2052_v26  ;;  %2197 = vst [vmem:[%s6060_s26 + $0x730] sm:$0xff] %v2069_v61 }
 0x7b7   : > { %v3384_v24 = vmul.f32 %v7032_v57, %v3173_v62  ;;  %v3175_v59 = vpop.f32.mrb[145].mxu1  ;;  %v2064_v62 = vld [vmem:[%s7177_s8 + $0x308] sm:$0xff]  ;;  %2200 = vst [vmem:[%s6060_s26 + $0x748] sm:$0xff] %v2072_v18  ;;  %2212 = vst [vmem:[%s6060_s26 + $0x7a8] sm:$0xff] %v2084_v39 }
 0x7b8   : > { %v3385_v19 = vmul.f32 %v7034_v53, %v3175_v59  ;;  %v3177_v2 = vpop.f32.mrb[146].mxu1  ;;  %v2068_v59 = vld [vmem:[%s7177_s8 + $0x328] sm:$0xff]  ;;  %2192 = vst [vmem:[%s6060_s26 + $0x708] sm:$0xff] %v2064_v62  ;;  %2213 = vst [vmem:[%s6060_s26 + $0x7b0] sm:$0xff] %v2085_v37 }
 0x7b9   : > { %3512 = vst [vmem:[%s7039_s3 + $0x240] sm:$0xff] %v3384_v24  ;;  %v3386_v8 = vmul.f32 %v7032_v57, %v3177_v2  ;;  %v3179_v25 = vpop.f32.mrb[147].mxu1  ;;  %v2067_v24 = vld [vmem:[%s7177_s8 + $0x320] sm:$0xff]  ;;  %2196 = vst [vmem:[%s6060_s26 + $0x728] sm:$0xff] %v2068_v59 }
 0x7ba   : > { %3513 = vst [vmem:[%s7039_s3 + $0x248] sm:$0xff] %v3385_v19  ;;  %v3387_v20 = vmul.f32 %v7034_v53, %v3179_v25  ;;  %v2070_v19 = vld [vmem:[%s7177_s8 + $0x338] sm:$0xff]  ;;  %v2071_v2 = vld [vmem:[%s7177_s8 + $0x340] sm:$0xff]  ;;  %2195 = vst [vmem:[%s6060_s26 + $0x720] sm:$0xff] %v2067_v24 }
 0x7bb   : > { %3514 = vst [vmem:[%s7039_s3 + $0x250] sm:$0xff] %v3386_v8  ;;  %v2073_v8 = vld [vmem:[%s7177_s8 + $0x350] sm:$0xff]  ;;  %v2074_v25 = vld [vmem:[%s7177_s8 + $0x358] sm:$0xff]  ;;  %2198 = vst [vmem:[%s6060_s26 + $0x738] sm:$0xff] %v2070_v19 }
 0x7bc   : > { %3515 = vst [vmem:[%s7039_s3 + $0x258] sm:$0xff] %v3387_v20  ;;  %2199 = vst [vmem:[%s6060_s26 + $0x740] sm:$0xff] %v2071_v2  ;;  %v2076_v20 = vld [vmem:[%s7177_s8 + $0x368] sm:$0xff] }
 0x7bd   : > { %2201 = vst [vmem:[%s6060_s26 + $0x750] sm:$0xff] %v2073_v8  ;;  %2202 = vst [vmem:[%s6060_s26 + $0x758] sm:$0xff] %v2074_v25 }
 0x7be   : > { %v3183_v46 = vpop.f32.mrb[148].mxu1  ;;  %2204 = vst [vmem:[%s6060_s26 + $0x768] sm:$0xff] %v2076_v20  ;;  %2214 = vst [vmem:[%s6060_s26 + $0x7b8] sm:$0xff] %v2086_v60 }
 0x7bf   : > { %v3388_v49 = vmul.f32 %v7032_v57, %v3183_v46  ;;  %v3185_v3 = vpop.f32.mrb[149].mxu1  ;;  %v2088_v46 = vld [vmem:[%s7177_s8 + $0x3c8] sm:$0xff]  ;;  %2215 = vst [vmem:[%s6060_s26 + $0x7c0] sm:$0xff] %v2087_v1  ;;  %2217 = vst [vmem:[%s6060_s26 + $0x7d0] sm:$0xff] %v2089_v0 }
 0x7c0   : > { %v3389_v29 = vmul.f32 %v7034_v53, %v3185_v3  ;;  %v3187_v54 = vpop.f32.mrb[150].mxu1  ;;  %v2092_v3 = vld [vmem:[%s7177_s8 + $0x3e8] sm:$0xff]  ;;  %2216 = vst [vmem:[%s6060_s26 + $0x7c8] sm:$0xff] %v2088_v46  ;;  %2218 = vst [vmem:[%s6060_s26 + $0x7d8] sm:$0xff] %v2090_v63 }
 0x7c1   : > { %3516 = vst [vmem:[%s7039_s3 + $0x260] sm:$0xff] %v3388_v49  ;;  %v3390_v58 = vmul.f32 %v7032_v57, %v3187_v54  ;;  %v3189_v50 = vpop.f32.mrb[151].mxu1  ;;  %v2091_v49 = vld [vmem:[%s7177_s8 + $0x3e0] sm:$0xff]  ;;  %2220 = vst [vmem:[%s6060_s26 + $0x7e8] sm:$0xff] %v2092_v3 }
 0x7c2   : > { %3517 = vst [vmem:[%s7039_s3 + $0x268] sm:$0xff] %v3389_v29  ;;  %v3391_v30 = vmul.f32 %v7034_v53, %v3189_v50  ;;  %v2094_v29 = vld [vmem:[%s7177_s8 + $0x3f8] sm:$0xff]  ;;  %2219 = vst [vmem:[%s6060_s26 + $0x7e0] sm:$0xff] %v2091_v49 }
 0x7c3   : > { %3518 = vst [vmem:[%s7039_s3 + $0x270] sm:$0xff] %v3390_v58  ;;  %2221 = vst [vmem:[%s6060_s26 + $0x7f0] sm:$0xff] %v2093_v13 }
 0x7c4   : > { %3519 = vst [vmem:[%s7039_s3 + $0x278] sm:$0xff] %v3391_v30  ;;  %2222 = vst [vmem:[%s6060_s26 + $0x7f8] sm:$0xff] %v2094_v29 }
 0x7c6   : > { %v3193_v41 = vpop.f32.mrb[152].mxu1 }
 0x7c7   : > { %v3392_v6 = vmul.f32 %v7032_v57, %v3193_v41  ;;  %v3195_v10 = vpop.f32.mrb[153].mxu1 }
 0x7c8   : > { %v3393_v51 = vmul.f32 %v7034_v53, %v3195_v10  ;;  %v3197_v47 = vpop.f32.mrb[154].mxu1 }
 0x7c9   : > { %3520 = vst [vmem:[%s7039_s3 + $0x280] sm:$0xff] %v3392_v6  ;;  %v3394_v15 = vmul.f32 %v7032_v57, %v3197_v47  ;;  %v3199_v56 = vpop.f32.mrb[155].mxu1 }
 0x7ca   : > { %3521 = vst [vmem:[%s7039_s3 + $0x288] sm:$0xff] %v3393_v51  ;;  %v3395_v5 = vmul.f32 %v7034_v53, %v3199_v56 }
 0x7cb   : > { %3522 = vst [vmem:[%s7039_s3 + $0x290] sm:$0xff] %v3394_v15 }
 0x7cc   : > { %3523 = vst [vmem:[%s7039_s3 + $0x298] sm:$0xff] %v3395_v5 }
 0x7ce   : > { %v3203_v34 = vpop.f32.mrb[156].mxu1 }
 0x7cf   : > { %v3396_v16 = vmul.f32 %v7032_v57, %v3203_v34  ;;  %v3205_v40 = vpop.f32.mrb[157].mxu1 }
 0x7d0   : > { %v3397_v54 = vmul.f32 %v7034_v53, %v3205_v40  ;;  %v3207_v52 = vpop.f32.mrb[158].mxu1 }
 0x7d1   : > { %3524 = vst [vmem:[%s7039_s3 + $0x2a0] sm:$0xff] %v3396_v16  ;;  %v3398_v21 = vmul.f32 %v7032_v57, %v3207_v52  ;;  %v3209_v38 = vpop.f32.mrb[159].mxu1 }
 0x7d2   : > { %4433 = shalt.err (!%p4430_p2)
}
 0x7d3   : > { %s4434_s16 = scalar_lea.hbm %s7467_s18, 32768  ;;  %s4438_s13 = scalar_lea.hbm %s7663_s5, 65536 }
 0x7d4   : > { %p4435_p3 = scmp.ne.s32.totalorder %s7467_s18, %s4434_s16  ;;  %p4439_p1 = scmp.lt.u32.totalorder %s7467_s18, %s7663_s5 }
 0x7d5   : > { %p4440_p6 = scmp.lt.u32.totalorder %s4438_s13, %s4434_s16  ;;  %p4442_p5 = scmp.lt.u32.totalorder %s4434_s16, %s7467_s18 }
 0x7d6   : > { %p4436_p11 = pnand %p4435_p3, %p8231_p10 }
 0x7d7   : > { %p4441_p8 = por %p4440_p6, %p4439_p1 }
 0x7d8   : > { %p4437_p9 = pneg %p4436_p11 }
 0x7d9   : > { %p4443_p12 = por %p4442_p5, %p4441_p8 }
 0x7db   : > { %p4444_p7 = pnand %p4443_p12, %p4437_p9 }
 0x7dd   : > { %4447 = shalt.err (!%p4444_p7)
}
 0x7de   : > { %s4555_s27 = smov 256   ;;  %s4556_s26 = smov 16   ;;  %3525 = vst [vmem:[%s7039_s3 + $0x2a8] sm:$0xff] %v3397_v54  ;;  %v3399_v58 = vmul.f32 %v7034_v53, %v3209_v38  ;;  %3526 = vst [vmem:[%s7039_s3 + $0x2b0] sm:$0xff] %v3398_v21  ;;  %v3213_v50 = vpop.f32.mrb[160].mxu1 }
 0x7df   : > { %3890 = dma.vmem_to_hbm [thread:$0]  (%p8231_p10), %s7469_s14, 32768, %s7467_s18, %s3569_s11, %s4555_s27, %s4555_s27, %s4556_s26   ;;  %v3400_v28 = vmul.f32 %v7032_v57, %v3213_v50  ;;  %v3215_v26 = vpop.f32.mrb[161].mxu1 }
 0x7e0   : > { %3527 = vst [vmem:[%s7039_s3 + $0x2b8] sm:$0xff] %v3399_v58  ;;  %v3401_v45 = vmul.f32 %v7034_v53, %v3215_v26  ;;  %v3217_v30 = vpop.f32.mrb[162].mxu1  ;;  %s3845_s8 = sshll.u32 %s4534_s24, 14  ;;  %s3607_s7 = sshll.u32 %s7039_s3, 4  ;;  %s7604_s7 = int_to_ptr.vmem [resolvable:$true] %s3607_s7 }
 0x7e1   : > { %3528 = vst [vmem:[%s7039_s3 + $0x2c0] sm:$0xff] %v3400_v28  ;;  %v3402_v31 = vmul.f32 %v7032_v57, %v3217_v30  ;;  %v3219_v23 = vpop.f32.mrb[163].mxu1  ;;  %s7602_s15 = scalar_lea.hbm %s7664_s6, %s3845_s8  ;;  %s3574_s24 = scalar_lea.sflag [#allocation13], %s4886_s20 }
 0x7e2   : > { %3529 = vst [vmem:[%s7039_s3 + $0x2c8] sm:$0xff] %v3401_v45  ;;  %v3403_v33 = vmul.f32 %v7034_v53, %v3219_v23  ;;  %v3223_v55 = vpop.f32.mrb[164].mxu1  ;;  %s4448_s18 = scalar_lea.vmem %s7604_s7, 16384  ;;  %s4557_s11 = smov [#allocation12]  }
 0x7e3   : > { %3530 = vst [vmem:[%s7039_s3 + $0x2d0] sm:$0xff] %v3402_v31  ;;  %v3404_v17 = vmul.f32 %v7032_v57, %v3223_v55  ;;  %v3225_v43 = vpop.f32.mrb[165].mxu1  ;;  %p4449_p4 = scmp.ne.s32.totalorder %s7604_s7, %s4448_s18  ;;  %s4452_s30 = sshll.u32 %s4557_s11, 4  ;;  %s4453_s30 = int_to_ptr.vmem [resolvable:$false] %s4452_s30 }
 0x7e4   : > { %3531 = vst [vmem:[%s7039_s3 + $0x2d8] sm:$0xff] %v3403_v33  ;;  %v3405_v7 = vmul.f32 %v7034_v53, %v3225_v43  ;;  %v3227_v48 = vpop.f32.mrb[166].mxu1  ;;  %s4454_s1 = scalar_lea.vmem %s4453_s30, 32768  ;;  %p4455_p2 = scmp.lt.s32.totalorder %s7604_s7, %s4453_s30 }
 0x7e5   : > { %3532 = vst [vmem:[%s7039_s3 + $0x2e0] sm:$0xff] %v3404_v17  ;;  %v3406_v27 = vmul.f32 %v7032_v57, %v3227_v48  ;;  %v3229_v44 = vpop.f32.mrb[167].mxu1  ;;  %p4450_p13 = pnand %p4449_p4, %p8231_p10  ;;  %p4456_p3 = scmp.lt.s32.totalorder %s4454_s1, %s4448_s18 }
 0x7e6   : > { %3533 = vst [vmem:[%s7039_s3 + $0x2e8] sm:$0xff] %v3405_v7  ;;  %v3407_v62 = vmul.f32 %v7034_v53, %v3229_v44  ;;  %v3233_v42 = vpop.f32.mrb[168].mxu1 }
 0x7e7   : > { %3534 = vst [vmem:[%s7039_s3 + $0x2f0] sm:$0xff] %v3406_v27  ;;  %v3408_v41 = vmul.f32 %v7032_v57, %v3233_v42  ;;  %v3235_v14 = vpop.f32.mrb[169].mxu1  ;;  %p4451_p0 = pneg %p4450_p13  ;;  %p4457_p11 = por %p4456_p3, %p4455_p2 }
 0x7e8   : > { %3535 = vst [vmem:[%s7039_s3 + $0x2f8] sm:$0xff] %v3407_v62  ;;  %v3409_v24 = vmul.f32 %v7034_v53, %v3235_v14  ;;  %v3237_v59 = vpop.f32.mrb[170].mxu1 }
 0x7e9   : > { %3536 = vst [vmem:[%s7039_s3 + $0x300] sm:$0xff] %v3408_v41  ;;  %v3410_v6 = vmul.f32 %v7032_v57, %v3237_v59  ;;  %v3239_v10 = vpop.f32.mrb[171].mxu1  ;;  %p4458_p9 = pnand %p4457_p11, %p4451_p0 }
 0x7ea   : > { %3537 = vst [vmem:[%s7039_s3 + $0x308] sm:$0xff] %v3409_v24  ;;  %v3411_v61 = vmul.f32 %v7034_v53, %v3239_v10 }
 0x7eb   : > { %3538 = vst [vmem:[%s7039_s3 + $0x310] sm:$0xff] %v3410_v6 }
 0x7ec   : > { %3539 = vst [vmem:[%s7039_s3 + $0x318] sm:$0xff] %v3411_v61 }
 0x7ee   : > { %v3243_v19 = vpop.f32.mrb[172].mxu1 }
 0x7ef   : > { %v3412_v2 = vmul.f32 %v7032_v57, %v3243_v19  ;;  %v3245_v51 = vpop.f32.mrb[173].mxu1 }
 0x7f0   : > { %v3413_v47 = vmul.f32 %v7034_v53, %v3245_v51  ;;  %v3247_v18 = vpop.f32.mrb[174].mxu1 }
 0x7f1   : > { %3540 = vst [vmem:[%s7039_s3 + $0x320] sm:$0xff] %v3412_v2  ;;  %v3414_v8 = vmul.f32 %v7032_v57, %v3247_v18  ;;  %v3249_v25 = vpop.f32.mrb[175].mxu1 }
 0x7f2   : > { %3541 = vst [vmem:[%s7039_s3 + $0x328] sm:$0xff] %v3413_v47  ;;  %v3415_v15 = vmul.f32 %v7034_v53, %v3249_v25 }
 0x7f3   : > { %3542 = vst [vmem:[%s7039_s3 + $0x330] sm:$0xff] %v3414_v8 }
 0x7f4   : > { %3543 = vst [vmem:[%s7039_s3 + $0x338] sm:$0xff] %v3415_v15 }
 0x7f6   : > { %v3253_v56 = vpop.f32.mrb[176].mxu1 }
 0x7f7   : > { %v3416_v4 = vmul.f32 %v7032_v57, %v3253_v56  ;;  %v3255_v20 = vpop.f32.mrb[177].mxu1 }
 0x7f8   : > { %v3417_v35 = vmul.f32 %v7034_v53, %v3255_v20  ;;  %v3257_v5 = vpop.f32.mrb[178].mxu1 }
 0x7f9   : > { %3544 = vst [vmem:[%s7039_s3 + $0x340] sm:$0xff] %v3416_v4  ;;  %v3418_v12 = vmul.f32 %v7032_v57, %v3257_v5  ;;  %v3259_v22 = vpop.f32.mrb[179].mxu1 }
 0x7fa   : > { %3545 = vst [vmem:[%s7039_s3 + $0x348] sm:$0xff] %v3417_v35  ;;  %v3419_v9 = vmul.f32 %v7034_v53, %v3259_v22 }
 0x7fb   : > { %3546 = vst [vmem:[%s7039_s3 + $0x350] sm:$0xff] %v3418_v12 }
 0x7fc   : > { %3547 = vst [vmem:[%s7039_s3 + $0x358] sm:$0xff] %v3419_v9 }
 0x7fe   : > { %v3263_v32 = vpop.f32.mrb[180].mxu1 }
 0x7ff   : > { %v3420_v11 = vmul.f32 %v7032_v57, %v3263_v32  ;;  %v3265_v36 = vpop.f32.mrb[181].mxu1 }
 0x800   : > { %v3421_v39 = vmul.f32 %v7034_v53, %v3265_v36  ;;  %v3267_v37 = vpop.f32.mrb[182].mxu1 }
 0x801   : > { %3548 = vst [vmem:[%s7039_s3 + $0x360] sm:$0xff] %v3420_v11  ;;  %v3422_v60 = vmul.f32 %v7032_v57, %v3267_v37  ;;  %v3269_v1 = vpop.f32.mrb[183].mxu1 }
 0x802   : > { %3549 = vst [vmem:[%s7039_s3 + $0x368] sm:$0xff] %v3421_v39  ;;  %v3423_v46 = vmul.f32 %v7034_v53, %v3269_v1 }
 0x803   : > { %3550 = vst [vmem:[%s7039_s3 + $0x370] sm:$0xff] %v3422_v60 }
 0x804   : > { %3551 = vst [vmem:[%s7039_s3 + $0x378] sm:$0xff] %v3423_v46 }
 0x806   : > { %v3273_v0 = vpop.f32.mrb[184].mxu1 }
 0x807   : > { %v3424_v34 = vmul.f32 %v7032_v57, %v3273_v0  ;;  %v3275_v63 = vpop.f32.mrb[185].mxu1 }
 0x808   : > { %v3425_v49 = vmul.f32 %v7034_v53, %v3275_v63  ;;  %v3277_v3 = vpop.f32.mrb[186].mxu1 }
 0x809   : > { %3552 = vst [vmem:[%s7039_s3 + $0x380] sm:$0xff] %v3424_v34  ;;  %v3426_v16 = vmul.f32 %v7032_v57, %v3277_v3  ;;  %v3279_v40 = vpop.f32.mrb[187].mxu1 }
 0x80a   : > { %3553 = vst [vmem:[%s7039_s3 + $0x388] sm:$0xff] %v3425_v49  ;;  %v3427_v13 = vmul.f32 %v7034_v53, %v3279_v40 }
 0x80b   : > { %3554 = vst [vmem:[%s7039_s3 + $0x390] sm:$0xff] %v3426_v16 }
 0x80c   : > { %3555 = vst [vmem:[%s7039_s3 + $0x398] sm:$0xff] %v3427_v13 }
 0x80e   : > { %v3283_v29 = vpop.f32.mrb[188].mxu1 }
 0x80f   : > { %v3428_v54 = vmul.f32 %v7032_v57, %v3283_v29  ;;  %v3285_v52 = vpop.f32.mrb[189].mxu1 }
 0x810   : > { %v3429_v21 = vmul.f32 %v7034_v53, %v3285_v52  ;;  %v3287_v38 = vpop.f32.mrb[190].mxu1 }
 0x811   : > { %3556 = vst [vmem:[%s7039_s3 + $0x3a0] sm:$0xff] %v3428_v54  ;;  %v3430_v58 = vmul.f32 %v7032_v57, %v3287_v38  ;;  %v3289_v50 = vpop.f32.mrb[191].mxu1 }
 0x812   : > { %3557 = vst [vmem:[%s7039_s3 + $0x3a8] sm:$0xff] %v3429_v21  ;;  %v3431_v28 = vmul.f32 %v7034_v53, %v3289_v50 }
 0x813   : > { %3558 = vst [vmem:[%s7039_s3 + $0x3b0] sm:$0xff] %v3430_v58 }
 0x814   : > { %3559 = vst [vmem:[%s7039_s3 + $0x3b8] sm:$0xff] %v3431_v28 }
 0x816   : > { %v3293_v26 = vpop.f32.mrb[192].mxu1 }
 0x817   : > { %v3432_v45 = vmul.f32 %v7032_v57, %v3293_v26  ;;  %v3295_v30 = vpop.f32.mrb[193].mxu1 }
 0x818   : > { %v3433_v31 = vmul.f32 %v7034_v53, %v3295_v30  ;;  %v3297_v23 = vpop.f32.mrb[194].mxu1 }
 0x819   : > { %3560 = vst [vmem:[%s7039_s3 + $0x3c0] sm:$0xff] %v3432_v45  ;;  %v3434_v33 = vmul.f32 %v7032_v57, %v3297_v23  ;;  %v3299_v55 = vpop.f32.mrb[195].mxu1 }
 0x81a   : > { %3561 = vst [vmem:[%s7039_s3 + $0x3c8] sm:$0xff] %v3433_v31  ;;  %v3435_v17 = vmul.f32 %v7034_v53, %v3299_v55 }
 0x81b   : > { %3562 = vst [vmem:[%s7039_s3 + $0x3d0] sm:$0xff] %v3434_v33 }
 0x81c   : > { %3563 = vst [vmem:[%s7039_s3 + $0x3d8] sm:$0xff] %v3435_v17 }
 0x81e   : > { %v3303_v43 = vpop.f32.mrb[196].mxu1 }
 0x81f   : > { %v3436_v7 = vmul.f32 %v7032_v57, %v3303_v43  ;;  %v3305_v48 = vpop.f32.mrb[197].mxu1 }
 0x820   : > { %v3437_v27 = vmul.f32 %v7034_v53, %v3305_v48  ;;  %v3307_v44 = vpop.f32.mrb[198].mxu1 }
 0x821   : > { %3564 = vst [vmem:[%s7039_s3 + $0x3e0] sm:$0xff] %v3436_v7  ;;  %v3438_v62 = vmul.f32 %v7032_v57, %v3307_v44  ;;  %v3309_v42 = vpop.f32.mrb[199].mxu1 }
 0x822   : > { %3565 = vst [vmem:[%s7039_s3 + $0x3e8] sm:$0xff] %v3437_v27  ;;  %v3439_v41 = vmul.f32 %v7034_v53, %v3309_v42 }
 0x823   : > { %3566 = vst [vmem:[%s7039_s3 + $0x3f0] sm:$0xff] %v3438_v62 }
 0x824   : > { %3567 = vst [vmem:[%s7039_s3 + $0x3f8] sm:$0xff] %v3439_v41 }
 0x825   : > { %4461 = shalt.err (!%p4458_p9)
}
 0x826   : > { %s4462_s3 = scalar_lea.hbm %s7602_s15, 16384  ;;  %s4466_s16 = scalar_lea.hbm %s7664_s6, 32768 }
 0x827   : > { %p4463_p1 = scmp.ne.s32.totalorder %s7602_s15, %s4462_s3  ;;  %p4467_p5 = scmp.lt.u32.totalorder %s7602_s15, %s7664_s6 }
 0x828   : > { %p4468_p12 = scmp.lt.u32.totalorder %s4466_s16, %s4462_s3  ;;  %p4470_p4 = scmp.lt.u32.totalorder %s4462_s3, %s7602_s15 }
 0x829   : > { %p4464_p6 = pnand %p4463_p1, %p8231_p10 }
 0x82a   : > { %p4469_p7 = por %p4468_p12, %p4467_p5 }
 0x82b   : > { %p4465_p8 = pneg %p4464_p6 }
 0x82c   : > { %p4471_p13 = por %p4470_p4, %p4469_p7 }
 0x82e   : > { %p4472_p0 = pnand %p4471_p13, %p4465_p8 }
 0x830   : > { %4475 = shalt.err (!%p4472_p0)
}
 0x831   : > { %3891 = dma.vmem_to_hbm [thread:$0]  (%p8231_p10), %s7604_s7, 16384, %s7602_s15, %s3574_s24, %s4555_s27, %s4555_s27, %s4556_s26  }
 0x832 PF: > { %s8232_s13 = sld [smem:[#allocation21_spill]]  ;;  %s3622_s10 = sand.u32 1, %s4522_s21  }
 0x833   : > { %p8233_p2 = scmp.ne.s32.totalorder %s7867_s12, 0  ;;  %s3623_s19 = scalar_lea.sflag [#allocation4], %s3622_s10 }
 0x838   : > { %p8234_p3 = scmp.ge.s32.totalorder %s8232_s13, 2 }
 0x83a   : > { %p3912_p11 = pnand %p8234_p3, %p8233_p2 }
 0x83c   : > { %4513 = dma.done.wait (!%p3912_p11), %s3623_s19, 32768  }
 0x83d   : > { %4515 = vsyncadd (!%p3912_p11), %s3623_s19, 4294934528  ;;  %s3632_s28 = scalar_lea.sflag [#allocation13], %s3622_s10 }
 0x83e   : > { %4517 = dma.done.wait (!%p3912_p11), %s3632_s28, 16384  }
 0x83f   : > { %4519 = vsyncadd (!%p3912_p11), %s3632_s28, 4294950912  ;;  %s30_s26 = sadd.s32 1, %s8232_s13   ;;  %s8235_s20 = sld [smem:[#allocation19_spill]] }
 0x840   : > { %p27_p9 = scmp.ge.s32.totalorder %s30_s26, 4   ;;  %s8236_s23 = sld [smem:[#allocation23_spill]] }
 0x841   : > { %s8237_s24 = sld [smem:[#allocation20_spill]]  ;;  %s8238_s25 = sld [smem:[#allocation22_spill]] }
 0x842   : > { %s8239_s21 = smov %s4526_s22  ;;  %29 = sbr.rel (!%p27_p9) target bundleno = 14 (0xe), region = 142 }
 0x845   : > { %s8240_s22 = smov %s8235_s20 }
 0x849   :  { %3637 = vsyncpa [#allocation3], 1 }
 0x84a   :  { %3639 = vsyncpa [#allocation3 + $0x1], 1 }
 0x84b   :  { %3640 = vsyncpa [#allocation6], 1 }
 0x84c   :  { %3642 = vsyncpa [#allocation6 + $0x1], 1 }
 0x84d   :  { %3643 = vsyncpa [#allocation9], 1 }
 0x84e   :  { %3645 = vsyncpa [#allocation9 + $0x1], 1 }
 0x84f   :  { %3646 = vsyncpa [#allocation4], 1 }
 0x850   :  { %3648 = vsyncpa [#allocation4 + $0x1], 1 }
 0x851   :  { %3649 = vsyncpa [#allocation13], 1 }
 0x852   :  { %3651 = vsyncpa [#allocation13 + $0x1], 1 }

</bundles_post_ra>
